<compile_context>
chip_gen: v5e
topology: v5e:2x2
jax: 0.10.0
libtpu: 0.0.40
codegen_flags: <defaults>
</compile_context>

<pallas_src>
import functools

import jax
import jax.numpy as jnp
from jax.experimental import pallas as pl
from jax.experimental.pallas import tpu as pltpu


def _round_up(a, m):
    return (a + m - 1) // m * m


def _layer_block_kernel(x_ref, w1_ref, b1_ref, w2_ref, b2_ref, o_ref, *,
                        K, C_in, C_out, W1out, Wp):
    """One tile of TB batch-rows (rows live on the lane axis).

    x_ref : (C_in, W, TB)      VMEM  input, channels-first, rows on lanes
    w1_ref: (C_out, C_in)      SMEM  1x1 conv weight (stride (1,2))
    b1_ref: (1, C_out)         SMEM
    w2_ref: (C_out, C_in*K)    SMEM  (1,K) conv weight, flat index ci*K + dk
    b2_ref: (1, C_out)         SMEM
    o_ref : (C_out, Wp, TB)    VMEM  relu(maxpool(conv1) + conv0[..., -Wp:])
    """
    # (1,K)-conv taps at the even / odd output columns that feed the max-pool.
    xe = [x_ref[:, pl.ds(dk, Wp + 1, stride=2), :] for dk in range(K)]   # (C_in, Wp+1, TB)
    xo = [x_ref[:, pl.ds(dk + 1, Wp, stride=2), :] for dk in range(K)]   # (C_in, Wp,   TB)
    # Even input columns feeding the trailing Wp outputs of the stride-2 1x1 conv.
    xr = x_ref[:, pl.ds(2 * (W1out - Wp), Wp, stride=2), :]              # (C_in, Wp, TB)

    for co in range(C_out):
        # conv_output1 at even (acc_e) and odd (acc_o) columns: scalar-weight VPU FMAs.
        acc_e = None
        acc_o = None
        for ci in range(C_in):
            for dk in range(K):
                w = w2_ref[co, ci * K + dk]
                pe = xe[dk][ci] * w
                po = xo[dk][ci] * w
                acc_e = pe if acc_e is None else acc_e + pe
                acc_o = po if acc_o is None else acc_o + po
        acc_e = acc_e + b2_ref[0, co]
        acc_o = acc_o + b2_ref[0, co]

        # MaxPool2d kernel (1,3), stride (1,2), no padding:
        # m[i] = max(y2[2i], y2[2i+1], y2[2i+2])
        m = jnp.maximum(jnp.maximum(acc_e[:Wp, :], acc_o), acc_e[1:Wp + 1, :])

        # conv_output (1x1, stride (1,2)) at the trailing Wp columns only (residual).
        res = b1_ref[0, co]
        for ci in range(C_in):
            res = res + xr[ci] * w1_ref[co, ci]

        o_ref[co, :, :] = jnp.maximum(m + res, 0.0)


def layer_block_forward(x_nchw, w1, b1, w2, b2):
    """x_nchw: (N, C_in, H, W) f32 (PyTorch NCHW).  Returns (N, C_out, H, Wp) f32."""
    N, C_in, H, W = x_nchw.shape
    C_out = w1.shape[0]
    K = w2.shape[3]
    W1out = (W - 1) // 2 + 1          # 1x1 conv, stride 2, no padding
    W2out = W - K + 1                 # (1,K) valid conv
    Wp = (W2out - 3) // 2 + 1         # maxpool kernel 3, stride 2, no padding
    assert W2out >= 3 and Wp >= 1 and W1out >= Wp

    B = N * H
    LANE = 128

    # channels-first, rows-on-lanes layout: (C_in, W, N*H)
    x_cwb = jnp.transpose(x_nchw, (1, 3, 0, 2)).reshape(C_in, W, B).astype(jnp.float32)

    # Lane-axis tile size from a conservative VMEM budget (double-buffered in + out),
    # always a multiple of 128; pad B (handles any N*H, no divisibility requirement).
    col_bytes = 8 * (C_in * W + C_out * Wp)              # f32, x2 for double buffering
    budget = 16 * 1024 * 1024
    tb_budget = max(LANE, min(8192, (budget // col_bytes) // LANE * LANE))
    Bp = _round_up(B, LANE)
    if Bp <= tb_budget:
        # prefer >= 2 grid steps when cheap so both v7x TensorCores get work
        TB = Bp // 2 if (Bp >= 2 * LANE and Bp % (2 * LANE) == 0) else Bp
    else:
        TB = tb_budget
        Bp = _round_up(Bp, TB)
    grid = (Bp // TB,)

    if Bp != B:
        x_cwb = jnp.pad(x_cwb, ((0, 0), (0, 0), (0, Bp - B)))

    # Weights/biases as small 2D SMEM tables (read as scalars inside the kernel).
    w1_k = w1[:, :, 0, 0].astype(jnp.float32)                       # (C_out, C_in)
    w2_k = w2[:, :, 0, :].reshape(C_out, C_in * K).astype(jnp.float32)
    b1_k = b1.reshape(1, C_out).astype(jnp.float32)
    b2_k = b2.reshape(1, C_out).astype(jnp.float32)

    kernel = functools.partial(_layer_block_kernel, K=K, C_in=C_in, C_out=C_out,
                               W1out=W1out, Wp=Wp)

    out_cwb = pl.pallas_call(
        kernel,
        out_shape=jax.ShapeDtypeStruct((C_out, Wp, Bp), jnp.float32),
        grid=grid,
        in_specs=[
            pl.BlockSpec((C_in, W, TB), lambda i: (0, 0, i)),
            pl.BlockSpec(memory_space=pltpu.MemorySpace.SMEM),
            pl.BlockSpec(memory_space=pltpu.MemorySpace.SMEM),
            pl.BlockSpec(memory_space=pltpu.MemorySpace.SMEM),
            pl.BlockSpec(memory_space=pltpu.MemorySpace.SMEM),
        ],
        out_specs=pl.BlockSpec((C_out, Wp, TB), lambda i: (0, 0, i)),
        compiler_params=pltpu.CompilerParams(
            dimension_semantics=("parallel",),
            vmem_limit_bytes=32 * 1024 * 1024),
    )(x_cwb, w1_k, b1_k, w2_k, b2_k)

    out_cwb = out_cwb[:, :, :B]
    # (C_out, Wp, N, H) -> NCHW (N, C_out, H, Wp)
    return jnp.transpose(out_cwb.reshape(C_out, Wp, N, H), (2, 0, 3, 1))


def reference(x, w1, b1, w2, b2):
    """Pure-JAX NCHW reference mirroring the PyTorch forward."""
    N, C_in, H, W = x.shape
    C_out = w1.shape[0]
    K = w2.shape[3]
    # conv_output: 1x1, stride (1,2), no padding
    y1 = jnp.einsum('nchw,oc->nohw', x[:, :, :, ::2], w1[:, :, 0, 0]) \
        + b1[None, :, None, None]
    # conv_output1: (1,K), stride 1, no padding
    W2out = W - K + 1
    y2 = b2[None, :, None, None] + sum(
        jnp.einsum('nchw,oc->nohw', x[:, :, :, dk:dk + W2out], w2[:, :, 0, dk])
        for dk in range(K))
    # maxpool (1,3), stride (1,2), no padding
    Wp = (W2out - 3) // 2 + 1
    mp = jnp.stack([y2[:, :, :, 2 * i:2 * i + 3].max(axis=3) for i in range(Wp)], axis=3)
    return jnp.maximum(mp + y1[..., -Wp:], 0.0)


if __name__ == "__main__":
    # small shapes consistent with the module: NCHW input, c_in=4, c_out=8, k_size=3
    N, C_in, C_out, H, W, K = 2, 4, 8, 8, 16, 3

    key = jax.random.PRNGKey(0)
    k1, k2, k3, k4, k5 = jax.random.split(key, 5)
    x = jax.random.normal(k1, (N, C_in, H, W), jnp.float32)
    # PyTorch parameter shapes: (c_out, c_in, 1, 1) / (c_out,) / (c_out, c_in, 1, k) / (c_out,)
    w1 = 0.2 * jax.random.normal(k2, (C_out, C_in, 1, 1), jnp.float32)
    b1 = 0.1 * jax.random.normal(k3, (C_out,), jnp.float32)
    w2 = 0.2 * jax.random.normal(k4, (C_out, C_in, 1, K), jnp.float32)
    b2 = 0.1 * jax.random.normal(k5, (C_out,), jnp.float32)

    out = layer_block_forward(x, w1, b1, w2, b2)
    out = jax.block_until_ready(out)

    ref = reference(x, w1, b1, w2, b2)
    assert out.shape == ref.shape == (N, C_out, H, (W - K + 1 - 3) // 2 + 1)
    assert jnp.allclose(out, ref, atol=1e-4, rtol=1e-4)

    print("KERNEL_OK")
</pallas_src>

<mosaic_0001>
module attributes {stable_mosaic.version = 11 : i64} {
  func.func @_layer_block_kernel(%arg0: i32, %arg1: memref<4x16x128xf32, #tpu.memory_space<vmem>>, %arg2: memref<8x4xf32, #tpu.memory_space<smem>>, %arg3: memref<1x8xf32, #tpu.memory_space<smem>>, %arg4: memref<8x12xf32, #tpu.memory_space<smem>>, %arg5: memref<1x8xf32, #tpu.memory_space<smem>>, %arg6: memref<8x6x128xf32, #tpu.memory_space<vmem>>) attributes {dimension_semantics = [#tpu.dimension_semantics<parallel>], iteration_bounds = array<i64: 1>, scalar_prefetch = 0 : i64, scratch_operands = 0 : i64, tpu.core_type = #tpu.core_type<tc>, window_params = [{transform_indices = @transform_0, window_bounds = array<i64: 4, 16, 128>}, {transform_indices = @transform_1, window_bounds = array<i64: 8, 4>}, {transform_indices = @transform_2, window_bounds = array<i64: 1, 8>}, {transform_indices = @transform_3, window_bounds = array<i64: 8, 12>}, {transform_indices = @transform_4, window_bounds = array<i64: 1, 8>}, {transform_indices = @transform_5, window_bounds = array<i64: 8, 6, 128>}]} {
    %c0 = arith.constant 0 : index
    %c0_0 = arith.constant 0 : index
    %c0_1 = arith.constant 0 : index
    %0 = tpu.strided_load %arg1[%c0, %c0_0, %c0_1] {strides = array<i32: 1, 2, 1>} : memref<4x16x128xf32, #tpu.memory_space<vmem>>, vector<4x7x128xf32>
    %c0_2 = arith.constant 0 : index
    %c1 = arith.constant 1 : index
    %c0_3 = arith.constant 0 : index
    %1 = tpu.strided_load %arg1[%c0_2, %c1, %c0_3] {strides = array<i32: 1, 2, 1>} : memref<4x16x128xf32, #tpu.memory_space<vmem>>, vector<4x7x128xf32>
    %c0_4 = arith.constant 0 : index
    %c2 = arith.constant 2 : index
    %c0_5 = arith.constant 0 : index
    %2 = tpu.strided_load %arg1[%c0_4, %c2, %c0_5] {strides = array<i32: 1, 2, 1>} : memref<4x16x128xf32, #tpu.memory_space<vmem>>, vector<4x7x128xf32>
    %c0_6 = arith.constant 0 : index
    %c1_7 = arith.constant 1 : index
    %c0_8 = arith.constant 0 : index
    %3 = tpu.strided_load %arg1[%c0_6, %c1_7, %c0_8] {strides = array<i32: 1, 2, 1>} : memref<4x16x128xf32, #tpu.memory_space<vmem>>, vector<4x6x128xf32>
    %c0_9 = arith.constant 0 : index
    %c2_10 = arith.constant 2 : index
    %c0_11 = arith.constant 0 : index
    %4 = tpu.strided_load %arg1[%c0_9, %c2_10, %c0_11] {strides = array<i32: 1, 2, 1>} : memref<4x16x128xf32, #tpu.memory_space<vmem>>, vector<4x6x128xf32>
    %c0_12 = arith.constant 0 : index
    %c3 = arith.constant 3 : index
    %c0_13 = arith.constant 0 : index
    %5 = tpu.strided_load %arg1[%c0_12, %c3, %c0_13] {strides = array<i32: 1, 2, 1>} : memref<4x16x128xf32, #tpu.memory_space<vmem>>, vector<4x6x128xf32>
    %c0_14 = arith.constant 0 : index
    %c4 = arith.constant 4 : index
    %c0_15 = arith.constant 0 : index
    %6 = tpu.strided_load %arg1[%c0_14, %c4, %c0_15] {strides = array<i32: 1, 2, 1>} : memref<4x16x128xf32, #tpu.memory_space<vmem>>, vector<4x6x128xf32>
    %c0_16 = arith.constant 0 : index
    %c0_17 = arith.constant 0 : index
    %7 = memref.load %arg4[%c0_16, %c0_17] : memref<8x12xf32, #tpu.memory_space<smem>>
    %8 = vector.extract_strided_slice %0 {offsets = [0, 0, 0], sizes = [1, 7, 128], strides = [1, 1, 1]} : vector<4x7x128xf32> to vector<1x7x128xf32>
    %9 = vector.shape_cast %8 : vector<1x7x128xf32> to vector<7x128xf32>
    %10 = vector.broadcast %7 : f32 to vector<7x128xf32>
    %11 = arith.mulf %9, %10 : vector<7x128xf32>
    %12 = vector.extract_strided_slice %3 {offsets = [0, 0, 0], sizes = [1, 6, 128], strides = [1, 1, 1]} : vector<4x6x128xf32> to vector<1x6x128xf32>
    %13 = vector.shape_cast %12 : vector<1x6x128xf32> to vector<6x128xf32>
    %14 = vector.broadcast %7 : f32 to vector<6x128xf32>
    %15 = arith.mulf %13, %14 : vector<6x128xf32>
    %c0_18 = arith.constant 0 : index
    %c1_19 = arith.constant 1 : index
    %16 = memref.load %arg4[%c0_18, %c1_19] : memref<8x12xf32, #tpu.memory_space<smem>>
    %17 = vector.extract_strided_slice %1 {offsets = [0, 0, 0], sizes = [1, 7, 128], strides = [1, 1, 1]} : vector<4x7x128xf32> to vector<1x7x128xf32>
    %18 = vector.shape_cast %17 : vector<1x7x128xf32> to vector<7x128xf32>
    %19 = vector.broadcast %16 : f32 to vector<7x128xf32>
    %20 = arith.mulf %18, %19 : vector<7x128xf32>
    %21 = vector.extract_strided_slice %4 {offsets = [0, 0, 0], sizes = [1, 6, 128], strides = [1, 1, 1]} : vector<4x6x128xf32> to vector<1x6x128xf32>
    %22 = vector.shape_cast %21 : vector<1x6x128xf32> to vector<6x128xf32>
    %23 = vector.broadcast %16 : f32 to vector<6x128xf32>
    %24 = arith.mulf %22, %23 : vector<6x128xf32>
    %25 = arith.addf %11, %20 : vector<7x128xf32>
    %26 = arith.addf %15, %24 : vector<6x128xf32>
    %c0_20 = arith.constant 0 : index
    %c2_21 = arith.constant 2 : index
    %27 = memref.load %arg4[%c0_20, %c2_21] : memref<8x12xf32, #tpu.memory_space<smem>>
    %28 = vector.extract_strided_slice %2 {offsets = [0, 0, 0], sizes = [1, 7, 128], strides = [1, 1, 1]} : vector<4x7x128xf32> to vector<1x7x128xf32>
    %29 = vector.shape_cast %28 : vector<1x7x128xf32> to vector<7x128xf32>
    %30 = vector.broadcast %27 : f32 to vector<7x128xf32>
    %31 = arith.mulf %29, %30 : vector<7x128xf32>
    %32 = vector.extract_strided_slice %5 {offsets = [0, 0, 0], sizes = [1, 6, 128], strides = [1, 1, 1]} : vector<4x6x128xf32> to vector<1x6x128xf32>
    %33 = vector.shape_cast %32 : vector<1x6x128xf32> to vector<6x128xf32>
    %34 = vector.broadcast %27 : f32 to vector<6x128xf32>
    %35 = arith.mulf %33, %34 : vector<6x128xf32>
    %36 = arith.addf %25, %31 : vector<7x128xf32>
    %37 = arith.addf %26, %35 : vector<6x128xf32>
    %c0_22 = arith.constant 0 : index
    %c3_23 = arith.constant 3 : index
    %38 = memref.load %arg4[%c0_22, %c3_23] : memref<8x12xf32, #tpu.memory_space<smem>>
    %39 = vector.extract_strided_slice %0 {offsets = [1, 0, 0], sizes = [1, 7, 128], strides = [1, 1, 1]} : vector<4x7x128xf32> to vector<1x7x128xf32>
    %40 = vector.shape_cast %39 : vector<1x7x128xf32> to vector<7x128xf32>
    %41 = vector.broadcast %38 : f32 to vector<7x128xf32>
    %42 = arith.mulf %40, %41 : vector<7x128xf32>
    %43 = vector.extract_strided_slice %3 {offsets = [1, 0, 0], sizes = [1, 6, 128], strides = [1, 1, 1]} : vector<4x6x128xf32> to vector<1x6x128xf32>
    %44 = vector.shape_cast %43 : vector<1x6x128xf32> to vector<6x128xf32>
    %45 = vector.broadcast %38 : f32 to vector<6x128xf32>
    %46 = arith.mulf %44, %45 : vector<6x128xf32>
    %47 = arith.addf %36, %42 : vector<7x128xf32>
    %48 = arith.addf %37, %46 : vector<6x128xf32>
    %c0_24 = arith.constant 0 : index
    %c4_25 = arith.constant 4 : index
    %49 = memref.load %arg4[%c0_24, %c4_25] : memref<8x12xf32, #tpu.memory_space<smem>>
    %50 = vector.extract_strided_slice %1 {offsets = [1, 0, 0], sizes = [1, 7, 128], strides = [1, 1, 1]} : vector<4x7x128xf32> to vector<1x7x128xf32>
    %51 = vector.shape_cast %50 : vector<1x7x128xf32> to vector<7x128xf32>
    %52 = vector.broadcast %49 : f32 to vector<7x128xf32>
    %53 = arith.mulf %51, %52 : vector<7x128xf32>
    %54 = vector.extract_strided_slice %4 {offsets = [1, 0, 0], sizes = [1, 6, 128], strides = [1, 1, 1]} : vector<4x6x128xf32> to vector<1x6x128xf32>
    %55 = vector.shape_cast %54 : vector<1x6x128xf32> to vector<6x128xf32>
    %56 = vector.broadcast %49 : f32 to vector<6x128xf32>
    %57 = arith.mulf %55, %56 : vector<6x128xf32>
    %58 = arith.addf %47, %53 : vector<7x128xf32>
    %59 = arith.addf %48, %57 : vector<6x128xf32>
    %c0_26 = arith.constant 0 : index
    %c5 = arith.constant 5 : index
    %60 = memref.load %arg4[%c0_26, %c5] : memref<8x12xf32, #tpu.memory_space<smem>>
    %61 = vector.extract_strided_slice %2 {offsets = [1, 0, 0], sizes = [1, 7, 128], strides = [1, 1, 1]} : vector<4x7x128xf32> to vector<1x7x128xf32>
    %62 = vector.shape_cast %61 : vector<1x7x128xf32> to vector<7x128xf32>
    %63 = vector.broadcast %60 : f32 to vector<7x128xf32>
    %64 = arith.mulf %62, %63 : vector<7x128xf32>
    %65 = vector.extract_strided_slice %5 {offsets = [1, 0, 0], sizes = [1, 6, 128], strides = [1, 1, 1]} : vector<4x6x128xf32> to vector<1x6x128xf32>
    %66 = vector.shape_cast %65 : vector<1x6x128xf32> to vector<6x128xf32>
    %67 = vector.broadcast %60 : f32 to vector<6x128xf32>
    %68 = arith.mulf %66, %67 : vector<6x128xf32>
    %69 = arith.addf %58, %64 : vector<7x128xf32>
    %70 = arith.addf %59, %68 : vector<6x128xf32>
    %c0_27 = arith.constant 0 : index
    %c6 = arith.constant 6 : index
    %71 = memref.load %arg4[%c0_27, %c6] : memref<8x12xf32, #tpu.memory_space<smem>>
    %72 = vector.extract_strided_slice %0 {offsets = [2, 0, 0], sizes = [1, 7, 128], strides = [1, 1, 1]} : vector<4x7x128xf32> to vector<1x7x128xf32>
    %73 = vector.shape_cast %72 : vector<1x7x128xf32> to vector<7x128xf32>
    %74 = vector.broadcast %71 : f32 to vector<7x128xf32>
    %75 = arith.mulf %73, %74 : vector<7x128xf32>
    %76 = vector.extract_strided_slice %3 {offsets = [2, 0, 0], sizes = [1, 6, 128], strides = [1, 1, 1]} : vector<4x6x128xf32> to vector<1x6x128xf32>
    %77 = vector.shape_cast %76 : vector<1x6x128xf32> to vector<6x128xf32>
    %78 = vector.broadcast %71 : f32 to vector<6x128xf32>
    %79 = arith.mulf %77, %78 : vector<6x128xf32>
    %80 = arith.addf %69, %75 : vector<7x128xf32>
    %81 = arith.addf %70, %79 : vector<6x128xf32>
    %c0_28 = arith.constant 0 : index
    %c7 = arith.constant 7 : index
    %82 = memref.load %arg4[%c0_28, %c7] : memref<8x12xf32, #tpu.memory_space<smem>>
    %83 = vector.extract_strided_slice %1 {offsets = [2, 0, 0], sizes = [1, 7, 128], strides = [1, 1, 1]} : vector<4x7x128xf32> to vector<1x7x128xf32>
    %84 = vector.shape_cast %83 : vector<1x7x128xf32> to vector<7x128xf32>
    %85 = vector.broadcast %82 : f32 to vector<7x128xf32>
    %86 = arith.mulf %84, %85 : vector<7x128xf32>
    %87 = vector.extract_strided_slice %4 {offsets = [2, 0, 0], sizes = [1, 6, 128], strides = [1, 1, 1]} : vector<4x6x128xf32> to vector<1x6x128xf32>
    %88 = vector.shape_cast %87 : vector<1x6x128xf32> to vector<6x128xf32>
    %89 = vector.broadcast %82 : f32 to vector<6x128xf32>
    %90 = arith.mulf %88, %89 : vector<6x128xf32>
    %91 = arith.addf %80, %86 : vector<7x128xf32>
    %92 = arith.addf %81, %90 : vector<6x128xf32>
    %c0_29 = arith.constant 0 : index
    %c8 = arith.constant 8 : index
    %93 = memref.load %arg4[%c0_29, %c8] : memref<8x12xf32, #tpu.memory_space<smem>>
    %94 = vector.extract_strided_slice %2 {offsets = [2, 0, 0], sizes = [1, 7, 128], strides = [1, 1, 1]} : vector<4x7x128xf32> to vector<1x7x128xf32>
    %95 = vector.shape_cast %94 : vector<1x7x128xf32> to vector<7x128xf32>
    %96 = vector.broadcast %93 : f32 to vector<7x128xf32>
    %97 = arith.mulf %95, %96 : vector<7x128xf32>
    %98 = vector.extract_strided_slice %5 {offsets = [2, 0, 0], sizes = [1, 6, 128], strides = [1, 1, 1]} : vector<4x6x128xf32> to vector<1x6x128xf32>
    %99 = vector.shape_cast %98 : vector<1x6x128xf32> to vector<6x128xf32>
    %100 = vector.broadcast %93 : f32 to vector<6x128xf32>
    %101 = arith.mulf %99, %100 : vector<6x128xf32>
    %102 = arith.addf %91, %97 : vector<7x128xf32>
    %103 = arith.addf %92, %101 : vector<6x128xf32>
    %c0_30 = arith.constant 0 : index
    %c9 = arith.constant 9 : index
    %104 = memref.load %arg4[%c0_30, %c9] : memref<8x12xf32, #tpu.memory_space<smem>>
    %105 = vector.extract_strided_slice %0 {offsets = [3, 0, 0], sizes = [1, 7, 128], strides = [1, 1, 1]} : vector<4x7x128xf32> to vector<1x7x128xf32>
    %106 = vector.shape_cast %105 : vector<1x7x128xf32> to vector<7x128xf32>
    %107 = vector.broadcast %104 : f32 to vector<7x128xf32>
    %108 = arith.mulf %106, %107 : vector<7x128xf32>
    %109 = vector.extract_strided_slice %3 {offsets = [3, 0, 0], sizes = [1, 6, 128], strides = [1, 1, 1]} : vector<4x6x128xf32> to vector<1x6x128xf32>
    %110 = vector.shape_cast %109 : vector<1x6x128xf32> to vector<6x128xf32>
    %111 = vector.broadcast %104 : f32 to vector<6x128xf32>
    %112 = arith.mulf %110, %111 : vector<6x128xf32>
    %113 = arith.addf %102, %108 : vector<7x128xf32>
    %114 = arith.addf %103, %112 : vector<6x128xf32>
    %c0_31 = arith.constant 0 : index
    %c10 = arith.constant 10 : index
    %115 = memref.load %arg4[%c0_31, %c10] : memref<8x12xf32, #tpu.memory_space<smem>>
    %116 = vector.extract_strided_slice %1 {offsets = [3, 0, 0], sizes = [1, 7, 128], strides = [1, 1, 1]} : vector<4x7x128xf32> to vector<1x7x128xf32>
    %117 = vector.shape_cast %116 : vector<1x7x128xf32> to vector<7x128xf32>
    %118 = vector.broadcast %115 : f32 to vector<7x128xf32>
    %119 = arith.mulf %117, %118 : vector<7x128xf32>
    %120 = vector.extract_strided_slice %4 {offsets = [3, 0, 0], sizes = [1, 6, 128], strides = [1, 1, 1]} : vector<4x6x128xf32> to vector<1x6x128xf32>
    %121 = vector.shape_cast %120 : vector<1x6x128xf32> to vector<6x128xf32>
    %122 = vector.broadcast %115 : f32 to vector<6x128xf32>
    %123 = arith.mulf %121, %122 : vector<6x128xf32>
    %124 = arith.addf %113, %119 : vector<7x128xf32>
    %125 = arith.addf %114, %123 : vector<6x128xf32>
    %c0_32 = arith.constant 0 : index
    %c11 = arith.constant 11 : index
    %126 = memref.load %arg4[%c0_32, %c11] : memref<8x12xf32, #tpu.memory_space<smem>>
    %127 = vector.extract_strided_slice %2 {offsets = [3, 0, 0], sizes = [1, 7, 128], strides = [1, 1, 1]} : vector<4x7x128xf32> to vector<1x7x128xf32>
    %128 = vector.shape_cast %127 : vector<1x7x128xf32> to vector<7x128xf32>
    %129 = vector.broadcast %126 : f32 to vector<7x128xf32>
    %130 = arith.mulf %128, %129 : vector<7x128xf32>
    %131 = vector.extract_strided_slice %5 {offsets = [3, 0, 0], sizes = [1, 6, 128], strides = [1, 1, 1]} : vector<4x6x128xf32> to vector<1x6x128xf32>
    %132 = vector.shape_cast %131 : vector<1x6x128xf32> to vector<6x128xf32>
    %133 = vector.broadcast %126 : f32 to vector<6x128xf32>
    %134 = arith.mulf %132, %133 : vector<6x128xf32>
    %135 = arith.addf %124, %130 : vector<7x128xf32>
    %136 = arith.addf %125, %134 : vector<6x128xf32>
    %c0_33 = arith.constant 0 : index
    %c0_34 = arith.constant 0 : index
    %137 = memref.load %arg5[%c0_33, %c0_34] : memref<1x8xf32, #tpu.memory_space<smem>>
    %138 = vector.broadcast %137 : f32 to vector<7x128xf32>
    %139 = arith.addf %135, %138 : vector<7x128xf32>
    %c0_35 = arith.constant 0 : index
    %c0_36 = arith.constant 0 : index
    %140 = memref.load %arg5[%c0_35, %c0_36] : memref<1x8xf32, #tpu.memory_space<smem>>
    %141 = vector.broadcast %140 : f32 to vector<6x128xf32>
    %142 = arith.addf %136, %141 : vector<6x128xf32>
    %143 = vector.extract_strided_slice %139 {offsets = [0, 0], sizes = [6, 128], strides = [1, 1]} : vector<7x128xf32> to vector<6x128xf32>
    %144 = arith.maximumf %143, %142 : vector<6x128xf32>
    %145 = vector.extract_strided_slice %139 {offsets = [1, 0], sizes = [6, 128], strides = [1, 1]} : vector<7x128xf32> to vector<6x128xf32>
    %146 = arith.maximumf %144, %145 : vector<6x128xf32>
    %c0_37 = arith.constant 0 : index
    %c0_38 = arith.constant 0 : index
    %147 = memref.load %arg3[%c0_37, %c0_38] : memref<1x8xf32, #tpu.memory_space<smem>>
    %148 = vector.extract_strided_slice %6 {offsets = [0, 0, 0], sizes = [1, 6, 128], strides = [1, 1, 1]} : vector<4x6x128xf32> to vector<1x6x128xf32>
    %149 = vector.shape_cast %148 : vector<1x6x128xf32> to vector<6x128xf32>
    %c0_39 = arith.constant 0 : index
    %c0_40 = arith.constant 0 : index
    %150 = memref.load %arg2[%c0_39, %c0_40] : memref<8x4xf32, #tpu.memory_space<smem>>
    %151 = vector.broadcast %150 : f32 to vector<6x128xf32>
    %152 = arith.mulf %149, %151 : vector<6x128xf32>
    %153 = vector.broadcast %147 : f32 to vector<6x128xf32>
    %154 = arith.addf %153, %152 : vector<6x128xf32>
    %155 = vector.extract_strided_slice %6 {offsets = [1, 0, 0], sizes = [1, 6, 128], strides = [1, 1, 1]} : vector<4x6x128xf32> to vector<1x6x128xf32>
    %156 = vector.shape_cast %155 : vector<1x6x128xf32> to vector<6x128xf32>
    %c0_41 = arith.constant 0 : index
    %c1_42 = arith.constant 1 : index
    %157 = memref.load %arg2[%c0_41, %c1_42] : memref<8x4xf32, #tpu.memory_space<smem>>
    %158 = vector.broadcast %157 : f32 to vector<6x128xf32>
    %159 = arith.mulf %156, %158 : vector<6x128xf32>
    %160 = arith.addf %154, %159 : vector<6x128xf32>
    %161 = vector.extract_strided_slice %6 {offsets = [2, 0, 0], sizes = [1, 6, 128], strides = [1, 1, 1]} : vector<4x6x128xf32> to vector<1x6x128xf32>
    %162 = vector.shape_cast %161 : vector<1x6x128xf32> to vector<6x128xf32>
    %c0_43 = arith.constant 0 : index
    %c2_44 = arith.constant 2 : index
    %163 = memref.load %arg2[%c0_43, %c2_44] : memref<8x4xf32, #tpu.memory_space<smem>>
    %164 = vector.broadcast %163 : f32 to vector<6x128xf32>
    %165 = arith.mulf %162, %164 : vector<6x128xf32>
    %166 = arith.addf %160, %165 : vector<6x128xf32>
    %167 = vector.extract_strided_slice %6 {offsets = [3, 0, 0], sizes = [1, 6, 128], strides = [1, 1, 1]} : vector<4x6x128xf32> to vector<1x6x128xf32>
    %168 = vector.shape_cast %167 : vector<1x6x128xf32> to vector<6x128xf32>
    %c0_45 = arith.constant 0 : index
    %c3_46 = arith.constant 3 : index
    %169 = memref.load %arg2[%c0_45, %c3_46] : memref<8x4xf32, #tpu.memory_space<smem>>
    %170 = vector.broadcast %169 : f32 to vector<6x128xf32>
    %171 = arith.mulf %168, %170 : vector<6x128xf32>
    %172 = arith.addf %166, %171 : vector<6x128xf32>
    %173 = arith.addf %146, %172 : vector<6x128xf32>
    %cst = arith.constant 0.000000e+00 : f32
    %174 = vector.broadcast %cst : f32 to vector<6x128xf32>
    %175 = arith.maximumf %173, %174 : vector<6x128xf32>
    %c0_47 = arith.constant 0 : index
    %c0_48 = arith.constant 0 : index
    %c0_49 = arith.constant 0 : index
    %176 = vector.load %arg6[%c0_47, %c0_48, %c0_49] : memref<8x6x128xf32, #tpu.memory_space<vmem>>, vector<1x6x128xf32>
    %177 = vector.shape_cast %176 : vector<1x6x128xf32> to vector<6x128xf32>
    %178 = vector.shape_cast %175 : vector<6x128xf32> to vector<1x6x128xf32>
    tpu.vector_store %arg6[%c0_47, %c0_48, %c0_49], %178 {strides = array<i32>} : memref<8x6x128xf32, #tpu.memory_space<vmem>>, vector<1x6x128xf32>,
    %c1_50 = arith.constant 1 : index
    %c0_51 = arith.constant 0 : index
    %179 = memref.load %arg4[%c1_50, %c0_51] : memref<8x12xf32, #tpu.memory_space<smem>>
    %180 = vector.extract_strided_slice %0 {offsets = [0, 0, 0], sizes = [1, 7, 128], strides = [1, 1, 1]} : vector<4x7x128xf32> to vector<1x7x128xf32>
    %181 = vector.shape_cast %180 : vector<1x7x128xf32> to vector<7x128xf32>
    %182 = vector.broadcast %179 : f32 to vector<7x128xf32>
    %183 = arith.mulf %181, %182 : vector<7x128xf32>
    %184 = vector.extract_strided_slice %3 {offsets = [0, 0, 0], sizes = [1, 6, 128], strides = [1, 1, 1]} : vector<4x6x128xf32> to vector<1x6x128xf32>
    %185 = vector.shape_cast %184 : vector<1x6x128xf32> to vector<6x128xf32>
    %186 = vector.broadcast %179 : f32 to vector<6x128xf32>
    %187 = arith.mulf %185, %186 : vector<6x128xf32>
    %c1_52 = arith.constant 1 : index
    %c1_53 = arith.constant 1 : index
    %188 = memref.load %arg4[%c1_52, %c1_53] : memref<8x12xf32, #tpu.memory_space<smem>>
    %189 = vector.extract_strided_slice %1 {offsets = [0, 0, 0], sizes = [1, 7, 128], strides = [1, 1, 1]} : vector<4x7x128xf32> to vector<1x7x128xf32>
    %190 = vector.shape_cast %189 : vector<1x7x128xf32> to vector<7x128xf32>
    %191 = vector.broadcast %188 : f32 to vector<7x128xf32>
    %192 = arith.mulf %190, %191 : vector<7x128xf32>
    %193 = vector.extract_strided_slice %4 {offsets = [0, 0, 0], sizes = [1, 6, 128], strides = [1, 1, 1]} : vector<4x6x128xf32> to vector<1x6x128xf32>
    %194 = vector.shape_cast %193 : vector<1x6x128xf32> to vector<6x128xf32>
    %195 = vector.broadcast %188 : f32 to vector<6x128xf32>
    %196 = arith.mulf %194, %195 : vector<6x128xf32>
    %197 = arith.addf %183, %192 : vector<7x128xf32>
    %198 = arith.addf %187, %196 : vector<6x128xf32>
    %c1_54 = arith.constant 1 : index
    %c2_55 = arith.constant 2 : index
    %199 = memref.load %arg4[%c1_54, %c2_55] : memref<8x12xf32, #tpu.memory_space<smem>>
    %200 = vector.extract_strided_slice %2 {offsets = [0, 0, 0], sizes = [1, 7, 128], strides = [1, 1, 1]} : vector<4x7x128xf32> to vector<1x7x128xf32>
    %201 = vector.shape_cast %200 : vector<1x7x128xf32> to vector<7x128xf32>
    %202 = vector.broadcast %199 : f32 to vector<7x128xf32>
    %203 = arith.mulf %201, %202 : vector<7x128xf32>
    %204 = vector.extract_strided_slice %5 {offsets = [0, 0, 0], sizes = [1, 6, 128], strides = [1, 1, 1]} : vector<4x6x128xf32> to vector<1x6x128xf32>
    %205 = vector.shape_cast %204 : vector<1x6x128xf32> to vector<6x128xf32>
    %206 = vector.broadcast %199 : f32 to vector<6x128xf32>
    %207 = arith.mulf %205, %206 : vector<6x128xf32>
    %208 = arith.addf %197, %203 : vector<7x128xf32>
    %209 = arith.addf %198, %207 : vector<6x128xf32>
    %c1_56 = arith.constant 1 : index
    %c3_57 = arith.constant 3 : index
    %210 = memref.load %arg4[%c1_56, %c3_57] : memref<8x12xf32, #tpu.memory_space<smem>>
    %211 = vector.extract_strided_slice %0 {offsets = [1, 0, 0], sizes = [1, 7, 128], strides = [1, 1, 1]} : vector<4x7x128xf32> to vector<1x7x128xf32>
    %212 = vector.shape_cast %211 : vector<1x7x128xf32> to vector<7x128xf32>
    %213 = vector.broadcast %210 : f32 to vector<7x128xf32>
    %214 = arith.mulf %212, %213 : vector<7x128xf32>
    %215 = vector.extract_strided_slice %3 {offsets = [1, 0, 0], sizes = [1, 6, 128], strides = [1, 1, 1]} : vector<4x6x128xf32> to vector<1x6x128xf32>
    %216 = vector.shape_cast %215 : vector<1x6x128xf32> to vector<6x128xf32>
    %217 = vector.broadcast %210 : f32 to vector<6x128xf32>
    %218 = arith.mulf %216, %217 : vector<6x128xf32>
    %219 = arith.addf %208, %214 : vector<7x128xf32>
    %220 = arith.addf %209, %218 : vector<6x128xf32>
    %c1_58 = arith.constant 1 : index
    %c4_59 = arith.constant 4 : index
    %221 = memref.load %arg4[%c1_58, %c4_59] : memref<8x12xf32, #tpu.memory_space<smem>>
    %222 = vector.extract_strided_slice %1 {offsets = [1, 0, 0], sizes = [1, 7, 128], strides = [1, 1, 1]} : vector<4x7x128xf32> to vector<1x7x128xf32>
    %223 = vector.shape_cast %222 : vector<1x7x128xf32> to vector<7x128xf32>
    %224 = vector.broadcast %221 : f32 to vector<7x128xf32>
    %225 = arith.mulf %223, %224 : vector<7x128xf32>
    %226 = vector.extract_strided_slice %4 {offsets = [1, 0, 0], sizes = [1, 6, 128], strides = [1, 1, 1]} : vector<4x6x128xf32> to vector<1x6x128xf32>
    %227 = vector.shape_cast %226 : vector<1x6x128xf32> to vector<6x128xf32>
    %228 = vector.broadcast %221 : f32 to vector<6x128xf32>
    %229 = arith.mulf %227, %228 : vector<6x128xf32>
    %230 = arith.addf %219, %225 : vector<7x128xf32>
    %231 = arith.addf %220, %229 : vector<6x128xf32>
    %c1_60 = arith.constant 1 : index
    %c5_61 = arith.constant 5 : index
    %232 = memref.load %arg4[%c1_60, %c5_61] : memref<8x12xf32, #tpu.memory_space<smem>>
    %233 = vector.extract_strided_slice %2 {offsets = [1, 0, 0], sizes = [1, 7, 128], strides = [1, 1, 1]} : vector<4x7x128xf32> to vector<1x7x128xf32>
    %234 = vector.shape_cast %233 : vector<1x7x128xf32> to vector<7x128xf32>
    %235 = vector.broadcast %232 : f32 to vector<7x128xf32>
    %236 = arith.mulf %234, %235 : vector<7x128xf32>
    %237 = vector.extract_strided_slice %5 {offsets = [1, 0, 0], sizes = [1, 6, 128], strides = [1, 1, 1]} : vector<4x6x128xf32> to vector<1x6x128xf32>
    %238 = vector.shape_cast %237 : vector<1x6x128xf32> to vector<6x128xf32>
    %239 = vector.broadcast %232 : f32 to vector<6x128xf32>
    %240 = arith.mulf %238, %239 : vector<6x128xf32>
    %241 = arith.addf %230, %236 : vector<7x128xf32>
    %242 = arith.addf %231, %240 : vector<6x128xf32>
    %c1_62 = arith.constant 1 : index
    %c6_63 = arith.constant 6 : index
    %243 = memref.load %arg4[%c1_62, %c6_63] : memref<8x12xf32, #tpu.memory_space<smem>>
    %244 = vector.extract_strided_slice %0 {offsets = [2, 0, 0], sizes = [1, 7, 128], strides = [1, 1, 1]} : vector<4x7x128xf32> to vector<1x7x128xf32>
    %245 = vector.shape_cast %244 : vector<1x7x128xf32> to vector<7x128xf32>
    %246 = vector.broadcast %243 : f32 to vector<7x128xf32>
    %247 = arith.mulf %245, %246 : vector<7x128xf32>
    %248 = vector.extract_strided_slice %3 {offsets = [2, 0, 0], sizes = [1, 6, 128], strides = [1, 1, 1]} : vector<4x6x128xf32> to vector<1x6x128xf32>
    %249 = vector.shape_cast %248 : vector<1x6x128xf32> to vector<6x128xf32>
    %250 = vector.broadcast %243 : f32 to vector<6x128xf32>
    %251 = arith.mulf %249, %250 : vector<6x128xf32>
    %252 = arith.addf %241, %247 : vector<7x128xf32>
    %253 = arith.addf %242, %251 : vector<6x128xf32>
    %c1_64 = arith.constant 1 : index
    %c7_65 = arith.constant 7 : index
    %254 = memref.load %arg4[%c1_64, %c7_65] : memref<8x12xf32, #tpu.memory_space<smem>>
    %255 = vector.extract_strided_slice %1 {offsets = [2, 0, 0], sizes = [1, 7, 128], strides = [1, 1, 1]} : vector<4x7x128xf32> to vector<1x7x128xf32>
    %256 = vector.shape_cast %255 : vector<1x7x128xf32> to vector<7x128xf32>
    %257 = vector.broadcast %254 : f32 to vector<7x128xf32>
    %258 = arith.mulf %256, %257 : vector<7x128xf32>
    %259 = vector.extract_strided_slice %4 {offsets = [2, 0, 0], sizes = [1, 6, 128], strides = [1, 1, 1]} : vector<4x6x128xf32> to vector<1x6x128xf32>
    %260 = vector.shape_cast %259 : vector<1x6x128xf32> to vector<6x128xf32>
    %261 = vector.broadcast %254 : f32 to vector<6x128xf32>
    %262 = arith.mulf %260, %261 : vector<6x128xf32>
    %263 = arith.addf %252, %258 : vector<7x128xf32>
    %264 = arith.addf %253, %262 : vector<6x128xf32>
    %c1_66 = arith.constant 1 : index
    %c8_67 = arith.constant 8 : index
    %265 = memref.load %arg4[%c1_66, %c8_67] : memref<8x12xf32, #tpu.memory_space<smem>>
    %266 = vector.extract_strided_slice %2 {offsets = [2, 0, 0], sizes = [1, 7, 128], strides = [1, 1, 1]} : vector<4x7x128xf32> to vector<1x7x128xf32>
    %267 = vector.shape_cast %266 : vector<1x7x128xf32> to vector<7x128xf32>
    %268 = vector.broadcast %265 : f32 to vector<7x128xf32>
    %269 = arith.mulf %267, %268 : vector<7x128xf32>
    %270 = vector.extract_strided_slice %5 {offsets = [2, 0, 0], sizes = [1, 6, 128], strides = [1, 1, 1]} : vector<4x6x128xf32> to vector<1x6x128xf32>
    %271 = vector.shape_cast %270 : vector<1x6x128xf32> to vector<6x128xf32>
    %272 = vector.broadcast %265 : f32 to vector<6x128xf32>
    %273 = arith.mulf %271, %272 : vector<6x128xf32>
    %274 = arith.addf %263, %269 : vector<7x128xf32>
    %275 = arith.addf %264, %273 : vector<6x128xf32>
    %c1_68 = arith.constant 1 : index
    %c9_69 = arith.constant 9 : index
    %276 = memref.load %arg4[%c1_68, %c9_69] : memref<8x12xf32, #tpu.memory_space<smem>>
    %277 = vector.extract_strided_slice %0 {offsets = [3, 0, 0], sizes = [1, 7, 128], strides = [1, 1, 1]} : vector<4x7x128xf32> to vector<1x7x128xf32>
    %278 = vector.shape_cast %277 : vector<1x7x128xf32> to vector<7x128xf32>
    %279 = vector.broadcast %276 : f32 to vector<7x128xf32>
    %280 = arith.mulf %278, %279 : vector<7x128xf32>
    %281 = vector.extract_strided_slice %3 {offsets = [3, 0, 0], sizes = [1, 6, 128], strides = [1, 1, 1]} : vector<4x6x128xf32> to vector<1x6x128xf32>
    %282 = vector.shape_cast %281 : vector<1x6x128xf32> to vector<6x128xf32>
    %283 = vector.broadcast %276 : f32 to vector<6x128xf32>
    %284 = arith.mulf %282, %283 : vector<6x128xf32>
    %285 = arith.addf %274, %280 : vector<7x128xf32>
    %286 = arith.addf %275, %284 : vector<6x128xf32>
    %c1_70 = arith.constant 1 : index
    %c10_71 = arith.constant 10 : index
    %287 = memref.load %arg4[%c1_70, %c10_71] : memref<8x12xf32, #tpu.memory_space<smem>>
    %288 = vector.extract_strided_slice %1 {offsets = [3, 0, 0], sizes = [1, 7, 128], strides = [1, 1, 1]} : vector<4x7x128xf32> to vector<1x7x128xf32>
    %289 = vector.shape_cast %288 : vector<1x7x128xf32> to vector<7x128xf32>
    %290 = vector.broadcast %287 : f32 to vector<7x128xf32>
    %291 = arith.mulf %289, %290 : vector<7x128xf32>
    %292 = vector.extract_strided_slice %4 {offsets = [3, 0, 0], sizes = [1, 6, 128], strides = [1, 1, 1]} : vector<4x6x128xf32> to vector<1x6x128xf32>
    %293 = vector.shape_cast %292 : vector<1x6x128xf32> to vector<6x128xf32>
    %294 = vector.broadcast %287 : f32 to vector<6x128xf32>
    %295 = arith.mulf %293, %294 : vector<6x128xf32>
    %296 = arith.addf %285, %291 : vector<7x128xf32>
    %297 = arith.addf %286, %295 : vector<6x128xf32>
    %c1_72 = arith.constant 1 : index
    %c11_73 = arith.constant 11 : index
    %298 = memref.load %arg4[%c1_72, %c11_73] : memref<8x12xf32, #tpu.memory_space<smem>>
    %299 = vector.extract_strided_slice %2 {offsets = [3, 0, 0], sizes = [1, 7, 128], strides = [1, 1, 1]} : vector<4x7x128xf32> to vector<1x7x128xf32>
    %300 = vector.shape_cast %299 : vector<1x7x128xf32> to vector<7x128xf32>
    %301 = vector.broadcast %298 : f32 to vector<7x128xf32>
    %302 = arith.mulf %300, %301 : vector<7x128xf32>
    %303 = vector.extract_strided_slice %5 {offsets = [3, 0, 0], sizes = [1, 6, 128], strides = [1, 1, 1]} : vector<4x6x128xf32> to vector<1x6x128xf32>
    %304 = vector.shape_cast %303 : vector<1x6x128xf32> to vector<6x128xf32>
    %305 = vector.broadcast %298 : f32 to vector<6x128xf32>
    %306 = arith.mulf %304, %305 : vector<6x128xf32>
    %307 = arith.addf %296, %302 : vector<7x128xf32>
    %308 = arith.addf %297, %306 : vector<6x128xf32>
    %c0_74 = arith.constant 0 : index
    %c1_75 = arith.constant 1 : index
    %309 = memref.load %arg5[%c0_74, %c1_75] : memref<1x8xf32, #tpu.memory_space<smem>>
    %310 = vector.broadcast %309 : f32 to vector<7x128xf32>
    %311 = arith.addf %307, %310 : vector<7x128xf32>
    %c0_76 = arith.constant 0 : index
    %c1_77 = arith.constant 1 : index
    %312 = memref.load %arg5[%c0_76, %c1_77] : memref<1x8xf32, #tpu.memory_space<smem>>
    %313 = vector.broadcast %312 : f32 to vector<6x128xf32>
    %314 = arith.addf %308, %313 : vector<6x128xf32>
    %315 = vector.extract_strided_slice %311 {offsets = [0, 0], sizes = [6, 128], strides = [1, 1]} : vector<7x128xf32> to vector<6x128xf32>
    %316 = arith.maximumf %315, %314 : vector<6x128xf32>
    %317 = vector.extract_strided_slice %311 {offsets = [1, 0], sizes = [6, 128], strides = [1, 1]} : vector<7x128xf32> to vector<6x128xf32>
    %318 = arith.maximumf %316, %317 : vector<6x128xf32>
    %c0_78 = arith.constant 0 : index
    %c1_79 = arith.constant 1 : index
    %319 = memref.load %arg3[%c0_78, %c1_79] : memref<1x8xf32, #tpu.memory_space<smem>>
    %320 = vector.extract_strided_slice %6 {offsets = [0, 0, 0], sizes = [1, 6, 128], strides = [1, 1, 1]} : vector<4x6x128xf32> to vector<1x6x128xf32>
    %321 = vector.shape_cast %320 : vector<1x6x128xf32> to vector<6x128xf32>
    %c1_80 = arith.constant 1 : index
    %c0_81 = arith.constant 0 : index
    %322 = memref.load %arg2[%c1_80, %c0_81] : memref<8x4xf32, #tpu.memory_space<smem>>
    %323 = vector.broadcast %322 : f32 to vector<6x128xf32>
    %324 = arith.mulf %321, %323 : vector<6x128xf32>
    %325 = vector.broadcast %319 : f32 to vector<6x128xf32>
    %326 = arith.addf %325, %324 : vector<6x128xf32>
    %327 = vector.extract_strided_slice %6 {offsets = [1, 0, 0], sizes = [1, 6, 128], strides = [1, 1, 1]} : vector<4x6x128xf32> to vector<1x6x128xf32>
    %328 = vector.shape_cast %327 : vector<1x6x128xf32> to vector<6x128xf32>
    %c1_82 = arith.constant 1 : index
    %c1_83 = arith.constant 1 : index
    %329 = memref.load %arg2[%c1_82, %c1_83] : memref<8x4xf32, #tpu.memory_space<smem>>
    %330 = vector.broadcast %329 : f32 to vector<6x128xf32>
    %331 = arith.mulf %328, %330 : vector<6x128xf32>
    %332 = arith.addf %326, %331 : vector<6x128xf32>
    %333 = vector.extract_strided_slice %6 {offsets = [2, 0, 0], sizes = [1, 6, 128], strides = [1, 1, 1]} : vector<4x6x128xf32> to vector<1x6x128xf32>
    %334 = vector.shape_cast %333 : vector<1x6x128xf32> to vector<6x128xf32>
    %c1_84 = arith.constant 1 : index
    %c2_85 = arith.constant 2 : index
    %335 = memref.load %arg2[%c1_84, %c2_85] : memref<8x4xf32, #tpu.memory_space<smem>>
    %336 = vector.broadcast %335 : f32 to vector<6x128xf32>
    %337 = arith.mulf %334, %336 : vector<6x128xf32>
    %338 = arith.addf %332, %337 : vector<6x128xf32>
    %339 = vector.extract_strided_slice %6 {offsets = [3, 0, 0], sizes = [1, 6, 128], strides = [1, 1, 1]} : vector<4x6x128xf32> to vector<1x6x128xf32>
    %340 = vector.shape_cast %339 : vector<1x6x128xf32> to vector<6x128xf32>
    %c1_86 = arith.constant 1 : index
    %c3_87 = arith.constant 3 : index
    %341 = memref.load %arg2[%c1_86, %c3_87] : memref<8x4xf32, #tpu.memory_space<smem>>
    %342 = vector.broadcast %341 : f32 to vector<6x128xf32>
    %343 = arith.mulf %340, %342 : vector<6x128xf32>
    %344 = arith.addf %338, %343 : vector<6x128xf32>
    %345 = arith.addf %318, %344 : vector<6x128xf32>
    %cst_88 = arith.constant 0.000000e+00 : f32
    %346 = vector.broadcast %cst_88 : f32 to vector<6x128xf32>
    %347 = arith.maximumf %345, %346 : vector<6x128xf32>
    %c1_89 = arith.constant 1 : index
    %c0_90 = arith.constant 0 : index
    %c0_91 = arith.constant 0 : index
    %348 = vector.load %arg6[%c1_89, %c0_90, %c0_91] : memref<8x6x128xf32, #tpu.memory_space<vmem>>, vector<1x6x128xf32>
    %349 = vector.shape_cast %348 : vector<1x6x128xf32> to vector<6x128xf32>
    %350 = vector.shape_cast %347 : vector<6x128xf32> to vector<1x6x128xf32>
    tpu.vector_store %arg6[%c1_89, %c0_90, %c0_91], %350 {strides = array<i32>} : memref<8x6x128xf32, #tpu.memory_space<vmem>>, vector<1x6x128xf32>,
    %c2_92 = arith.constant 2 : index
    %c0_93 = arith.constant 0 : index
    %351 = memref.load %arg4[%c2_92, %c0_93] : memref<8x12xf32, #tpu.memory_space<smem>>
    %352 = vector.extract_strided_slice %0 {offsets = [0, 0, 0], sizes = [1, 7, 128], strides = [1, 1, 1]} : vector<4x7x128xf32> to vector<1x7x128xf32>
    %353 = vector.shape_cast %352 : vector<1x7x128xf32> to vector<7x128xf32>
    %354 = vector.broadcast %351 : f32 to vector<7x128xf32>
    %355 = arith.mulf %353, %354 : vector<7x128xf32>
    %356 = vector.extract_strided_slice %3 {offsets = [0, 0, 0], sizes = [1, 6, 128], strides = [1, 1, 1]} : vector<4x6x128xf32> to vector<1x6x128xf32>
    %357 = vector.shape_cast %356 : vector<1x6x128xf32> to vector<6x128xf32>
    %358 = vector.broadcast %351 : f32 to vector<6x128xf32>
    %359 = arith.mulf %357, %358 : vector<6x128xf32>
    %c2_94 = arith.constant 2 : index
    %c1_95 = arith.constant 1 : index
    %360 = memref.load %arg4[%c2_94, %c1_95] : memref<8x12xf32, #tpu.memory_space<smem>>
    %361 = vector.extract_strided_slice %1 {offsets = [0, 0, 0], sizes = [1, 7, 128], strides = [1, 1, 1]} : vector<4x7x128xf32> to vector<1x7x128xf32>
    %362 = vector.shape_cast %361 : vector<1x7x128xf32> to vector<7x128xf32>
    %363 = vector.broadcast %360 : f32 to vector<7x128xf32>
    %364 = arith.mulf %362, %363 : vector<7x128xf32>
    %365 = vector.extract_strided_slice %4 {offsets = [0, 0, 0], sizes = [1, 6, 128], strides = [1, 1, 1]} : vector<4x6x128xf32> to vector<1x6x128xf32>
    %366 = vector.shape_cast %365 : vector<1x6x128xf32> to vector<6x128xf32>
    %367 = vector.broadcast %360 : f32 to vector<6x128xf32>
    %368 = arith.mulf %366, %367 : vector<6x128xf32>
    %369 = arith.addf %355, %364 : vector<7x128xf32>
    %370 = arith.addf %359, %368 : vector<6x128xf32>
    %c2_96 = arith.constant 2 : index
    %c2_97 = arith.constant 2 : index
    %371 = memref.load %arg4[%c2_96, %c2_97] : memref<8x12xf32, #tpu.memory_space<smem>>
    %372 = vector.extract_strided_slice %2 {offsets = [0, 0, 0], sizes = [1, 7, 128], strides = [1, 1, 1]} : vector<4x7x128xf32> to vector<1x7x128xf32>
    %373 = vector.shape_cast %372 : vector<1x7x128xf32> to vector<7x128xf32>
    %374 = vector.broadcast %371 : f32 to vector<7x128xf32>
    %375 = arith.mulf %373, %374 : vector<7x128xf32>
    %376 = vector.extract_strided_slice %5 {offsets = [0, 0, 0], sizes = [1, 6, 128], strides = [1, 1, 1]} : vector<4x6x128xf32> to vector<1x6x128xf32>
    %377 = vector.shape_cast %376 : vector<1x6x128xf32> to vector<6x128xf32>
    %378 = vector.broadcast %371 : f32 to vector<6x128xf32>
    %379 = arith.mulf %377, %378 : vector<6x128xf32>
    %380 = arith.addf %369, %375 : vector<7x128xf32>
    %381 = arith.addf %370, %379 : vector<6x128xf32>
    %c2_98 = arith.constant 2 : index
    %c3_99 = arith.constant 3 : index
    %382 = memref.load %arg4[%c2_98, %c3_99] : memref<8x12xf32, #tpu.memory_space<smem>>
    %383 = vector.extract_strided_slice %0 {offsets = [1, 0, 0], sizes = [1, 7, 128], strides = [1, 1, 1]} : vector<4x7x128xf32> to vector<1x7x128xf32>
    %384 = vector.shape_cast %383 : vector<1x7x128xf32> to vector<7x128xf32>
    %385 = vector.broadcast %382 : f32 to vector<7x128xf32>
    %386 = arith.mulf %384, %385 : vector<7x128xf32>
    %387 = vector.extract_strided_slice %3 {offsets = [1, 0, 0], sizes = [1, 6, 128], strides = [1, 1, 1]} : vector<4x6x128xf32> to vector<1x6x128xf32>
    %388 = vector.shape_cast %387 : vector<1x6x128xf32> to vector<6x128xf32>
    %389 = vector.broadcast %382 : f32 to vector<6x128xf32>
    %390 = arith.mulf %388, %389 : vector<6x128xf32>
    %391 = arith.addf %380, %386 : vector<7x128xf32>
    %392 = arith.addf %381, %390 : vector<6x128xf32>
    %c2_100 = arith.constant 2 : index
    %c4_101 = arith.constant 4 : index
    %393 = memref.load %arg4[%c2_100, %c4_101] : memref<8x12xf32, #tpu.memory_space<smem>>
    %394 = vector.extract_strided_slice %1 {offsets = [1, 0, 0], sizes = [1, 7, 128], strides = [1, 1, 1]} : vector<4x7x128xf32> to vector<1x7x128xf32>
    %395 = vector.shape_cast %394 : vector<1x7x128xf32> to vector<7x128xf32>
    %396 = vector.broadcast %393 : f32 to vector<7x128xf32>
    %397 = arith.mulf %395, %396 : vector<7x128xf32>
    %398 = vector.extract_strided_slice %4 {offsets = [1, 0, 0], sizes = [1, 6, 128], strides = [1, 1, 1]} : vector<4x6x128xf32> to vector<1x6x128xf32>
    %399 = vector.shape_cast %398 : vector<1x6x128xf32> to vector<6x128xf32>
    %400 = vector.broadcast %393 : f32 to vector<6x128xf32>
    %401 = arith.mulf %399, %400 : vector<6x128xf32>
    %402 = arith.addf %391, %397 : vector<7x128xf32>
    %403 = arith.addf %392, %401 : vector<6x128xf32>
    %c2_102 = arith.constant 2 : index
    %c5_103 = arith.constant 5 : index
    %404 = memref.load %arg4[%c2_102, %c5_103] : memref<8x12xf32, #tpu.memory_space<smem>>
    %405 = vector.extract_strided_slice %2 {offsets = [1, 0, 0], sizes = [1, 7, 128], strides = [1, 1, 1]} : vector<4x7x128xf32> to vector<1x7x128xf32>
    %406 = vector.shape_cast %405 : vector<1x7x128xf32> to vector<7x128xf32>
    %407 = vector.broadcast %404 : f32 to vector<7x128xf32>
    %408 = arith.mulf %406, %407 : vector<7x128xf32>
    %409 = vector.extract_strided_slice %5 {offsets = [1, 0, 0], sizes = [1, 6, 128], strides = [1, 1, 1]} : vector<4x6x128xf32> to vector<1x6x128xf32>
    %410 = vector.shape_cast %409 : vector<1x6x128xf32> to vector<6x128xf32>
    %411 = vector.broadcast %404 : f32 to vector<6x128xf32>
    %412 = arith.mulf %410, %411 : vector<6x128xf32>
    %413 = arith.addf %402, %408 : vector<7x128xf32>
    %414 = arith.addf %403, %412 : vector<6x128xf32>
    %c2_104 = arith.constant 2 : index
    %c6_105 = arith.constant 6 : index
    %415 = memref.load %arg4[%c2_104, %c6_105] : memref<8x12xf32, #tpu.memory_space<smem>>
    %416 = vector.extract_strided_slice %0 {offsets = [2, 0, 0], sizes = [1, 7, 128], strides = [1, 1, 1]} : vector<4x7x128xf32> to vector<1x7x128xf32>
    %417 = vector.shape_cast %416 : vector<1x7x128xf32> to vector<7x128xf32>
    %418 = vector.broadcast %415 : f32 to vector<7x128xf32>
    %419 = arith.mulf %417, %418 : vector<7x128xf32>
    %420 = vector.extract_strided_slice %3 {offsets = [2, 0, 0], sizes = [1, 6, 128], strides = [1, 1, 1]} : vector<4x6x128xf32> to vector<1x6x128xf32>
    %421 = vector.shape_cast %420 : vector<1x6x128xf32> to vector<6x128xf32>
    %422 = vector.broadcast %415 : f32 to vector<6x128xf32>
    %423 = arith.mulf %421, %422 : vector<6x128xf32>
    %424 = arith.addf %413, %419 : vector<7x128xf32>
    %425 = arith.addf %414, %423 : vector<6x128xf32>
    %c2_106 = arith.constant 2 : index
    %c7_107 = arith.constant 7 : index
    %426 = memref.load %arg4[%c2_106, %c7_107] : memref<8x12xf32, #tpu.memory_space<smem>>
    %427 = vector.extract_strided_slice %1 {offsets = [2, 0, 0], sizes = [1, 7, 128], strides = [1, 1, 1]} : vector<4x7x128xf32> to vector<1x7x128xf32>
    %428 = vector.shape_cast %427 : vector<1x7x128xf32> to vector<7x128xf32>
    %429 = vector.broadcast %426 : f32 to vector<7x128xf32>
    %430 = arith.mulf %428, %429 : vector<7x128xf32>
    %431 = vector.extract_strided_slice %4 {offsets = [2, 0, 0], sizes = [1, 6, 128], strides = [1, 1, 1]} : vector<4x6x128xf32> to vector<1x6x128xf32>
    %432 = vector.shape_cast %431 : vector<1x6x128xf32> to vector<6x128xf32>
    %433 = vector.broadcast %426 : f32 to vector<6x128xf32>
    %434 = arith.mulf %432, %433 : vector<6x128xf32>
    %435 = arith.addf %424, %430 : vector<7x128xf32>
    %436 = arith.addf %425, %434 : vector<6x128xf32>
    %c2_108 = arith.constant 2 : index
    %c8_109 = arith.constant 8 : index
    %437 = memref.load %arg4[%c2_108, %c8_109] : memref<8x12xf32, #tpu.memory_space<smem>>
    %438 = vector.extract_strided_slice %2 {offsets = [2, 0, 0], sizes = [1, 7, 128], strides = [1, 1, 1]} : vector<4x7x128xf32> to vector<1x7x128xf32>
    %439 = vector.shape_cast %438 : vector<1x7x128xf32> to vector<7x128xf32>
    %440 = vector.broadcast %437 : f32 to vector<7x128xf32>
    %441 = arith.mulf %439, %440 : vector<7x128xf32>
    %442 = vector.extract_strided_slice %5 {offsets = [2, 0, 0], sizes = [1, 6, 128], strides = [1, 1, 1]} : vector<4x6x128xf32> to vector<1x6x128xf32>
    %443 = vector.shape_cast %442 : vector<1x6x128xf32> to vector<6x128xf32>
    %444 = vector.broadcast %437 : f32 to vector<6x128xf32>
    %445 = arith.mulf %443, %444 : vector<6x128xf32>
    %446 = arith.addf %435, %441 : vector<7x128xf32>
    %447 = arith.addf %436, %445 : vector<6x128xf32>
    %c2_110 = arith.constant 2 : index
    %c9_111 = arith.constant 9 : index
    %448 = memref.load %arg4[%c2_110, %c9_111] : memref<8x12xf32, #tpu.memory_space<smem>>
    %449 = vector.extract_strided_slice %0 {offsets = [3, 0, 0], sizes = [1, 7, 128], strides = [1, 1, 1]} : vector<4x7x128xf32> to vector<1x7x128xf32>
    %450 = vector.shape_cast %449 : vector<1x7x128xf32> to vector<7x128xf32>
    %451 = vector.broadcast %448 : f32 to vector<7x128xf32>
    %452 = arith.mulf %450, %451 : vector<7x128xf32>
    %453 = vector.extract_strided_slice %3 {offsets = [3, 0, 0], sizes = [1, 6, 128], strides = [1, 1, 1]} : vector<4x6x128xf32> to vector<1x6x128xf32>
    %454 = vector.shape_cast %453 : vector<1x6x128xf32> to vector<6x128xf32>
    %455 = vector.broadcast %448 : f32 to vector<6x128xf32>
    %456 = arith.mulf %454, %455 : vector<6x128xf32>
    %457 = arith.addf %446, %452 : vector<7x128xf32>
    %458 = arith.addf %447, %456 : vector<6x128xf32>
    %c2_112 = arith.constant 2 : index
    %c10_113 = arith.constant 10 : index
    %459 = memref.load %arg4[%c2_112, %c10_113] : memref<8x12xf32, #tpu.memory_space<smem>>
    %460 = vector.extract_strided_slice %1 {offsets = [3, 0, 0], sizes = [1, 7, 128], strides = [1, 1, 1]} : vector<4x7x128xf32> to vector<1x7x128xf32>
    %461 = vector.shape_cast %460 : vector<1x7x128xf32> to vector<7x128xf32>
    %462 = vector.broadcast %459 : f32 to vector<7x128xf32>
    %463 = arith.mulf %461, %462 : vector<7x128xf32>
    %464 = vector.extract_strided_slice %4 {offsets = [3, 0, 0], sizes = [1, 6, 128], strides = [1, 1, 1]} : vector<4x6x128xf32> to vector<1x6x128xf32>
    %465 = vector.shape_cast %464 : vector<1x6x128xf32> to vector<6x128xf32>
    %466 = vector.broadcast %459 : f32 to vector<6x128xf32>
    %467 = arith.mulf %465, %466 : vector<6x128xf32>
    %468 = arith.addf %457, %463 : vector<7x128xf32>
    %469 = arith.addf %458, %467 : vector<6x128xf32>
    %c2_114 = arith.constant 2 : index
    %c11_115 = arith.constant 11 : index
    %470 = memref.load %arg4[%c2_114, %c11_115] : memref<8x12xf32, #tpu.memory_space<smem>>
    %471 = vector.extract_strided_slice %2 {offsets = [3, 0, 0], sizes = [1, 7, 128], strides = [1, 1, 1]} : vector<4x7x128xf32> to vector<1x7x128xf32>
    %472 = vector.shape_cast %471 : vector<1x7x128xf32> to vector<7x128xf32>
    %473 = vector.broadcast %470 : f32 to vector<7x128xf32>
    %474 = arith.mulf %472, %473 : vector<7x128xf32>
    %475 = vector.extract_strided_slice %5 {offsets = [3, 0, 0], sizes = [1, 6, 128], strides = [1, 1, 1]} : vector<4x6x128xf32> to vector<1x6x128xf32>
    %476 = vector.shape_cast %475 : vector<1x6x128xf32> to vector<6x128xf32>
    %477 = vector.broadcast %470 : f32 to vector<6x128xf32>
    %478 = arith.mulf %476, %477 : vector<6x128xf32>
    %479 = arith.addf %468, %474 : vector<7x128xf32>
    %480 = arith.addf %469, %478 : vector<6x128xf32>
    %c0_116 = arith.constant 0 : index
    %c2_117 = arith.constant 2 : index
    %481 = memref.load %arg5[%c0_116, %c2_117] : memref<1x8xf32, #tpu.memory_space<smem>>
    %482 = vector.broadcast %481 : f32 to vector<7x128xf32>
    %483 = arith.addf %479, %482 : vector<7x128xf32>
    %c0_118 = arith.constant 0 : index
    %c2_119 = arith.constant 2 : index
    %484 = memref.load %arg5[%c0_118, %c2_119] : memref<1x8xf32, #tpu.memory_space<smem>>
    %485 = vector.broadcast %484 : f32 to vector<6x128xf32>
    %486 = arith.addf %480, %485 : vector<6x128xf32>
    %487 = vector.extract_strided_slice %483 {offsets = [0, 0], sizes = [6, 128], strides = [1, 1]} : vector<7x128xf32> to vector<6x128xf32>
    %488 = arith.maximumf %487, %486 : vector<6x128xf32>
    %489 = vector.extract_strided_slice %483 {offsets = [1, 0], sizes = [6, 128], strides = [1, 1]} : vector<7x128xf32> to vector<6x128xf32>
    %490 = arith.maximumf %488, %489 : vector<6x128xf32>
    %c0_120 = arith.constant 0 : index
    %c2_121 = arith.constant 2 : index
    %491 = memref.load %arg3[%c0_120, %c2_121] : memref<1x8xf32, #tpu.memory_space<smem>>
    %492 = vector.extract_strided_slice %6 {offsets = [0, 0, 0], sizes = [1, 6, 128], strides = [1, 1, 1]} : vector<4x6x128xf32> to vector<1x6x128xf32>
    %493 = vector.shape_cast %492 : vector<1x6x128xf32> to vector<6x128xf32>
    %c2_122 = arith.constant 2 : index
    %c0_123 = arith.constant 0 : index
    %494 = memref.load %arg2[%c2_122, %c0_123] : memref<8x4xf32, #tpu.memory_space<smem>>
    %495 = vector.broadcast %494 : f32 to vector<6x128xf32>
    %496 = arith.mulf %493, %495 : vector<6x128xf32>
    %497 = vector.broadcast %491 : f32 to vector<6x128xf32>
    %498 = arith.addf %497, %496 : vector<6x128xf32>
    %499 = vector.extract_strided_slice %6 {offsets = [1, 0, 0], sizes = [1, 6, 128], strides = [1, 1, 1]} : vector<4x6x128xf32> to vector<1x6x128xf32>
    %500 = vector.shape_cast %499 : vector<1x6x128xf32> to vector<6x128xf32>
    %c2_124 = arith.constant 2 : index
    %c1_125 = arith.constant 1 : index
    %501 = memref.load %arg2[%c2_124, %c1_125] : memref<8x4xf32, #tpu.memory_space<smem>>
    %502 = vector.broadcast %501 : f32 to vector<6x128xf32>
    %503 = arith.mulf %500, %502 : vector<6x128xf32>
    %504 = arith.addf %498, %503 : vector<6x128xf32>
    %505 = vector.extract_strided_slice %6 {offsets = [2, 0, 0], sizes = [1, 6, 128], strides = [1, 1, 1]} : vector<4x6x128xf32> to vector<1x6x128xf32>
    %506 = vector.shape_cast %505 : vector<1x6x128xf32> to vector<6x128xf32>
    %c2_126 = arith.constant 2 : index
    %c2_127 = arith.constant 2 : index
    %507 = memref.load %arg2[%c2_126, %c2_127] : memref<8x4xf32, #tpu.memory_space<smem>>
    %508 = vector.broadcast %507 : f32 to vector<6x128xf32>
    %509 = arith.mulf %506, %508 : vector<6x128xf32>
    %510 = arith.addf %504, %509 : vector<6x128xf32>
    %511 = vector.extract_strided_slice %6 {offsets = [3, 0, 0], sizes = [1, 6, 128], strides = [1, 1, 1]} : vector<4x6x128xf32> to vector<1x6x128xf32>
    %512 = vector.shape_cast %511 : vector<1x6x128xf32> to vector<6x128xf32>
    %c2_128 = arith.constant 2 : index
    %c3_129 = arith.constant 3 : index
    %513 = memref.load %arg2[%c2_128, %c3_129] : memref<8x4xf32, #tpu.memory_space<smem>>
    %514 = vector.broadcast %513 : f32 to vector<6x128xf32>
    %515 = arith.mulf %512, %514 : vector<6x128xf32>
    %516 = arith.addf %510, %515 : vector<6x128xf32>
    %517 = arith.addf %490, %516 : vector<6x128xf32>
    %cst_130 = arith.constant 0.000000e+00 : f32
    %518 = vector.broadcast %cst_130 : f32 to vector<6x128xf32>
    %519 = arith.maximumf %517, %518 : vector<6x128xf32>
    %c2_131 = arith.constant 2 : index
    %c0_132 = arith.constant 0 : index
    %c0_133 = arith.constant 0 : index
    %520 = vector.load %arg6[%c2_131, %c0_132, %c0_133] : memref<8x6x128xf32, #tpu.memory_space<vmem>>, vector<1x6x128xf32>
    %521 = vector.shape_cast %520 : vector<1x6x128xf32> to vector<6x128xf32>
    %522 = vector.shape_cast %519 : vector<6x128xf32> to vector<1x6x128xf32>
    tpu.vector_store %arg6[%c2_131, %c0_132, %c0_133], %522 {strides = array<i32>} : memref<8x6x128xf32, #tpu.memory_space<vmem>>, vector<1x6x128xf32>,
    %c3_134 = arith.constant 3 : index
    %c0_135 = arith.constant 0 : index
    %523 = memref.load %arg4[%c3_134, %c0_135] : memref<8x12xf32, #tpu.memory_space<smem>>
    %524 = vector.extract_strided_slice %0 {offsets = [0, 0, 0], sizes = [1, 7, 128], strides = [1, 1, 1]} : vector<4x7x128xf32> to vector<1x7x128xf32>
    %525 = vector.shape_cast %524 : vector<1x7x128xf32> to vector<7x128xf32>
    %526 = vector.broadcast %523 : f32 to vector<7x128xf32>
    %527 = arith.mulf %525, %526 : vector<7x128xf32>
    %528 = vector.extract_strided_slice %3 {offsets = [0, 0, 0], sizes = [1, 6, 128], strides = [1, 1, 1]} : vector<4x6x128xf32> to vector<1x6x128xf32>
    %529 = vector.shape_cast %528 : vector<1x6x128xf32> to vector<6x128xf32>
    %530 = vector.broadcast %523 : f32 to vector<6x128xf32>
    %531 = arith.mulf %529, %530 : vector<6x128xf32>
    %c3_136 = arith.constant 3 : index
    %c1_137 = arith.constant 1 : index
    %532 = memref.load %arg4[%c3_136, %c1_137] : memref<8x12xf32, #tpu.memory_space<smem>>
    %533 = vector.extract_strided_slice %1 {offsets = [0, 0, 0], sizes = [1, 7, 128], strides = [1, 1, 1]} : vector<4x7x128xf32> to vector<1x7x128xf32>
    %534 = vector.shape_cast %533 : vector<1x7x128xf32> to vector<7x128xf32>
    %535 = vector.broadcast %532 : f32 to vector<7x128xf32>
    %536 = arith.mulf %534, %535 : vector<7x128xf32>
    %537 = vector.extract_strided_slice %4 {offsets = [0, 0, 0], sizes = [1, 6, 128], strides = [1, 1, 1]} : vector<4x6x128xf32> to vector<1x6x128xf32>
    %538 = vector.shape_cast %537 : vector<1x6x128xf32> to vector<6x128xf32>
    %539 = vector.broadcast %532 : f32 to vector<6x128xf32>
    %540 = arith.mulf %538, %539 : vector<6x128xf32>
    %541 = arith.addf %527, %536 : vector<7x128xf32>
    %542 = arith.addf %531, %540 : vector<6x128xf32>
    %c3_138 = arith.constant 3 : index
    %c2_139 = arith.constant 2 : index
    %543 = memref.load %arg4[%c3_138, %c2_139] : memref<8x12xf32, #tpu.memory_space<smem>>
    %544 = vector.extract_strided_slice %2 {offsets = [0, 0, 0], sizes = [1, 7, 128], strides = [1, 1, 1]} : vector<4x7x128xf32> to vector<1x7x128xf32>
    %545 = vector.shape_cast %544 : vector<1x7x128xf32> to vector<7x128xf32>
    %546 = vector.broadcast %543 : f32 to vector<7x128xf32>
    %547 = arith.mulf %545, %546 : vector<7x128xf32>
    %548 = vector.extract_strided_slice %5 {offsets = [0, 0, 0], sizes = [1, 6, 128], strides = [1, 1, 1]} : vector<4x6x128xf32> to vector<1x6x128xf32>
    %549 = vector.shape_cast %548 : vector<1x6x128xf32> to vector<6x128xf32>
    %550 = vector.broadcast %543 : f32 to vector<6x128xf32>
    %551 = arith.mulf %549, %550 : vector<6x128xf32>
    %552 = arith.addf %541, %547 : vector<7x128xf32>
    %553 = arith.addf %542, %551 : vector<6x128xf32>
    %c3_140 = arith.constant 3 : index
    %c3_141 = arith.constant 3 : index
    %554 = memref.load %arg4[%c3_140, %c3_141] : memref<8x12xf32, #tpu.memory_space<smem>>
    %555 = vector.extract_strided_slice %0 {offsets = [1, 0, 0], sizes = [1, 7, 128], strides = [1, 1, 1]} : vector<4x7x128xf32> to vector<1x7x128xf32>
    %556 = vector.shape_cast %555 : vector<1x7x128xf32> to vector<7x128xf32>
    %557 = vector.broadcast %554 : f32 to vector<7x128xf32>
    %558 = arith.mulf %556, %557 : vector<7x128xf32>
    %559 = vector.extract_strided_slice %3 {offsets = [1, 0, 0], sizes = [1, 6, 128], strides = [1, 1, 1]} : vector<4x6x128xf32> to vector<1x6x128xf32>
    %560 = vector.shape_cast %559 : vector<1x6x128xf32> to vector<6x128xf32>
    %561 = vector.broadcast %554 : f32 to vector<6x128xf32>
    %562 = arith.mulf %560, %561 : vector<6x128xf32>
    %563 = arith.addf %552, %558 : vector<7x128xf32>
    %564 = arith.addf %553, %562 : vector<6x128xf32>
    %c3_142 = arith.constant 3 : index
    %c4_143 = arith.constant 4 : index
    %565 = memref.load %arg4[%c3_142, %c4_143] : memref<8x12xf32, #tpu.memory_space<smem>>
    %566 = vector.extract_strided_slice %1 {offsets = [1, 0, 0], sizes = [1, 7, 128], strides = [1, 1, 1]} : vector<4x7x128xf32> to vector<1x7x128xf32>
    %567 = vector.shape_cast %566 : vector<1x7x128xf32> to vector<7x128xf32>
    %568 = vector.broadcast %565 : f32 to vector<7x128xf32>
    %569 = arith.mulf %567, %568 : vector<7x128xf32>
    %570 = vector.extract_strided_slice %4 {offsets = [1, 0, 0], sizes = [1, 6, 128], strides = [1, 1, 1]} : vector<4x6x128xf32> to vector<1x6x128xf32>
    %571 = vector.shape_cast %570 : vector<1x6x128xf32> to vector<6x128xf32>
    %572 = vector.broadcast %565 : f32 to vector<6x128xf32>
    %573 = arith.mulf %571, %572 : vector<6x128xf32>
    %574 = arith.addf %563, %569 : vector<7x128xf32>
    %575 = arith.addf %564, %573 : vector<6x128xf32>
    %c3_144 = arith.constant 3 : index
    %c5_145 = arith.constant 5 : index
    %576 = memref.load %arg4[%c3_144, %c5_145] : memref<8x12xf32, #tpu.memory_space<smem>>
    %577 = vector.extract_strided_slice %2 {offsets = [1, 0, 0], sizes = [1, 7, 128], strides = [1, 1, 1]} : vector<4x7x128xf32> to vector<1x7x128xf32>
    %578 = vector.shape_cast %577 : vector<1x7x128xf32> to vector<7x128xf32>
    %579 = vector.broadcast %576 : f32 to vector<7x128xf32>
    %580 = arith.mulf %578, %579 : vector<7x128xf32>
    %581 = vector.extract_strided_slice %5 {offsets = [1, 0, 0], sizes = [1, 6, 128], strides = [1, 1, 1]} : vector<4x6x128xf32> to vector<1x6x128xf32>
    %582 = vector.shape_cast %581 : vector<1x6x128xf32> to vector<6x128xf32>
    %583 = vector.broadcast %576 : f32 to vector<6x128xf32>
    %584 = arith.mulf %582, %583 : vector<6x128xf32>
    %585 = arith.addf %574, %580 : vector<7x128xf32>
    %586 = arith.addf %575, %584 : vector<6x128xf32>
    %c3_146 = arith.constant 3 : index
    %c6_147 = arith.constant 6 : index
    %587 = memref.load %arg4[%c3_146, %c6_147] : memref<8x12xf32, #tpu.memory_space<smem>>
    %588 = vector.extract_strided_slice %0 {offsets = [2, 0, 0], sizes = [1, 7, 128], strides = [1, 1, 1]} : vector<4x7x128xf32> to vector<1x7x128xf32>
    %589 = vector.shape_cast %588 : vector<1x7x128xf32> to vector<7x128xf32>
    %590 = vector.broadcast %587 : f32 to vector<7x128xf32>
    %591 = arith.mulf %589, %590 : vector<7x128xf32>
    %592 = vector.extract_strided_slice %3 {offsets = [2, 0, 0], sizes = [1, 6, 128], strides = [1, 1, 1]} : vector<4x6x128xf32> to vector<1x6x128xf32>
    %593 = vector.shape_cast %592 : vector<1x6x128xf32> to vector<6x128xf32>
    %594 = vector.broadcast %587 : f32 to vector<6x128xf32>
    %595 = arith.mulf %593, %594 : vector<6x128xf32>
    %596 = arith.addf %585, %591 : vector<7x128xf32>
    %597 = arith.addf %586, %595 : vector<6x128xf32>
    %c3_148 = arith.constant 3 : index
    %c7_149 = arith.constant 7 : index
    %598 = memref.load %arg4[%c3_148, %c7_149] : memref<8x12xf32, #tpu.memory_space<smem>>
    %599 = vector.extract_strided_slice %1 {offsets = [2, 0, 0], sizes = [1, 7, 128], strides = [1, 1, 1]} : vector<4x7x128xf32> to vector<1x7x128xf32>
    %600 = vector.shape_cast %599 : vector<1x7x128xf32> to vector<7x128xf32>
    %601 = vector.broadcast %598 : f32 to vector<7x128xf32>
    %602 = arith.mulf %600, %601 : vector<7x128xf32>
    %603 = vector.extract_strided_slice %4 {offsets = [2, 0, 0], sizes = [1, 6, 128], strides = [1, 1, 1]} : vector<4x6x128xf32> to vector<1x6x128xf32>
    %604 = vector.shape_cast %603 : vector<1x6x128xf32> to vector<6x128xf32>
    %605 = vector.broadcast %598 : f32 to vector<6x128xf32>
    %606 = arith.mulf %604, %605 : vector<6x128xf32>
    %607 = arith.addf %596, %602 : vector<7x128xf32>
    %608 = arith.addf %597, %606 : vector<6x128xf32>
    %c3_150 = arith.constant 3 : index
    %c8_151 = arith.constant 8 : index
    %609 = memref.load %arg4[%c3_150, %c8_151] : memref<8x12xf32, #tpu.memory_space<smem>>
    %610 = vector.extract_strided_slice %2 {offsets = [2, 0, 0], sizes = [1, 7, 128], strides = [1, 1, 1]} : vector<4x7x128xf32> to vector<1x7x128xf32>
    %611 = vector.shape_cast %610 : vector<1x7x128xf32> to vector<7x128xf32>
    %612 = vector.broadcast %609 : f32 to vector<7x128xf32>
    %613 = arith.mulf %611, %612 : vector<7x128xf32>
    %614 = vector.extract_strided_slice %5 {offsets = [2, 0, 0], sizes = [1, 6, 128], strides = [1, 1, 1]} : vector<4x6x128xf32> to vector<1x6x128xf32>
    %615 = vector.shape_cast %614 : vector<1x6x128xf32> to vector<6x128xf32>
    %616 = vector.broadcast %609 : f32 to vector<6x128xf32>
    %617 = arith.mulf %615, %616 : vector<6x128xf32>
    %618 = arith.addf %607, %613 : vector<7x128xf32>
    %619 = arith.addf %608, %617 : vector<6x128xf32>
    %c3_152 = arith.constant 3 : index
    %c9_153 = arith.constant 9 : index
    %620 = memref.load %arg4[%c3_152, %c9_153] : memref<8x12xf32, #tpu.memory_space<smem>>
    %621 = vector.extract_strided_slice %0 {offsets = [3, 0, 0], sizes = [1, 7, 128], strides = [1, 1, 1]} : vector<4x7x128xf32> to vector<1x7x128xf32>
    %622 = vector.shape_cast %621 : vector<1x7x128xf32> to vector<7x128xf32>
    %623 = vector.broadcast %620 : f32 to vector<7x128xf32>
    %624 = arith.mulf %622, %623 : vector<7x128xf32>
    %625 = vector.extract_strided_slice %3 {offsets = [3, 0, 0], sizes = [1, 6, 128], strides = [1, 1, 1]} : vector<4x6x128xf32> to vector<1x6x128xf32>
    %626 = vector.shape_cast %625 : vector<1x6x128xf32> to vector<6x128xf32>
    %627 = vector.broadcast %620 : f32 to vector<6x128xf32>
    %628 = arith.mulf %626, %627 : vector<6x128xf32>
    %629 = arith.addf %618, %624 : vector<7x128xf32>
    %630 = arith.addf %619, %628 : vector<6x128xf32>
    %c3_154 = arith.constant 3 : index
    %c10_155 = arith.constant 10 : index
    %631 = memref.load %arg4[%c3_154, %c10_155] : memref<8x12xf32, #tpu.memory_space<smem>>
    %632 = vector.extract_strided_slice %1 {offsets = [3, 0, 0], sizes = [1, 7, 128], strides = [1, 1, 1]} : vector<4x7x128xf32> to vector<1x7x128xf32>
    %633 = vector.shape_cast %632 : vector<1x7x128xf32> to vector<7x128xf32>
    %634 = vector.broadcast %631 : f32 to vector<7x128xf32>
    %635 = arith.mulf %633, %634 : vector<7x128xf32>
    %636 = vector.extract_strided_slice %4 {offsets = [3, 0, 0], sizes = [1, 6, 128], strides = [1, 1, 1]} : vector<4x6x128xf32> to vector<1x6x128xf32>
    %637 = vector.shape_cast %636 : vector<1x6x128xf32> to vector<6x128xf32>
    %638 = vector.broadcast %631 : f32 to vector<6x128xf32>
    %639 = arith.mulf %637, %638 : vector<6x128xf32>
    %640 = arith.addf %629, %635 : vector<7x128xf32>
    %641 = arith.addf %630, %639 : vector<6x128xf32>
    %c3_156 = arith.constant 3 : index
    %c11_157 = arith.constant 11 : index
    %642 = memref.load %arg4[%c3_156, %c11_157] : memref<8x12xf32, #tpu.memory_space<smem>>
    %643 = vector.extract_strided_slice %2 {offsets = [3, 0, 0], sizes = [1, 7, 128], strides = [1, 1, 1]} : vector<4x7x128xf32> to vector<1x7x128xf32>
    %644 = vector.shape_cast %643 : vector<1x7x128xf32> to vector<7x128xf32>
    %645 = vector.broadcast %642 : f32 to vector<7x128xf32>
    %646 = arith.mulf %644, %645 : vector<7x128xf32>
    %647 = vector.extract_strided_slice %5 {offsets = [3, 0, 0], sizes = [1, 6, 128], strides = [1, 1, 1]} : vector<4x6x128xf32> to vector<1x6x128xf32>
    %648 = vector.shape_cast %647 : vector<1x6x128xf32> to vector<6x128xf32>
    %649 = vector.broadcast %642 : f32 to vector<6x128xf32>
    %650 = arith.mulf %648, %649 : vector<6x128xf32>
    %651 = arith.addf %640, %646 : vector<7x128xf32>
    %652 = arith.addf %641, %650 : vector<6x128xf32>
    %c0_158 = arith.constant 0 : index
    %c3_159 = arith.constant 3 : index
    %653 = memref.load %arg5[%c0_158, %c3_159] : memref<1x8xf32, #tpu.memory_space<smem>>
    %654 = vector.broadcast %653 : f32 to vector<7x128xf32>
    %655 = arith.addf %651, %654 : vector<7x128xf32>
    %c0_160 = arith.constant 0 : index
    %c3_161 = arith.constant 3 : index
    %656 = memref.load %arg5[%c0_160, %c3_161] : memref<1x8xf32, #tpu.memory_space<smem>>
    %657 = vector.broadcast %656 : f32 to vector<6x128xf32>
    %658 = arith.addf %652, %657 : vector<6x128xf32>
    %659 = vector.extract_strided_slice %655 {offsets = [0, 0], sizes = [6, 128], strides = [1, 1]} : vector<7x128xf32> to vector<6x128xf32>
    %660 = arith.maximumf %659, %658 : vector<6x128xf32>
    %661 = vector.extract_strided_slice %655 {offsets = [1, 0], sizes = [6, 128], strides = [1, 1]} : vector<7x128xf32> to vector<6x128xf32>
    %662 = arith.maximumf %660, %661 : vector<6x128xf32>
    %c0_162 = arith.constant 0 : index
    %c3_163 = arith.constant 3 : index
    %663 = memref.load %arg3[%c0_162, %c3_163] : memref<1x8xf32, #tpu.memory_space<smem>>
    %664 = vector.extract_strided_slice %6 {offsets = [0, 0, 0], sizes = [1, 6, 128], strides = [1, 1, 1]} : vector<4x6x128xf32> to vector<1x6x128xf32>
    %665 = vector.shape_cast %664 : vector<1x6x128xf32> to vector<6x128xf32>
    %c3_164 = arith.constant 3 : index
    %c0_165 = arith.constant 0 : index
    %666 = memref.load %arg2[%c3_164, %c0_165] : memref<8x4xf32, #tpu.memory_space<smem>>
    %667 = vector.broadcast %666 : f32 to vector<6x128xf32>
    %668 = arith.mulf %665, %667 : vector<6x128xf32>
    %669 = vector.broadcast %663 : f32 to vector<6x128xf32>
    %670 = arith.addf %669, %668 : vector<6x128xf32>
    %671 = vector.extract_strided_slice %6 {offsets = [1, 0, 0], sizes = [1, 6, 128], strides = [1, 1, 1]} : vector<4x6x128xf32> to vector<1x6x128xf32>
    %672 = vector.shape_cast %671 : vector<1x6x128xf32> to vector<6x128xf32>
    %c3_166 = arith.constant 3 : index
    %c1_167 = arith.constant 1 : index
    %673 = memref.load %arg2[%c3_166, %c1_167] : memref<8x4xf32, #tpu.memory_space<smem>>
    %674 = vector.broadcast %673 : f32 to vector<6x128xf32>
    %675 = arith.mulf %672, %674 : vector<6x128xf32>
    %676 = arith.addf %670, %675 : vector<6x128xf32>
    %677 = vector.extract_strided_slice %6 {offsets = [2, 0, 0], sizes = [1, 6, 128], strides = [1, 1, 1]} : vector<4x6x128xf32> to vector<1x6x128xf32>
    %678 = vector.shape_cast %677 : vector<1x6x128xf32> to vector<6x128xf32>
    %c3_168 = arith.constant 3 : index
    %c2_169 = arith.constant 2 : index
    %679 = memref.load %arg2[%c3_168, %c2_169] : memref<8x4xf32, #tpu.memory_space<smem>>
    %680 = vector.broadcast %679 : f32 to vector<6x128xf32>
    %681 = arith.mulf %678, %680 : vector<6x128xf32>
    %682 = arith.addf %676, %681 : vector<6x128xf32>
    %683 = vector.extract_strided_slice %6 {offsets = [3, 0, 0], sizes = [1, 6, 128], strides = [1, 1, 1]} : vector<4x6x128xf32> to vector<1x6x128xf32>
    %684 = vector.shape_cast %683 : vector<1x6x128xf32> to vector<6x128xf32>
    %c3_170 = arith.constant 3 : index
    %c3_171 = arith.constant 3 : index
    %685 = memref.load %arg2[%c3_170, %c3_171] : memref<8x4xf32, #tpu.memory_space<smem>>
    %686 = vector.broadcast %685 : f32 to vector<6x128xf32>
    %687 = arith.mulf %684, %686 : vector<6x128xf32>
    %688 = arith.addf %682, %687 : vector<6x128xf32>
    %689 = arith.addf %662, %688 : vector<6x128xf32>
    %cst_172 = arith.constant 0.000000e+00 : f32
    %690 = vector.broadcast %cst_172 : f32 to vector<6x128xf32>
    %691 = arith.maximumf %689, %690 : vector<6x128xf32>
    %c3_173 = arith.constant 3 : index
    %c0_174 = arith.constant 0 : index
    %c0_175 = arith.constant 0 : index
    %692 = vector.load %arg6[%c3_173, %c0_174, %c0_175] : memref<8x6x128xf32, #tpu.memory_space<vmem>>, vector<1x6x128xf32>
    %693 = vector.shape_cast %692 : vector<1x6x128xf32> to vector<6x128xf32>
    %694 = vector.shape_cast %691 : vector<6x128xf32> to vector<1x6x128xf32>
    tpu.vector_store %arg6[%c3_173, %c0_174, %c0_175], %694 {strides = array<i32>} : memref<8x6x128xf32, #tpu.memory_space<vmem>>, vector<1x6x128xf32>,
    %c4_176 = arith.constant 4 : index
    %c0_177 = arith.constant 0 : index
    %695 = memref.load %arg4[%c4_176, %c0_177] : memref<8x12xf32, #tpu.memory_space<smem>>
    %696 = vector.extract_strided_slice %0 {offsets = [0, 0, 0], sizes = [1, 7, 128], strides = [1, 1, 1]} : vector<4x7x128xf32> to vector<1x7x128xf32>
    %697 = vector.shape_cast %696 : vector<1x7x128xf32> to vector<7x128xf32>
    %698 = vector.broadcast %695 : f32 to vector<7x128xf32>
    %699 = arith.mulf %697, %698 : vector<7x128xf32>
    %700 = vector.extract_strided_slice %3 {offsets = [0, 0, 0], sizes = [1, 6, 128], strides = [1, 1, 1]} : vector<4x6x128xf32> to vector<1x6x128xf32>
    %701 = vector.shape_cast %700 : vector<1x6x128xf32> to vector<6x128xf32>
    %702 = vector.broadcast %695 : f32 to vector<6x128xf32>
    %703 = arith.mulf %701, %702 : vector<6x128xf32>
    %c4_178 = arith.constant 4 : index
    %c1_179 = arith.constant 1 : index
    %704 = memref.load %arg4[%c4_178, %c1_179] : memref<8x12xf32, #tpu.memory_space<smem>>
    %705 = vector.extract_strided_slice %1 {offsets = [0, 0, 0], sizes = [1, 7, 128], strides = [1, 1, 1]} : vector<4x7x128xf32> to vector<1x7x128xf32>
    %706 = vector.shape_cast %705 : vector<1x7x128xf32> to vector<7x128xf32>
    %707 = vector.broadcast %704 : f32 to vector<7x128xf32>
    %708 = arith.mulf %706, %707 : vector<7x128xf32>
    %709 = vector.extract_strided_slice %4 {offsets = [0, 0, 0], sizes = [1, 6, 128], strides = [1, 1, 1]} : vector<4x6x128xf32> to vector<1x6x128xf32>
    %710 = vector.shape_cast %709 : vector<1x6x128xf32> to vector<6x128xf32>
    %711 = vector.broadcast %704 : f32 to vector<6x128xf32>
    %712 = arith.mulf %710, %711 : vector<6x128xf32>
    %713 = arith.addf %699, %708 : vector<7x128xf32>
    %714 = arith.addf %703, %712 : vector<6x128xf32>
    %c4_180 = arith.constant 4 : index
    %c2_181 = arith.constant 2 : index
    %715 = memref.load %arg4[%c4_180, %c2_181] : memref<8x12xf32, #tpu.memory_space<smem>>
    %716 = vector.extract_strided_slice %2 {offsets = [0, 0, 0], sizes = [1, 7, 128], strides = [1, 1, 1]} : vector<4x7x128xf32> to vector<1x7x128xf32>
    %717 = vector.shape_cast %716 : vector<1x7x128xf32> to vector<7x128xf32>
    %718 = vector.broadcast %715 : f32 to vector<7x128xf32>
    %719 = arith.mulf %717, %718 : vector<7x128xf32>
    %720 = vector.extract_strided_slice %5 {offsets = [0, 0, 0], sizes = [1, 6, 128], strides = [1, 1, 1]} : vector<4x6x128xf32> to vector<1x6x128xf32>
    %721 = vector.shape_cast %720 : vector<1x6x128xf32> to vector<6x128xf32>
    %722 = vector.broadcast %715 : f32 to vector<6x128xf32>
    %723 = arith.mulf %721, %722 : vector<6x128xf32>
    %724 = arith.addf %713, %719 : vector<7x128xf32>
    %725 = arith.addf %714, %723 : vector<6x128xf32>
    %c4_182 = arith.constant 4 : index
    %c3_183 = arith.constant 3 : index
    %726 = memref.load %arg4[%c4_182, %c3_183] : memref<8x12xf32, #tpu.memory_space<smem>>
    %727 = vector.extract_strided_slice %0 {offsets = [1, 0, 0], sizes = [1, 7, 128], strides = [1, 1, 1]} : vector<4x7x128xf32> to vector<1x7x128xf32>
    %728 = vector.shape_cast %727 : vector<1x7x128xf32> to vector<7x128xf32>
    %729 = vector.broadcast %726 : f32 to vector<7x128xf32>
    %730 = arith.mulf %728, %729 : vector<7x128xf32>
    %731 = vector.extract_strided_slice %3 {offsets = [1, 0, 0], sizes = [1, 6, 128], strides = [1, 1, 1]} : vector<4x6x128xf32> to vector<1x6x128xf32>
    %732 = vector.shape_cast %731 : vector<1x6x128xf32> to vector<6x128xf32>
    %733 = vector.broadcast %726 : f32 to vector<6x128xf32>
    %734 = arith.mulf %732, %733 : vector<6x128xf32>
    %735 = arith.addf %724, %730 : vector<7x128xf32>
    %736 = arith.addf %725, %734 : vector<6x128xf32>
    %c4_184 = arith.constant 4 : index
    %c4_185 = arith.constant 4 : index
    %737 = memref.load %arg4[%c4_184, %c4_185] : memref<8x12xf32, #tpu.memory_space<smem>>
    %738 = vector.extract_strided_slice %1 {offsets = [1, 0, 0], sizes = [1, 7, 128], strides = [1, 1, 1]} : vector<4x7x128xf32> to vector<1x7x128xf32>
    %739 = vector.shape_cast %738 : vector<1x7x128xf32> to vector<7x128xf32>
    %740 = vector.broadcast %737 : f32 to vector<7x128xf32>
    %741 = arith.mulf %739, %740 : vector<7x128xf32>
    %742 = vector.extract_strided_slice %4 {offsets = [1, 0, 0], sizes = [1, 6, 128], strides = [1, 1, 1]} : vector<4x6x128xf32> to vector<1x6x128xf32>
    %743 = vector.shape_cast %742 : vector<1x6x128xf32> to vector<6x128xf32>
    %744 = vector.broadcast %737 : f32 to vector<6x128xf32>
    %745 = arith.mulf %743, %744 : vector<6x128xf32>
    %746 = arith.addf %735, %741 : vector<7x128xf32>
    %747 = arith.addf %736, %745 : vector<6x128xf32>
    %c4_186 = arith.constant 4 : index
    %c5_187 = arith.constant 5 : index
    %748 = memref.load %arg4[%c4_186, %c5_187] : memref<8x12xf32, #tpu.memory_space<smem>>
    %749 = vector.extract_strided_slice %2 {offsets = [1, 0, 0], sizes = [1, 7, 128], strides = [1, 1, 1]} : vector<4x7x128xf32> to vector<1x7x128xf32>
    %750 = vector.shape_cast %749 : vector<1x7x128xf32> to vector<7x128xf32>
    %751 = vector.broadcast %748 : f32 to vector<7x128xf32>
    %752 = arith.mulf %750, %751 : vector<7x128xf32>
    %753 = vector.extract_strided_slice %5 {offsets = [1, 0, 0], sizes = [1, 6, 128], strides = [1, 1, 1]} : vector<4x6x128xf32> to vector<1x6x128xf32>
    %754 = vector.shape_cast %753 : vector<1x6x128xf32> to vector<6x128xf32>
    %755 = vector.broadcast %748 : f32 to vector<6x128xf32>
    %756 = arith.mulf %754, %755 : vector<6x128xf32>
    %757 = arith.addf %746, %752 : vector<7x128xf32>
    %758 = arith.addf %747, %756 : vector<6x128xf32>
    %c4_188 = arith.constant 4 : index
    %c6_189 = arith.constant 6 : index
    %759 = memref.load %arg4[%c4_188, %c6_189] : memref<8x12xf32, #tpu.memory_space<smem>>
    %760 = vector.extract_strided_slice %0 {offsets = [2, 0, 0], sizes = [1, 7, 128], strides = [1, 1, 1]} : vector<4x7x128xf32> to vector<1x7x128xf32>
    %761 = vector.shape_cast %760 : vector<1x7x128xf32> to vector<7x128xf32>
    %762 = vector.broadcast %759 : f32 to vector<7x128xf32>
    %763 = arith.mulf %761, %762 : vector<7x128xf32>
    %764 = vector.extract_strided_slice %3 {offsets = [2, 0, 0], sizes = [1, 6, 128], strides = [1, 1, 1]} : vector<4x6x128xf32> to vector<1x6x128xf32>
    %765 = vector.shape_cast %764 : vector<1x6x128xf32> to vector<6x128xf32>
    %766 = vector.broadcast %759 : f32 to vector<6x128xf32>
    %767 = arith.mulf %765, %766 : vector<6x128xf32>
    %768 = arith.addf %757, %763 : vector<7x128xf32>
    %769 = arith.addf %758, %767 : vector<6x128xf32>
    %c4_190 = arith.constant 4 : index
    %c7_191 = arith.constant 7 : index
    %770 = memref.load %arg4[%c4_190, %c7_191] : memref<8x12xf32, #tpu.memory_space<smem>>
    %771 = vector.extract_strided_slice %1 {offsets = [2, 0, 0], sizes = [1, 7, 128], strides = [1, 1, 1]} : vector<4x7x128xf32> to vector<1x7x128xf32>
    %772 = vector.shape_cast %771 : vector<1x7x128xf32> to vector<7x128xf32>
    %773 = vector.broadcast %770 : f32 to vector<7x128xf32>
    %774 = arith.mulf %772, %773 : vector<7x128xf32>
    %775 = vector.extract_strided_slice %4 {offsets = [2, 0, 0], sizes = [1, 6, 128], strides = [1, 1, 1]} : vector<4x6x128xf32> to vector<1x6x128xf32>
    %776 = vector.shape_cast %775 : vector<1x6x128xf32> to vector<6x128xf32>
    %777 = vector.broadcast %770 : f32 to vector<6x128xf32>
    %778 = arith.mulf %776, %777 : vector<6x128xf32>
    %779 = arith.addf %768, %774 : vector<7x128xf32>
    %780 = arith.addf %769, %778 : vector<6x128xf32>
    %c4_192 = arith.constant 4 : index
    %c8_193 = arith.constant 8 : index
    %781 = memref.load %arg4[%c4_192, %c8_193] : memref<8x12xf32, #tpu.memory_space<smem>>
    %782 = vector.extract_strided_slice %2 {offsets = [2, 0, 0], sizes = [1, 7, 128], strides = [1, 1, 1]} : vector<4x7x128xf32> to vector<1x7x128xf32>
    %783 = vector.shape_cast %782 : vector<1x7x128xf32> to vector<7x128xf32>
    %784 = vector.broadcast %781 : f32 to vector<7x128xf32>
    %785 = arith.mulf %783, %784 : vector<7x128xf32>
    %786 = vector.extract_strided_slice %5 {offsets = [2, 0, 0], sizes = [1, 6, 128], strides = [1, 1, 1]} : vector<4x6x128xf32> to vector<1x6x128xf32>
    %787 = vector.shape_cast %786 : vector<1x6x128xf32> to vector<6x128xf32>
    %788 = vector.broadcast %781 : f32 to vector<6x128xf32>
    %789 = arith.mulf %787, %788 : vector<6x128xf32>
    %790 = arith.addf %779, %785 : vector<7x128xf32>
    %791 = arith.addf %780, %789 : vector<6x128xf32>
    %c4_194 = arith.constant 4 : index
    %c9_195 = arith.constant 9 : index
    %792 = memref.load %arg4[%c4_194, %c9_195] : memref<8x12xf32, #tpu.memory_space<smem>>
    %793 = vector.extract_strided_slice %0 {offsets = [3, 0, 0], sizes = [1, 7, 128], strides = [1, 1, 1]} : vector<4x7x128xf32> to vector<1x7x128xf32>
    %794 = vector.shape_cast %793 : vector<1x7x128xf32> to vector<7x128xf32>
    %795 = vector.broadcast %792 : f32 to vector<7x128xf32>
    %796 = arith.mulf %794, %795 : vector<7x128xf32>
    %797 = vector.extract_strided_slice %3 {offsets = [3, 0, 0], sizes = [1, 6, 128], strides = [1, 1, 1]} : vector<4x6x128xf32> to vector<1x6x128xf32>
    %798 = vector.shape_cast %797 : vector<1x6x128xf32> to vector<6x128xf32>
    %799 = vector.broadcast %792 : f32 to vector<6x128xf32>
    %800 = arith.mulf %798, %799 : vector<6x128xf32>
    %801 = arith.addf %790, %796 : vector<7x128xf32>
    %802 = arith.addf %791, %800 : vector<6x128xf32>
    %c4_196 = arith.constant 4 : index
    %c10_197 = arith.constant 10 : index
    %803 = memref.load %arg4[%c4_196, %c10_197] : memref<8x12xf32, #tpu.memory_space<smem>>
    %804 = vector.extract_strided_slice %1 {offsets = [3, 0, 0], sizes = [1, 7, 128], strides = [1, 1, 1]} : vector<4x7x128xf32> to vector<1x7x128xf32>
    %805 = vector.shape_cast %804 : vector<1x7x128xf32> to vector<7x128xf32>
    %806 = vector.broadcast %803 : f32 to vector<7x128xf32>
    %807 = arith.mulf %805, %806 : vector<7x128xf32>
    %808 = vector.extract_strided_slice %4 {offsets = [3, 0, 0], sizes = [1, 6, 128], strides = [1, 1, 1]} : vector<4x6x128xf32> to vector<1x6x128xf32>
    %809 = vector.shape_cast %808 : vector<1x6x128xf32> to vector<6x128xf32>
    %810 = vector.broadcast %803 : f32 to vector<6x128xf32>
    %811 = arith.mulf %809, %810 : vector<6x128xf32>
    %812 = arith.addf %801, %807 : vector<7x128xf32>
    %813 = arith.addf %802, %811 : vector<6x128xf32>
    %c4_198 = arith.constant 4 : index
    %c11_199 = arith.constant 11 : index
    %814 = memref.load %arg4[%c4_198, %c11_199] : memref<8x12xf32, #tpu.memory_space<smem>>
    %815 = vector.extract_strided_slice %2 {offsets = [3, 0, 0], sizes = [1, 7, 128], strides = [1, 1, 1]} : vector<4x7x128xf32> to vector<1x7x128xf32>
    %816 = vector.shape_cast %815 : vector<1x7x128xf32> to vector<7x128xf32>
    %817 = vector.broadcast %814 : f32 to vector<7x128xf32>
    %818 = arith.mulf %816, %817 : vector<7x128xf32>
    %819 = vector.extract_strided_slice %5 {offsets = [3, 0, 0], sizes = [1, 6, 128], strides = [1, 1, 1]} : vector<4x6x128xf32> to vector<1x6x128xf32>
    %820 = vector.shape_cast %819 : vector<1x6x128xf32> to vector<6x128xf32>
    %821 = vector.broadcast %814 : f32 to vector<6x128xf32>
    %822 = arith.mulf %820, %821 : vector<6x128xf32>
    %823 = arith.addf %812, %818 : vector<7x128xf32>
    %824 = arith.addf %813, %822 : vector<6x128xf32>
    %c0_200 = arith.constant 0 : index
    %c4_201 = arith.constant 4 : index
    %825 = memref.load %arg5[%c0_200, %c4_201] : memref<1x8xf32, #tpu.memory_space<smem>>
    %826 = vector.broadcast %825 : f32 to vector<7x128xf32>
    %827 = arith.addf %823, %826 : vector<7x128xf32>
    %c0_202 = arith.constant 0 : index
    %c4_203 = arith.constant 4 : index
    %828 = memref.load %arg5[%c0_202, %c4_203] : memref<1x8xf32, #tpu.memory_space<smem>>
    %829 = vector.broadcast %828 : f32 to vector<6x128xf32>
    %830 = arith.addf %824, %829 : vector<6x128xf32>
    %831 = vector.extract_strided_slice %827 {offsets = [0, 0], sizes = [6, 128], strides = [1, 1]} : vector<7x128xf32> to vector<6x128xf32>
    %832 = arith.maximumf %831, %830 : vector<6x128xf32>
    %833 = vector.extract_strided_slice %827 {offsets = [1, 0], sizes = [6, 128], strides = [1, 1]} : vector<7x128xf32> to vector<6x128xf32>
    %834 = arith.maximumf %832, %833 : vector<6x128xf32>
    %c0_204 = arith.constant 0 : index
    %c4_205 = arith.constant 4 : index
    %835 = memref.load %arg3[%c0_204, %c4_205] : memref<1x8xf32, #tpu.memory_space<smem>>
    %836 = vector.extract_strided_slice %6 {offsets = [0, 0, 0], sizes = [1, 6, 128], strides = [1, 1, 1]} : vector<4x6x128xf32> to vector<1x6x128xf32>
    %837 = vector.shape_cast %836 : vector<1x6x128xf32> to vector<6x128xf32>
    %c4_206 = arith.constant 4 : index
    %c0_207 = arith.constant 0 : index
    %838 = memref.load %arg2[%c4_206, %c0_207] : memref<8x4xf32, #tpu.memory_space<smem>>
    %839 = vector.broadcast %838 : f32 to vector<6x128xf32>
    %840 = arith.mulf %837, %839 : vector<6x128xf32>
    %841 = vector.broadcast %835 : f32 to vector<6x128xf32>
    %842 = arith.addf %841, %840 : vector<6x128xf32>
    %843 = vector.extract_strided_slice %6 {offsets = [1, 0, 0], sizes = [1, 6, 128], strides = [1, 1, 1]} : vector<4x6x128xf32> to vector<1x6x128xf32>
    %844 = vector.shape_cast %843 : vector<1x6x128xf32> to vector<6x128xf32>
    %c4_208 = arith.constant 4 : index
    %c1_209 = arith.constant 1 : index
    %845 = memref.load %arg2[%c4_208, %c1_209] : memref<8x4xf32, #tpu.memory_space<smem>>
    %846 = vector.broadcast %845 : f32 to vector<6x128xf32>
    %847 = arith.mulf %844, %846 : vector<6x128xf32>
    %848 = arith.addf %842, %847 : vector<6x128xf32>
    %849 = vector.extract_strided_slice %6 {offsets = [2, 0, 0], sizes = [1, 6, 128], strides = [1, 1, 1]} : vector<4x6x128xf32> to vector<1x6x128xf32>
    %850 = vector.shape_cast %849 : vector<1x6x128xf32> to vector<6x128xf32>
    %c4_210 = arith.constant 4 : index
    %c2_211 = arith.constant 2 : index
    %851 = memref.load %arg2[%c4_210, %c2_211] : memref<8x4xf32, #tpu.memory_space<smem>>
    %852 = vector.broadcast %851 : f32 to vector<6x128xf32>
    %853 = arith.mulf %850, %852 : vector<6x128xf32>
    %854 = arith.addf %848, %853 : vector<6x128xf32>
    %855 = vector.extract_strided_slice %6 {offsets = [3, 0, 0], sizes = [1, 6, 128], strides = [1, 1, 1]} : vector<4x6x128xf32> to vector<1x6x128xf32>
    %856 = vector.shape_cast %855 : vector<1x6x128xf32> to vector<6x128xf32>
    %c4_212 = arith.constant 4 : index
    %c3_213 = arith.constant 3 : index
    %857 = memref.load %arg2[%c4_212, %c3_213] : memref<8x4xf32, #tpu.memory_space<smem>>
    %858 = vector.broadcast %857 : f32 to vector<6x128xf32>
    %859 = arith.mulf %856, %858 : vector<6x128xf32>
    %860 = arith.addf %854, %859 : vector<6x128xf32>
    %861 = arith.addf %834, %860 : vector<6x128xf32>
    %cst_214 = arith.constant 0.000000e+00 : f32
    %862 = vector.broadcast %cst_214 : f32 to vector<6x128xf32>
    %863 = arith.maximumf %861, %862 : vector<6x128xf32>
    %c4_215 = arith.constant 4 : index
    %c0_216 = arith.constant 0 : index
    %c0_217 = arith.constant 0 : index
    %864 = vector.load %arg6[%c4_215, %c0_216, %c0_217] : memref<8x6x128xf32, #tpu.memory_space<vmem>>, vector<1x6x128xf32>
    %865 = vector.shape_cast %864 : vector<1x6x128xf32> to vector<6x128xf32>
    %866 = vector.shape_cast %863 : vector<6x128xf32> to vector<1x6x128xf32>
    tpu.vector_store %arg6[%c4_215, %c0_216, %c0_217], %866 {strides = array<i32>} : memref<8x6x128xf32, #tpu.memory_space<vmem>>, vector<1x6x128xf32>,
    %c5_218 = arith.constant 5 : index
    %c0_219 = arith.constant 0 : index
    %867 = memref.load %arg4[%c5_218, %c0_219] : memref<8x12xf32, #tpu.memory_space<smem>>
    %868 = vector.extract_strided_slice %0 {offsets = [0, 0, 0], sizes = [1, 7, 128], strides = [1, 1, 1]} : vector<4x7x128xf32> to vector<1x7x128xf32>
    %869 = vector.shape_cast %868 : vector<1x7x128xf32> to vector<7x128xf32>
    %870 = vector.broadcast %867 : f32 to vector<7x128xf32>
    %871 = arith.mulf %869, %870 : vector<7x128xf32>
    %872 = vector.extract_strided_slice %3 {offsets = [0, 0, 0], sizes = [1, 6, 128], strides = [1, 1, 1]} : vector<4x6x128xf32> to vector<1x6x128xf32>
    %873 = vector.shape_cast %872 : vector<1x6x128xf32> to vector<6x128xf32>
    %874 = vector.broadcast %867 : f32 to vector<6x128xf32>
    %875 = arith.mulf %873, %874 : vector<6x128xf32>
    %c5_220 = arith.constant 5 : index
    %c1_221 = arith.constant 1 : index
    %876 = memref.load %arg4[%c5_220, %c1_221] : memref<8x12xf32, #tpu.memory_space<smem>>
    %877 = vector.extract_strided_slice %1 {offsets = [0, 0, 0], sizes = [1, 7, 128], strides = [1, 1, 1]} : vector<4x7x128xf32> to vector<1x7x128xf32>
    %878 = vector.shape_cast %877 : vector<1x7x128xf32> to vector<7x128xf32>
    %879 = vector.broadcast %876 : f32 to vector<7x128xf32>
    %880 = arith.mulf %878, %879 : vector<7x128xf32>
    %881 = vector.extract_strided_slice %4 {offsets = [0, 0, 0], sizes = [1, 6, 128], strides = [1, 1, 1]} : vector<4x6x128xf32> to vector<1x6x128xf32>
    %882 = vector.shape_cast %881 : vector<1x6x128xf32> to vector<6x128xf32>
    %883 = vector.broadcast %876 : f32 to vector<6x128xf32>
    %884 = arith.mulf %882, %883 : vector<6x128xf32>
    %885 = arith.addf %871, %880 : vector<7x128xf32>
    %886 = arith.addf %875, %884 : vector<6x128xf32>
    %c5_222 = arith.constant 5 : index
    %c2_223 = arith.constant 2 : index
    %887 = memref.load %arg4[%c5_222, %c2_223] : memref<8x12xf32, #tpu.memory_space<smem>>
    %888 = vector.extract_strided_slice %2 {offsets = [0, 0, 0], sizes = [1, 7, 128], strides = [1, 1, 1]} : vector<4x7x128xf32> to vector<1x7x128xf32>
    %889 = vector.shape_cast %888 : vector<1x7x128xf32> to vector<7x128xf32>
    %890 = vector.broadcast %887 : f32 to vector<7x128xf32>
    %891 = arith.mulf %889, %890 : vector<7x128xf32>
    %892 = vector.extract_strided_slice %5 {offsets = [0, 0, 0], sizes = [1, 6, 128], strides = [1, 1, 1]} : vector<4x6x128xf32> to vector<1x6x128xf32>
    %893 = vector.shape_cast %892 : vector<1x6x128xf32> to vector<6x128xf32>
    %894 = vector.broadcast %887 : f32 to vector<6x128xf32>
    %895 = arith.mulf %893, %894 : vector<6x128xf32>
    %896 = arith.addf %885, %891 : vector<7x128xf32>
    %897 = arith.addf %886, %895 : vector<6x128xf32>
    %c5_224 = arith.constant 5 : index
    %c3_225 = arith.constant 3 : index
    %898 = memref.load %arg4[%c5_224, %c3_225] : memref<8x12xf32, #tpu.memory_space<smem>>
    %899 = vector.extract_strided_slice %0 {offsets = [1, 0, 0], sizes = [1, 7, 128], strides = [1, 1, 1]} : vector<4x7x128xf32> to vector<1x7x128xf32>
    %900 = vector.shape_cast %899 : vector<1x7x128xf32> to vector<7x128xf32>
    %901 = vector.broadcast %898 : f32 to vector<7x128xf32>
    %902 = arith.mulf %900, %901 : vector<7x128xf32>
    %903 = vector.extract_strided_slice %3 {offsets = [1, 0, 0], sizes = [1, 6, 128], strides = [1, 1, 1]} : vector<4x6x128xf32> to vector<1x6x128xf32>
    %904 = vector.shape_cast %903 : vector<1x6x128xf32> to vector<6x128xf32>
    %905 = vector.broadcast %898 : f32 to vector<6x128xf32>
    %906 = arith.mulf %904, %905 : vector<6x128xf32>
    %907 = arith.addf %896, %902 : vector<7x128xf32>
    %908 = arith.addf %897, %906 : vector<6x128xf32>
    %c5_226 = arith.constant 5 : index
    %c4_227 = arith.constant 4 : index
    %909 = memref.load %arg4[%c5_226, %c4_227] : memref<8x12xf32, #tpu.memory_space<smem>>
    %910 = vector.extract_strided_slice %1 {offsets = [1, 0, 0], sizes = [1, 7, 128], strides = [1, 1, 1]} : vector<4x7x128xf32> to vector<1x7x128xf32>
    %911 = vector.shape_cast %910 : vector<1x7x128xf32> to vector<7x128xf32>
    %912 = vector.broadcast %909 : f32 to vector<7x128xf32>
    %913 = arith.mulf %911, %912 : vector<7x128xf32>
    %914 = vector.extract_strided_slice %4 {offsets = [1, 0, 0], sizes = [1, 6, 128], strides = [1, 1, 1]} : vector<4x6x128xf32> to vector<1x6x128xf32>
    %915 = vector.shape_cast %914 : vector<1x6x128xf32> to vector<6x128xf32>
    %916 = vector.broadcast %909 : f32 to vector<6x128xf32>
    %917 = arith.mulf %915, %916 : vector<6x128xf32>
    %918 = arith.addf %907, %913 : vector<7x128xf32>
    %919 = arith.addf %908, %917 : vector<6x128xf32>
    %c5_228 = arith.constant 5 : index
    %c5_229 = arith.constant 5 : index
    %920 = memref.load %arg4[%c5_228, %c5_229] : memref<8x12xf32, #tpu.memory_space<smem>>
    %921 = vector.extract_strided_slice %2 {offsets = [1, 0, 0], sizes = [1, 7, 128], strides = [1, 1, 1]} : vector<4x7x128xf32> to vector<1x7x128xf32>
    %922 = vector.shape_cast %921 : vector<1x7x128xf32> to vector<7x128xf32>
    %923 = vector.broadcast %920 : f32 to vector<7x128xf32>
    %924 = arith.mulf %922, %923 : vector<7x128xf32>
    %925 = vector.extract_strided_slice %5 {offsets = [1, 0, 0], sizes = [1, 6, 128], strides = [1, 1, 1]} : vector<4x6x128xf32> to vector<1x6x128xf32>
    %926 = vector.shape_cast %925 : vector<1x6x128xf32> to vector<6x128xf32>
    %927 = vector.broadcast %920 : f32 to vector<6x128xf32>
    %928 = arith.mulf %926, %927 : vector<6x128xf32>
    %929 = arith.addf %918, %924 : vector<7x128xf32>
    %930 = arith.addf %919, %928 : vector<6x128xf32>
    %c5_230 = arith.constant 5 : index
    %c6_231 = arith.constant 6 : index
    %931 = memref.load %arg4[%c5_230, %c6_231] : memref<8x12xf32, #tpu.memory_space<smem>>
    %932 = vector.extract_strided_slice %0 {offsets = [2, 0, 0], sizes = [1, 7, 128], strides = [1, 1, 1]} : vector<4x7x128xf32> to vector<1x7x128xf32>
    %933 = vector.shape_cast %932 : vector<1x7x128xf32> to vector<7x128xf32>
    %934 = vector.broadcast %931 : f32 to vector<7x128xf32>
    %935 = arith.mulf %933, %934 : vector<7x128xf32>
    %936 = vector.extract_strided_slice %3 {offsets = [2, 0, 0], sizes = [1, 6, 128], strides = [1, 1, 1]} : vector<4x6x128xf32> to vector<1x6x128xf32>
    %937 = vector.shape_cast %936 : vector<1x6x128xf32> to vector<6x128xf32>
    %938 = vector.broadcast %931 : f32 to vector<6x128xf32>
    %939 = arith.mulf %937, %938 : vector<6x128xf32>
    %940 = arith.addf %929, %935 : vector<7x128xf32>
    %941 = arith.addf %930, %939 : vector<6x128xf32>
    %c5_232 = arith.constant 5 : index
    %c7_233 = arith.constant 7 : index
    %942 = memref.load %arg4[%c5_232, %c7_233] : memref<8x12xf32, #tpu.memory_space<smem>>
    %943 = vector.extract_strided_slice %1 {offsets = [2, 0, 0], sizes = [1, 7, 128], strides = [1, 1, 1]} : vector<4x7x128xf32> to vector<1x7x128xf32>
    %944 = vector.shape_cast %943 : vector<1x7x128xf32> to vector<7x128xf32>
    %945 = vector.broadcast %942 : f32 to vector<7x128xf32>
    %946 = arith.mulf %944, %945 : vector<7x128xf32>
    %947 = vector.extract_strided_slice %4 {offsets = [2, 0, 0], sizes = [1, 6, 128], strides = [1, 1, 1]} : vector<4x6x128xf32> to vector<1x6x128xf32>
    %948 = vector.shape_cast %947 : vector<1x6x128xf32> to vector<6x128xf32>
    %949 = vector.broadcast %942 : f32 to vector<6x128xf32>
    %950 = arith.mulf %948, %949 : vector<6x128xf32>
    %951 = arith.addf %940, %946 : vector<7x128xf32>
    %952 = arith.addf %941, %950 : vector<6x128xf32>
    %c5_234 = arith.constant 5 : index
    %c8_235 = arith.constant 8 : index
    %953 = memref.load %arg4[%c5_234, %c8_235] : memref<8x12xf32, #tpu.memory_space<smem>>
    %954 = vector.extract_strided_slice %2 {offsets = [2, 0, 0], sizes = [1, 7, 128], strides = [1, 1, 1]} : vector<4x7x128xf32> to vector<1x7x128xf32>
    %955 = vector.shape_cast %954 : vector<1x7x128xf32> to vector<7x128xf32>
    %956 = vector.broadcast %953 : f32 to vector<7x128xf32>
    %957 = arith.mulf %955, %956 : vector<7x128xf32>
    %958 = vector.extract_strided_slice %5 {offsets = [2, 0, 0], sizes = [1, 6, 128], strides = [1, 1, 1]} : vector<4x6x128xf32> to vector<1x6x128xf32>
    %959 = vector.shape_cast %958 : vector<1x6x128xf32> to vector<6x128xf32>
    %960 = vector.broadcast %953 : f32 to vector<6x128xf32>
    %961 = arith.mulf %959, %960 : vector<6x128xf32>
    %962 = arith.addf %951, %957 : vector<7x128xf32>
    %963 = arith.addf %952, %961 : vector<6x128xf32>
    %c5_236 = arith.constant 5 : index
    %c9_237 = arith.constant 9 : index
    %964 = memref.load %arg4[%c5_236, %c9_237] : memref<8x12xf32, #tpu.memory_space<smem>>
    %965 = vector.extract_strided_slice %0 {offsets = [3, 0, 0], sizes = [1, 7, 128], strides = [1, 1, 1]} : vector<4x7x128xf32> to vector<1x7x128xf32>
    %966 = vector.shape_cast %965 : vector<1x7x128xf32> to vector<7x128xf32>
    %967 = vector.broadcast %964 : f32 to vector<7x128xf32>
    %968 = arith.mulf %966, %967 : vector<7x128xf32>
    %969 = vector.extract_strided_slice %3 {offsets = [3, 0, 0], sizes = [1, 6, 128], strides = [1, 1, 1]} : vector<4x6x128xf32> to vector<1x6x128xf32>
    %970 = vector.shape_cast %969 : vector<1x6x128xf32> to vector<6x128xf32>
    %971 = vector.broadcast %964 : f32 to vector<6x128xf32>
    %972 = arith.mulf %970, %971 : vector<6x128xf32>
    %973 = arith.addf %962, %968 : vector<7x128xf32>
    %974 = arith.addf %963, %972 : vector<6x128xf32>
    %c5_238 = arith.constant 5 : index
    %c10_239 = arith.constant 10 : index
    %975 = memref.load %arg4[%c5_238, %c10_239] : memref<8x12xf32, #tpu.memory_space<smem>>
    %976 = vector.extract_strided_slice %1 {offsets = [3, 0, 0], sizes = [1, 7, 128], strides = [1, 1, 1]} : vector<4x7x128xf32> to vector<1x7x128xf32>
    %977 = vector.shape_cast %976 : vector<1x7x128xf32> to vector<7x128xf32>
    %978 = vector.broadcast %975 : f32 to vector<7x128xf32>
    %979 = arith.mulf %977, %978 : vector<7x128xf32>
    %980 = vector.extract_strided_slice %4 {offsets = [3, 0, 0], sizes = [1, 6, 128], strides = [1, 1, 1]} : vector<4x6x128xf32> to vector<1x6x128xf32>
    %981 = vector.shape_cast %980 : vector<1x6x128xf32> to vector<6x128xf32>
    %982 = vector.broadcast %975 : f32 to vector<6x128xf32>
    %983 = arith.mulf %981, %982 : vector<6x128xf32>
    %984 = arith.addf %973, %979 : vector<7x128xf32>
    %985 = arith.addf %974, %983 : vector<6x128xf32>
    %c5_240 = arith.constant 5 : index
    %c11_241 = arith.constant 11 : index
    %986 = memref.load %arg4[%c5_240, %c11_241] : memref<8x12xf32, #tpu.memory_space<smem>>
    %987 = vector.extract_strided_slice %2 {offsets = [3, 0, 0], sizes = [1, 7, 128], strides = [1, 1, 1]} : vector<4x7x128xf32> to vector<1x7x128xf32>
    %988 = vector.shape_cast %987 : vector<1x7x128xf32> to vector<7x128xf32>
    %989 = vector.broadcast %986 : f32 to vector<7x128xf32>
    %990 = arith.mulf %988, %989 : vector<7x128xf32>
    %991 = vector.extract_strided_slice %5 {offsets = [3, 0, 0], sizes = [1, 6, 128], strides = [1, 1, 1]} : vector<4x6x128xf32> to vector<1x6x128xf32>
    %992 = vector.shape_cast %991 : vector<1x6x128xf32> to vector<6x128xf32>
    %993 = vector.broadcast %986 : f32 to vector<6x128xf32>
    %994 = arith.mulf %992, %993 : vector<6x128xf32>
    %995 = arith.addf %984, %990 : vector<7x128xf32>
    %996 = arith.addf %985, %994 : vector<6x128xf32>
    %c0_242 = arith.constant 0 : index
    %c5_243 = arith.constant 5 : index
    %997 = memref.load %arg5[%c0_242, %c5_243] : memref<1x8xf32, #tpu.memory_space<smem>>
    %998 = vector.broadcast %997 : f32 to vector<7x128xf32>
    %999 = arith.addf %995, %998 : vector<7x128xf32>
    %c0_244 = arith.constant 0 : index
    %c5_245 = arith.constant 5 : index
    %1000 = memref.load %arg5[%c0_244, %c5_245] : memref<1x8xf32, #tpu.memory_space<smem>>
    %1001 = vector.broadcast %1000 : f32 to vector<6x128xf32>
    %1002 = arith.addf %996, %1001 : vector<6x128xf32>
    %1003 = vector.extract_strided_slice %999 {offsets = [0, 0], sizes = [6, 128], strides = [1, 1]} : vector<7x128xf32> to vector<6x128xf32>
    %1004 = arith.maximumf %1003, %1002 : vector<6x128xf32>
    %1005 = vector.extract_strided_slice %999 {offsets = [1, 0], sizes = [6, 128], strides = [1, 1]} : vector<7x128xf32> to vector<6x128xf32>
    %1006 = arith.maximumf %1004, %1005 : vector<6x128xf32>
    %c0_246 = arith.constant 0 : index
    %c5_247 = arith.constant 5 : index
    %1007 = memref.load %arg3[%c0_246, %c5_247] : memref<1x8xf32, #tpu.memory_space<smem>>
    %1008 = vector.extract_strided_slice %6 {offsets = [0, 0, 0], sizes = [1, 6, 128], strides = [1, 1, 1]} : vector<4x6x128xf32> to vector<1x6x128xf32>
    %1009 = vector.shape_cast %1008 : vector<1x6x128xf32> to vector<6x128xf32>
    %c5_248 = arith.constant 5 : index
    %c0_249 = arith.constant 0 : index
    %1010 = memref.load %arg2[%c5_248, %c0_249] : memref<8x4xf32, #tpu.memory_space<smem>>
    %1011 = vector.broadcast %1010 : f32 to vector<6x128xf32>
    %1012 = arith.mulf %1009, %1011 : vector<6x128xf32>
    %1013 = vector.broadcast %1007 : f32 to vector<6x128xf32>
    %1014 = arith.addf %1013, %1012 : vector<6x128xf32>
    %1015 = vector.extract_strided_slice %6 {offsets = [1, 0, 0], sizes = [1, 6, 128], strides = [1, 1, 1]} : vector<4x6x128xf32> to vector<1x6x128xf32>
    %1016 = vector.shape_cast %1015 : vector<1x6x128xf32> to vector<6x128xf32>
    %c5_250 = arith.constant 5 : index
    %c1_251 = arith.constant 1 : index
    %1017 = memref.load %arg2[%c5_250, %c1_251] : memref<8x4xf32, #tpu.memory_space<smem>>
    %1018 = vector.broadcast %1017 : f32 to vector<6x128xf32>
    %1019 = arith.mulf %1016, %1018 : vector<6x128xf32>
    %1020 = arith.addf %1014, %1019 : vector<6x128xf32>
    %1021 = vector.extract_strided_slice %6 {offsets = [2, 0, 0], sizes = [1, 6, 128], strides = [1, 1, 1]} : vector<4x6x128xf32> to vector<1x6x128xf32>
    %1022 = vector.shape_cast %1021 : vector<1x6x128xf32> to vector<6x128xf32>
    %c5_252 = arith.constant 5 : index
    %c2_253 = arith.constant 2 : index
    %1023 = memref.load %arg2[%c5_252, %c2_253] : memref<8x4xf32, #tpu.memory_space<smem>>
    %1024 = vector.broadcast %1023 : f32 to vector<6x128xf32>
    %1025 = arith.mulf %1022, %1024 : vector<6x128xf32>
    %1026 = arith.addf %1020, %1025 : vector<6x128xf32>
    %1027 = vector.extract_strided_slice %6 {offsets = [3, 0, 0], sizes = [1, 6, 128], strides = [1, 1, 1]} : vector<4x6x128xf32> to vector<1x6x128xf32>
    %1028 = vector.shape_cast %1027 : vector<1x6x128xf32> to vector<6x128xf32>
    %c5_254 = arith.constant 5 : index
    %c3_255 = arith.constant 3 : index
    %1029 = memref.load %arg2[%c5_254, %c3_255] : memref<8x4xf32, #tpu.memory_space<smem>>
    %1030 = vector.broadcast %1029 : f32 to vector<6x128xf32>
    %1031 = arith.mulf %1028, %1030 : vector<6x128xf32>
    %1032 = arith.addf %1026, %1031 : vector<6x128xf32>
    %1033 = arith.addf %1006, %1032 : vector<6x128xf32>
    %cst_256 = arith.constant 0.000000e+00 : f32
    %1034 = vector.broadcast %cst_256 : f32 to vector<6x128xf32>
    %1035 = arith.maximumf %1033, %1034 : vector<6x128xf32>
    %c5_257 = arith.constant 5 : index
    %c0_258 = arith.constant 0 : index
    %c0_259 = arith.constant 0 : index
    %1036 = vector.load %arg6[%c5_257, %c0_258, %c0_259] : memref<8x6x128xf32, #tpu.memory_space<vmem>>, vector<1x6x128xf32>
    %1037 = vector.shape_cast %1036 : vector<1x6x128xf32> to vector<6x128xf32>
    %1038 = vector.shape_cast %1035 : vector<6x128xf32> to vector<1x6x128xf32>
    tpu.vector_store %arg6[%c5_257, %c0_258, %c0_259], %1038 {strides = array<i32>} : memref<8x6x128xf32, #tpu.memory_space<vmem>>, vector<1x6x128xf32>,
    %c6_260 = arith.constant 6 : index
    %c0_261 = arith.constant 0 : index
    %1039 = memref.load %arg4[%c6_260, %c0_261] : memref<8x12xf32, #tpu.memory_space<smem>>
    %1040 = vector.extract_strided_slice %0 {offsets = [0, 0, 0], sizes = [1, 7, 128], strides = [1, 1, 1]} : vector<4x7x128xf32> to vector<1x7x128xf32>
    %1041 = vector.shape_cast %1040 : vector<1x7x128xf32> to vector<7x128xf32>
    %1042 = vector.broadcast %1039 : f32 to vector<7x128xf32>
    %1043 = arith.mulf %1041, %1042 : vector<7x128xf32>
    %1044 = vector.extract_strided_slice %3 {offsets = [0, 0, 0], sizes = [1, 6, 128], strides = [1, 1, 1]} : vector<4x6x128xf32> to vector<1x6x128xf32>
    %1045 = vector.shape_cast %1044 : vector<1x6x128xf32> to vector<6x128xf32>
    %1046 = vector.broadcast %1039 : f32 to vector<6x128xf32>
    %1047 = arith.mulf %1045, %1046 : vector<6x128xf32>
    %c6_262 = arith.constant 6 : index
    %c1_263 = arith.constant 1 : index
    %1048 = memref.load %arg4[%c6_262, %c1_263] : memref<8x12xf32, #tpu.memory_space<smem>>
    %1049 = vector.extract_strided_slice %1 {offsets = [0, 0, 0], sizes = [1, 7, 128], strides = [1, 1, 1]} : vector<4x7x128xf32> to vector<1x7x128xf32>
    %1050 = vector.shape_cast %1049 : vector<1x7x128xf32> to vector<7x128xf32>
    %1051 = vector.broadcast %1048 : f32 to vector<7x128xf32>
    %1052 = arith.mulf %1050, %1051 : vector<7x128xf32>
    %1053 = vector.extract_strided_slice %4 {offsets = [0, 0, 0], sizes = [1, 6, 128], strides = [1, 1, 1]} : vector<4x6x128xf32> to vector<1x6x128xf32>
    %1054 = vector.shape_cast %1053 : vector<1x6x128xf32> to vector<6x128xf32>
    %1055 = vector.broadcast %1048 : f32 to vector<6x128xf32>
    %1056 = arith.mulf %1054, %1055 : vector<6x128xf32>
    %1057 = arith.addf %1043, %1052 : vector<7x128xf32>
    %1058 = arith.addf %1047, %1056 : vector<6x128xf32>
    %c6_264 = arith.constant 6 : index
    %c2_265 = arith.constant 2 : index
    %1059 = memref.load %arg4[%c6_264, %c2_265] : memref<8x12xf32, #tpu.memory_space<smem>>
    %1060 = vector.extract_strided_slice %2 {offsets = [0, 0, 0], sizes = [1, 7, 128], strides = [1, 1, 1]} : vector<4x7x128xf32> to vector<1x7x128xf32>
    %1061 = vector.shape_cast %1060 : vector<1x7x128xf32> to vector<7x128xf32>
    %1062 = vector.broadcast %1059 : f32 to vector<7x128xf32>
    %1063 = arith.mulf %1061, %1062 : vector<7x128xf32>
    %1064 = vector.extract_strided_slice %5 {offsets = [0, 0, 0], sizes = [1, 6, 128], strides = [1, 1, 1]} : vector<4x6x128xf32> to vector<1x6x128xf32>
    %1065 = vector.shape_cast %1064 : vector<1x6x128xf32> to vector<6x128xf32>
    %1066 = vector.broadcast %1059 : f32 to vector<6x128xf32>
    %1067 = arith.mulf %1065, %1066 : vector<6x128xf32>
    %1068 = arith.addf %1057, %1063 : vector<7x128xf32>
    %1069 = arith.addf %1058, %1067 : vector<6x128xf32>
    %c6_266 = arith.constant 6 : index
    %c3_267 = arith.constant 3 : index
    %1070 = memref.load %arg4[%c6_266, %c3_267] : memref<8x12xf32, #tpu.memory_space<smem>>
    %1071 = vector.extract_strided_slice %0 {offsets = [1, 0, 0], sizes = [1, 7, 128], strides = [1, 1, 1]} : vector<4x7x128xf32> to vector<1x7x128xf32>
    %1072 = vector.shape_cast %1071 : vector<1x7x128xf32> to vector<7x128xf32>
    %1073 = vector.broadcast %1070 : f32 to vector<7x128xf32>
    %1074 = arith.mulf %1072, %1073 : vector<7x128xf32>
    %1075 = vector.extract_strided_slice %3 {offsets = [1, 0, 0], sizes = [1, 6, 128], strides = [1, 1, 1]} : vector<4x6x128xf32> to vector<1x6x128xf32>
    %1076 = vector.shape_cast %1075 : vector<1x6x128xf32> to vector<6x128xf32>
    %1077 = vector.broadcast %1070 : f32 to vector<6x128xf32>
    %1078 = arith.mulf %1076, %1077 : vector<6x128xf32>
    %1079 = arith.addf %1068, %1074 : vector<7x128xf32>
    %1080 = arith.addf %1069, %1078 : vector<6x128xf32>
    %c6_268 = arith.constant 6 : index
    %c4_269 = arith.constant 4 : index
    %1081 = memref.load %arg4[%c6_268, %c4_269] : memref<8x12xf32, #tpu.memory_space<smem>>
    %1082 = vector.extract_strided_slice %1 {offsets = [1, 0, 0], sizes = [1, 7, 128], strides = [1, 1, 1]} : vector<4x7x128xf32> to vector<1x7x128xf32>
    %1083 = vector.shape_cast %1082 : vector<1x7x128xf32> to vector<7x128xf32>
    %1084 = vector.broadcast %1081 : f32 to vector<7x128xf32>
    %1085 = arith.mulf %1083, %1084 : vector<7x128xf32>
    %1086 = vector.extract_strided_slice %4 {offsets = [1, 0, 0], sizes = [1, 6, 128], strides = [1, 1, 1]} : vector<4x6x128xf32> to vector<1x6x128xf32>
    %1087 = vector.shape_cast %1086 : vector<1x6x128xf32> to vector<6x128xf32>
    %1088 = vector.broadcast %1081 : f32 to vector<6x128xf32>
    %1089 = arith.mulf %1087, %1088 : vector<6x128xf32>
    %1090 = arith.addf %1079, %1085 : vector<7x128xf32>
    %1091 = arith.addf %1080, %1089 : vector<6x128xf32>
    %c6_270 = arith.constant 6 : index
    %c5_271 = arith.constant 5 : index
    %1092 = memref.load %arg4[%c6_270, %c5_271] : memref<8x12xf32, #tpu.memory_space<smem>>
    %1093 = vector.extract_strided_slice %2 {offsets = [1, 0, 0], sizes = [1, 7, 128], strides = [1, 1, 1]} : vector<4x7x128xf32> to vector<1x7x128xf32>
    %1094 = vector.shape_cast %1093 : vector<1x7x128xf32> to vector<7x128xf32>
    %1095 = vector.broadcast %1092 : f32 to vector<7x128xf32>
    %1096 = arith.mulf %1094, %1095 : vector<7x128xf32>
    %1097 = vector.extract_strided_slice %5 {offsets = [1, 0, 0], sizes = [1, 6, 128], strides = [1, 1, 1]} : vector<4x6x128xf32> to vector<1x6x128xf32>
    %1098 = vector.shape_cast %1097 : vector<1x6x128xf32> to vector<6x128xf32>
    %1099 = vector.broadcast %1092 : f32 to vector<6x128xf32>
    %1100 = arith.mulf %1098, %1099 : vector<6x128xf32>
    %1101 = arith.addf %1090, %1096 : vector<7x128xf32>
    %1102 = arith.addf %1091, %1100 : vector<6x128xf32>
    %c6_272 = arith.constant 6 : index
    %c6_273 = arith.constant 6 : index
    %1103 = memref.load %arg4[%c6_272, %c6_273] : memref<8x12xf32, #tpu.memory_space<smem>>
    %1104 = vector.extract_strided_slice %0 {offsets = [2, 0, 0], sizes = [1, 7, 128], strides = [1, 1, 1]} : vector<4x7x128xf32> to vector<1x7x128xf32>
    %1105 = vector.shape_cast %1104 : vector<1x7x128xf32> to vector<7x128xf32>
    %1106 = vector.broadcast %1103 : f32 to vector<7x128xf32>
    %1107 = arith.mulf %1105, %1106 : vector<7x128xf32>
    %1108 = vector.extract_strided_slice %3 {offsets = [2, 0, 0], sizes = [1, 6, 128], strides = [1, 1, 1]} : vector<4x6x128xf32> to vector<1x6x128xf32>
    %1109 = vector.shape_cast %1108 : vector<1x6x128xf32> to vector<6x128xf32>
    %1110 = vector.broadcast %1103 : f32 to vector<6x128xf32>
    %1111 = arith.mulf %1109, %1110 : vector<6x128xf32>
    %1112 = arith.addf %1101, %1107 : vector<7x128xf32>
    %1113 = arith.addf %1102, %1111 : vector<6x128xf32>
    %c6_274 = arith.constant 6 : index
    %c7_275 = arith.constant 7 : index
    %1114 = memref.load %arg4[%c6_274, %c7_275] : memref<8x12xf32, #tpu.memory_space<smem>>
    %1115 = vector.extract_strided_slice %1 {offsets = [2, 0, 0], sizes = [1, 7, 128], strides = [1, 1, 1]} : vector<4x7x128xf32> to vector<1x7x128xf32>
    %1116 = vector.shape_cast %1115 : vector<1x7x128xf32> to vector<7x128xf32>
    %1117 = vector.broadcast %1114 : f32 to vector<7x128xf32>
    %1118 = arith.mulf %1116, %1117 : vector<7x128xf32>
    %1119 = vector.extract_strided_slice %4 {offsets = [2, 0, 0], sizes = [1, 6, 128], strides = [1, 1, 1]} : vector<4x6x128xf32> to vector<1x6x128xf32>
    %1120 = vector.shape_cast %1119 : vector<1x6x128xf32> to vector<6x128xf32>
    %1121 = vector.broadcast %1114 : f32 to vector<6x128xf32>
    %1122 = arith.mulf %1120, %1121 : vector<6x128xf32>
    %1123 = arith.addf %1112, %1118 : vector<7x128xf32>
    %1124 = arith.addf %1113, %1122 : vector<6x128xf32>
    %c6_276 = arith.constant 6 : index
    %c8_277 = arith.constant 8 : index
    %1125 = memref.load %arg4[%c6_276, %c8_277] : memref<8x12xf32, #tpu.memory_space<smem>>
    %1126 = vector.extract_strided_slice %2 {offsets = [2, 0, 0], sizes = [1, 7, 128], strides = [1, 1, 1]} : vector<4x7x128xf32> to vector<1x7x128xf32>
    %1127 = vector.shape_cast %1126 : vector<1x7x128xf32> to vector<7x128xf32>
    %1128 = vector.broadcast %1125 : f32 to vector<7x128xf32>
    %1129 = arith.mulf %1127, %1128 : vector<7x128xf32>
    %1130 = vector.extract_strided_slice %5 {offsets = [2, 0, 0], sizes = [1, 6, 128], strides = [1, 1, 1]} : vector<4x6x128xf32> to vector<1x6x128xf32>
    %1131 = vector.shape_cast %1130 : vector<1x6x128xf32> to vector<6x128xf32>
    %1132 = vector.broadcast %1125 : f32 to vector<6x128xf32>
    %1133 = arith.mulf %1131, %1132 : vector<6x128xf32>
    %1134 = arith.addf %1123, %1129 : vector<7x128xf32>
    %1135 = arith.addf %1124, %1133 : vector<6x128xf32>
    %c6_278 = arith.constant 6 : index
    %c9_279 = arith.constant 9 : index
    %1136 = memref.load %arg4[%c6_278, %c9_279] : memref<8x12xf32, #tpu.memory_space<smem>>
    %1137 = vector.extract_strided_slice %0 {offsets = [3, 0, 0], sizes = [1, 7, 128], strides = [1, 1, 1]} : vector<4x7x128xf32> to vector<1x7x128xf32>
    %1138 = vector.shape_cast %1137 : vector<1x7x128xf32> to vector<7x128xf32>
    %1139 = vector.broadcast %1136 : f32 to vector<7x128xf32>
    %1140 = arith.mulf %1138, %1139 : vector<7x128xf32>
    %1141 = vector.extract_strided_slice %3 {offsets = [3, 0, 0], sizes = [1, 6, 128], strides = [1, 1, 1]} : vector<4x6x128xf32> to vector<1x6x128xf32>
    %1142 = vector.shape_cast %1141 : vector<1x6x128xf32> to vector<6x128xf32>
    %1143 = vector.broadcast %1136 : f32 to vector<6x128xf32>
    %1144 = arith.mulf %1142, %1143 : vector<6x128xf32>
    %1145 = arith.addf %1134, %1140 : vector<7x128xf32>
    %1146 = arith.addf %1135, %1144 : vector<6x128xf32>
    %c6_280 = arith.constant 6 : index
    %c10_281 = arith.constant 10 : index
    %1147 = memref.load %arg4[%c6_280, %c10_281] : memref<8x12xf32, #tpu.memory_space<smem>>
    %1148 = vector.extract_strided_slice %1 {offsets = [3, 0, 0], sizes = [1, 7, 128], strides = [1, 1, 1]} : vector<4x7x128xf32> to vector<1x7x128xf32>
    %1149 = vector.shape_cast %1148 : vector<1x7x128xf32> to vector<7x128xf32>
    %1150 = vector.broadcast %1147 : f32 to vector<7x128xf32>
    %1151 = arith.mulf %1149, %1150 : vector<7x128xf32>
    %1152 = vector.extract_strided_slice %4 {offsets = [3, 0, 0], sizes = [1, 6, 128], strides = [1, 1, 1]} : vector<4x6x128xf32> to vector<1x6x128xf32>
    %1153 = vector.shape_cast %1152 : vector<1x6x128xf32> to vector<6x128xf32>
    %1154 = vector.broadcast %1147 : f32 to vector<6x128xf32>
    %1155 = arith.mulf %1153, %1154 : vector<6x128xf32>
    %1156 = arith.addf %1145, %1151 : vector<7x128xf32>
    %1157 = arith.addf %1146, %1155 : vector<6x128xf32>
    %c6_282 = arith.constant 6 : index
    %c11_283 = arith.constant 11 : index
    %1158 = memref.load %arg4[%c6_282, %c11_283] : memref<8x12xf32, #tpu.memory_space<smem>>
    %1159 = vector.extract_strided_slice %2 {offsets = [3, 0, 0], sizes = [1, 7, 128], strides = [1, 1, 1]} : vector<4x7x128xf32> to vector<1x7x128xf32>
    %1160 = vector.shape_cast %1159 : vector<1x7x128xf32> to vector<7x128xf32>
    %1161 = vector.broadcast %1158 : f32 to vector<7x128xf32>
    %1162 = arith.mulf %1160, %1161 : vector<7x128xf32>
    %1163 = vector.extract_strided_slice %5 {offsets = [3, 0, 0], sizes = [1, 6, 128], strides = [1, 1, 1]} : vector<4x6x128xf32> to vector<1x6x128xf32>
    %1164 = vector.shape_cast %1163 : vector<1x6x128xf32> to vector<6x128xf32>
    %1165 = vector.broadcast %1158 : f32 to vector<6x128xf32>
    %1166 = arith.mulf %1164, %1165 : vector<6x128xf32>
    %1167 = arith.addf %1156, %1162 : vector<7x128xf32>
    %1168 = arith.addf %1157, %1166 : vector<6x128xf32>
    %c0_284 = arith.constant 0 : index
    %c6_285 = arith.constant 6 : index
    %1169 = memref.load %arg5[%c0_284, %c6_285] : memref<1x8xf32, #tpu.memory_space<smem>>
    %1170 = vector.broadcast %1169 : f32 to vector<7x128xf32>
    %1171 = arith.addf %1167, %1170 : vector<7x128xf32>
    %c0_286 = arith.constant 0 : index
    %c6_287 = arith.constant 6 : index
    %1172 = memref.load %arg5[%c0_286, %c6_287] : memref<1x8xf32, #tpu.memory_space<smem>>
    %1173 = vector.broadcast %1172 : f32 to vector<6x128xf32>
    %1174 = arith.addf %1168, %1173 : vector<6x128xf32>
    %1175 = vector.extract_strided_slice %1171 {offsets = [0, 0], sizes = [6, 128], strides = [1, 1]} : vector<7x128xf32> to vector<6x128xf32>
    %1176 = arith.maximumf %1175, %1174 : vector<6x128xf32>
    %1177 = vector.extract_strided_slice %1171 {offsets = [1, 0], sizes = [6, 128], strides = [1, 1]} : vector<7x128xf32> to vector<6x128xf32>
    %1178 = arith.maximumf %1176, %1177 : vector<6x128xf32>
    %c0_288 = arith.constant 0 : index
    %c6_289 = arith.constant 6 : index
    %1179 = memref.load %arg3[%c0_288, %c6_289] : memref<1x8xf32, #tpu.memory_space<smem>>
    %1180 = vector.extract_strided_slice %6 {offsets = [0, 0, 0], sizes = [1, 6, 128], strides = [1, 1, 1]} : vector<4x6x128xf32> to vector<1x6x128xf32>
    %1181 = vector.shape_cast %1180 : vector<1x6x128xf32> to vector<6x128xf32>
    %c6_290 = arith.constant 6 : index
    %c0_291 = arith.constant 0 : index
    %1182 = memref.load %arg2[%c6_290, %c0_291] : memref<8x4xf32, #tpu.memory_space<smem>>
    %1183 = vector.broadcast %1182 : f32 to vector<6x128xf32>
    %1184 = arith.mulf %1181, %1183 : vector<6x128xf32>
    %1185 = vector.broadcast %1179 : f32 to vector<6x128xf32>
    %1186 = arith.addf %1185, %1184 : vector<6x128xf32>
    %1187 = vector.extract_strided_slice %6 {offsets = [1, 0, 0], sizes = [1, 6, 128], strides = [1, 1, 1]} : vector<4x6x128xf32> to vector<1x6x128xf32>
    %1188 = vector.shape_cast %1187 : vector<1x6x128xf32> to vector<6x128xf32>
    %c6_292 = arith.constant 6 : index
    %c1_293 = arith.constant 1 : index
    %1189 = memref.load %arg2[%c6_292, %c1_293] : memref<8x4xf32, #tpu.memory_space<smem>>
    %1190 = vector.broadcast %1189 : f32 to vector<6x128xf32>
    %1191 = arith.mulf %1188, %1190 : vector<6x128xf32>
    %1192 = arith.addf %1186, %1191 : vector<6x128xf32>
    %1193 = vector.extract_strided_slice %6 {offsets = [2, 0, 0], sizes = [1, 6, 128], strides = [1, 1, 1]} : vector<4x6x128xf32> to vector<1x6x128xf32>
    %1194 = vector.shape_cast %1193 : vector<1x6x128xf32> to vector<6x128xf32>
    %c6_294 = arith.constant 6 : index
    %c2_295 = arith.constant 2 : index
    %1195 = memref.load %arg2[%c6_294, %c2_295] : memref<8x4xf32, #tpu.memory_space<smem>>
    %1196 = vector.broadcast %1195 : f32 to vector<6x128xf32>
    %1197 = arith.mulf %1194, %1196 : vector<6x128xf32>
    %1198 = arith.addf %1192, %1197 : vector<6x128xf32>
    %1199 = vector.extract_strided_slice %6 {offsets = [3, 0, 0], sizes = [1, 6, 128], strides = [1, 1, 1]} : vector<4x6x128xf32> to vector<1x6x128xf32>
    %1200 = vector.shape_cast %1199 : vector<1x6x128xf32> to vector<6x128xf32>
    %c6_296 = arith.constant 6 : index
    %c3_297 = arith.constant 3 : index
    %1201 = memref.load %arg2[%c6_296, %c3_297] : memref<8x4xf32, #tpu.memory_space<smem>>
    %1202 = vector.broadcast %1201 : f32 to vector<6x128xf32>
    %1203 = arith.mulf %1200, %1202 : vector<6x128xf32>
    %1204 = arith.addf %1198, %1203 : vector<6x128xf32>
    %1205 = arith.addf %1178, %1204 : vector<6x128xf32>
    %cst_298 = arith.constant 0.000000e+00 : f32
    %1206 = vector.broadcast %cst_298 : f32 to vector<6x128xf32>
    %1207 = arith.maximumf %1205, %1206 : vector<6x128xf32>
    %c6_299 = arith.constant 6 : index
    %c0_300 = arith.constant 0 : index
    %c0_301 = arith.constant 0 : index
    %1208 = vector.load %arg6[%c6_299, %c0_300, %c0_301] : memref<8x6x128xf32, #tpu.memory_space<vmem>>, vector<1x6x128xf32>
    %1209 = vector.shape_cast %1208 : vector<1x6x128xf32> to vector<6x128xf32>
    %1210 = vector.shape_cast %1207 : vector<6x128xf32> to vector<1x6x128xf32>
    tpu.vector_store %arg6[%c6_299, %c0_300, %c0_301], %1210 {strides = array<i32>} : memref<8x6x128xf32, #tpu.memory_space<vmem>>, vector<1x6x128xf32>,
    %c7_302 = arith.constant 7 : index
    %c0_303 = arith.constant 0 : index
    %1211 = memref.load %arg4[%c7_302, %c0_303] : memref<8x12xf32, #tpu.memory_space<smem>>
    %1212 = vector.extract_strided_slice %0 {offsets = [0, 0, 0], sizes = [1, 7, 128], strides = [1, 1, 1]} : vector<4x7x128xf32> to vector<1x7x128xf32>
    %1213 = vector.shape_cast %1212 : vector<1x7x128xf32> to vector<7x128xf32>
    %1214 = vector.broadcast %1211 : f32 to vector<7x128xf32>
    %1215 = arith.mulf %1213, %1214 : vector<7x128xf32>
    %1216 = vector.extract_strided_slice %3 {offsets = [0, 0, 0], sizes = [1, 6, 128], strides = [1, 1, 1]} : vector<4x6x128xf32> to vector<1x6x128xf32>
    %1217 = vector.shape_cast %1216 : vector<1x6x128xf32> to vector<6x128xf32>
    %1218 = vector.broadcast %1211 : f32 to vector<6x128xf32>
    %1219 = arith.mulf %1217, %1218 : vector<6x128xf32>
    %c7_304 = arith.constant 7 : index
    %c1_305 = arith.constant 1 : index
    %1220 = memref.load %arg4[%c7_304, %c1_305] : memref<8x12xf32, #tpu.memory_space<smem>>
    %1221 = vector.extract_strided_slice %1 {offsets = [0, 0, 0], sizes = [1, 7, 128], strides = [1, 1, 1]} : vector<4x7x128xf32> to vector<1x7x128xf32>
    %1222 = vector.shape_cast %1221 : vector<1x7x128xf32> to vector<7x128xf32>
    %1223 = vector.broadcast %1220 : f32 to vector<7x128xf32>
    %1224 = arith.mulf %1222, %1223 : vector<7x128xf32>
    %1225 = vector.extract_strided_slice %4 {offsets = [0, 0, 0], sizes = [1, 6, 128], strides = [1, 1, 1]} : vector<4x6x128xf32> to vector<1x6x128xf32>
    %1226 = vector.shape_cast %1225 : vector<1x6x128xf32> to vector<6x128xf32>
    %1227 = vector.broadcast %1220 : f32 to vector<6x128xf32>
    %1228 = arith.mulf %1226, %1227 : vector<6x128xf32>
    %1229 = arith.addf %1215, %1224 : vector<7x128xf32>
    %1230 = arith.addf %1219, %1228 : vector<6x128xf32>
    %c7_306 = arith.constant 7 : index
    %c2_307 = arith.constant 2 : index
    %1231 = memref.load %arg4[%c7_306, %c2_307] : memref<8x12xf32, #tpu.memory_space<smem>>
    %1232 = vector.extract_strided_slice %2 {offsets = [0, 0, 0], sizes = [1, 7, 128], strides = [1, 1, 1]} : vector<4x7x128xf32> to vector<1x7x128xf32>
    %1233 = vector.shape_cast %1232 : vector<1x7x128xf32> to vector<7x128xf32>
    %1234 = vector.broadcast %1231 : f32 to vector<7x128xf32>
    %1235 = arith.mulf %1233, %1234 : vector<7x128xf32>
    %1236 = vector.extract_strided_slice %5 {offsets = [0, 0, 0], sizes = [1, 6, 128], strides = [1, 1, 1]} : vector<4x6x128xf32> to vector<1x6x128xf32>
    %1237 = vector.shape_cast %1236 : vector<1x6x128xf32> to vector<6x128xf32>
    %1238 = vector.broadcast %1231 : f32 to vector<6x128xf32>
    %1239 = arith.mulf %1237, %1238 : vector<6x128xf32>
    %1240 = arith.addf %1229, %1235 : vector<7x128xf32>
    %1241 = arith.addf %1230, %1239 : vector<6x128xf32>
    %c7_308 = arith.constant 7 : index
    %c3_309 = arith.constant 3 : index
    %1242 = memref.load %arg4[%c7_308, %c3_309] : memref<8x12xf32, #tpu.memory_space<smem>>
    %1243 = vector.extract_strided_slice %0 {offsets = [1, 0, 0], sizes = [1, 7, 128], strides = [1, 1, 1]} : vector<4x7x128xf32> to vector<1x7x128xf32>
    %1244 = vector.shape_cast %1243 : vector<1x7x128xf32> to vector<7x128xf32>
    %1245 = vector.broadcast %1242 : f32 to vector<7x128xf32>
    %1246 = arith.mulf %1244, %1245 : vector<7x128xf32>
    %1247 = vector.extract_strided_slice %3 {offsets = [1, 0, 0], sizes = [1, 6, 128], strides = [1, 1, 1]} : vector<4x6x128xf32> to vector<1x6x128xf32>
    %1248 = vector.shape_cast %1247 : vector<1x6x128xf32> to vector<6x128xf32>
    %1249 = vector.broadcast %1242 : f32 to vector<6x128xf32>
    %1250 = arith.mulf %1248, %1249 : vector<6x128xf32>
    %1251 = arith.addf %1240, %1246 : vector<7x128xf32>
    %1252 = arith.addf %1241, %1250 : vector<6x128xf32>
    %c7_310 = arith.constant 7 : index
    %c4_311 = arith.constant 4 : index
    %1253 = memref.load %arg4[%c7_310, %c4_311] : memref<8x12xf32, #tpu.memory_space<smem>>
    %1254 = vector.extract_strided_slice %1 {offsets = [1, 0, 0], sizes = [1, 7, 128], strides = [1, 1, 1]} : vector<4x7x128xf32> to vector<1x7x128xf32>
    %1255 = vector.shape_cast %1254 : vector<1x7x128xf32> to vector<7x128xf32>
    %1256 = vector.broadcast %1253 : f32 to vector<7x128xf32>
    %1257 = arith.mulf %1255, %1256 : vector<7x128xf32>
    %1258 = vector.extract_strided_slice %4 {offsets = [1, 0, 0], sizes = [1, 6, 128], strides = [1, 1, 1]} : vector<4x6x128xf32> to vector<1x6x128xf32>
    %1259 = vector.shape_cast %1258 : vector<1x6x128xf32> to vector<6x128xf32>
    %1260 = vector.broadcast %1253 : f32 to vector<6x128xf32>
    %1261 = arith.mulf %1259, %1260 : vector<6x128xf32>
    %1262 = arith.addf %1251, %1257 : vector<7x128xf32>
    %1263 = arith.addf %1252, %1261 : vector<6x128xf32>
    %c7_312 = arith.constant 7 : index
    %c5_313 = arith.constant 5 : index
    %1264 = memref.load %arg4[%c7_312, %c5_313] : memref<8x12xf32, #tpu.memory_space<smem>>
    %1265 = vector.extract_strided_slice %2 {offsets = [1, 0, 0], sizes = [1, 7, 128], strides = [1, 1, 1]} : vector<4x7x128xf32> to vector<1x7x128xf32>
    %1266 = vector.shape_cast %1265 : vector<1x7x128xf32> to vector<7x128xf32>
    %1267 = vector.broadcast %1264 : f32 to vector<7x128xf32>
    %1268 = arith.mulf %1266, %1267 : vector<7x128xf32>
    %1269 = vector.extract_strided_slice %5 {offsets = [1, 0, 0], sizes = [1, 6, 128], strides = [1, 1, 1]} : vector<4x6x128xf32> to vector<1x6x128xf32>
    %1270 = vector.shape_cast %1269 : vector<1x6x128xf32> to vector<6x128xf32>
    %1271 = vector.broadcast %1264 : f32 to vector<6x128xf32>
    %1272 = arith.mulf %1270, %1271 : vector<6x128xf32>
    %1273 = arith.addf %1262, %1268 : vector<7x128xf32>
    %1274 = arith.addf %1263, %1272 : vector<6x128xf32>
    %c7_314 = arith.constant 7 : index
    %c6_315 = arith.constant 6 : index
    %1275 = memref.load %arg4[%c7_314, %c6_315] : memref<8x12xf32, #tpu.memory_space<smem>>
    %1276 = vector.extract_strided_slice %0 {offsets = [2, 0, 0], sizes = [1, 7, 128], strides = [1, 1, 1]} : vector<4x7x128xf32> to vector<1x7x128xf32>
    %1277 = vector.shape_cast %1276 : vector<1x7x128xf32> to vector<7x128xf32>
    %1278 = vector.broadcast %1275 : f32 to vector<7x128xf32>
    %1279 = arith.mulf %1277, %1278 : vector<7x128xf32>
    %1280 = vector.extract_strided_slice %3 {offsets = [2, 0, 0], sizes = [1, 6, 128], strides = [1, 1, 1]} : vector<4x6x128xf32> to vector<1x6x128xf32>
    %1281 = vector.shape_cast %1280 : vector<1x6x128xf32> to vector<6x128xf32>
    %1282 = vector.broadcast %1275 : f32 to vector<6x128xf32>
    %1283 = arith.mulf %1281, %1282 : vector<6x128xf32>
    %1284 = arith.addf %1273, %1279 : vector<7x128xf32>
    %1285 = arith.addf %1274, %1283 : vector<6x128xf32>
    %c7_316 = arith.constant 7 : index
    %c7_317 = arith.constant 7 : index
    %1286 = memref.load %arg4[%c7_316, %c7_317] : memref<8x12xf32, #tpu.memory_space<smem>>
    %1287 = vector.extract_strided_slice %1 {offsets = [2, 0, 0], sizes = [1, 7, 128], strides = [1, 1, 1]} : vector<4x7x128xf32> to vector<1x7x128xf32>
    %1288 = vector.shape_cast %1287 : vector<1x7x128xf32> to vector<7x128xf32>
    %1289 = vector.broadcast %1286 : f32 to vector<7x128xf32>
    %1290 = arith.mulf %1288, %1289 : vector<7x128xf32>
    %1291 = vector.extract_strided_slice %4 {offsets = [2, 0, 0], sizes = [1, 6, 128], strides = [1, 1, 1]} : vector<4x6x128xf32> to vector<1x6x128xf32>
    %1292 = vector.shape_cast %1291 : vector<1x6x128xf32> to vector<6x128xf32>
    %1293 = vector.broadcast %1286 : f32 to vector<6x128xf32>
    %1294 = arith.mulf %1292, %1293 : vector<6x128xf32>
    %1295 = arith.addf %1284, %1290 : vector<7x128xf32>
    %1296 = arith.addf %1285, %1294 : vector<6x128xf32>
    %c7_318 = arith.constant 7 : index
    %c8_319 = arith.constant 8 : index
    %1297 = memref.load %arg4[%c7_318, %c8_319] : memref<8x12xf32, #tpu.memory_space<smem>>
    %1298 = vector.extract_strided_slice %2 {offsets = [2, 0, 0], sizes = [1, 7, 128], strides = [1, 1, 1]} : vector<4x7x128xf32> to vector<1x7x128xf32>
    %1299 = vector.shape_cast %1298 : vector<1x7x128xf32> to vector<7x128xf32>
    %1300 = vector.broadcast %1297 : f32 to vector<7x128xf32>
    %1301 = arith.mulf %1299, %1300 : vector<7x128xf32>
    %1302 = vector.extract_strided_slice %5 {offsets = [2, 0, 0], sizes = [1, 6, 128], strides = [1, 1, 1]} : vector<4x6x128xf32> to vector<1x6x128xf32>
    %1303 = vector.shape_cast %1302 : vector<1x6x128xf32> to vector<6x128xf32>
    %1304 = vector.broadcast %1297 : f32 to vector<6x128xf32>
    %1305 = arith.mulf %1303, %1304 : vector<6x128xf32>
    %1306 = arith.addf %1295, %1301 : vector<7x128xf32>
    %1307 = arith.addf %1296, %1305 : vector<6x128xf32>
    %c7_320 = arith.constant 7 : index
    %c9_321 = arith.constant 9 : index
    %1308 = memref.load %arg4[%c7_320, %c9_321] : memref<8x12xf32, #tpu.memory_space<smem>>
    %1309 = vector.extract_strided_slice %0 {offsets = [3, 0, 0], sizes = [1, 7, 128], strides = [1, 1, 1]} : vector<4x7x128xf32> to vector<1x7x128xf32>
    %1310 = vector.shape_cast %1309 : vector<1x7x128xf32> to vector<7x128xf32>
    %1311 = vector.broadcast %1308 : f32 to vector<7x128xf32>
    %1312 = arith.mulf %1310, %1311 : vector<7x128xf32>
    %1313 = vector.extract_strided_slice %3 {offsets = [3, 0, 0], sizes = [1, 6, 128], strides = [1, 1, 1]} : vector<4x6x128xf32> to vector<1x6x128xf32>
    %1314 = vector.shape_cast %1313 : vector<1x6x128xf32> to vector<6x128xf32>
    %1315 = vector.broadcast %1308 : f32 to vector<6x128xf32>
    %1316 = arith.mulf %1314, %1315 : vector<6x128xf32>
    %1317 = arith.addf %1306, %1312 : vector<7x128xf32>
    %1318 = arith.addf %1307, %1316 : vector<6x128xf32>
    %c7_322 = arith.constant 7 : index
    %c10_323 = arith.constant 10 : index
    %1319 = memref.load %arg4[%c7_322, %c10_323] : memref<8x12xf32, #tpu.memory_space<smem>>
    %1320 = vector.extract_strided_slice %1 {offsets = [3, 0, 0], sizes = [1, 7, 128], strides = [1, 1, 1]} : vector<4x7x128xf32> to vector<1x7x128xf32>
    %1321 = vector.shape_cast %1320 : vector<1x7x128xf32> to vector<7x128xf32>
    %1322 = vector.broadcast %1319 : f32 to vector<7x128xf32>
    %1323 = arith.mulf %1321, %1322 : vector<7x128xf32>
    %1324 = vector.extract_strided_slice %4 {offsets = [3, 0, 0], sizes = [1, 6, 128], strides = [1, 1, 1]} : vector<4x6x128xf32> to vector<1x6x128xf32>
    %1325 = vector.shape_cast %1324 : vector<1x6x128xf32> to vector<6x128xf32>
    %1326 = vector.broadcast %1319 : f32 to vector<6x128xf32>
    %1327 = arith.mulf %1325, %1326 : vector<6x128xf32>
    %1328 = arith.addf %1317, %1323 : vector<7x128xf32>
    %1329 = arith.addf %1318, %1327 : vector<6x128xf32>
    %c7_324 = arith.constant 7 : index
    %c11_325 = arith.constant 11 : index
    %1330 = memref.load %arg4[%c7_324, %c11_325] : memref<8x12xf32, #tpu.memory_space<smem>>
    %1331 = vector.extract_strided_slice %2 {offsets = [3, 0, 0], sizes = [1, 7, 128], strides = [1, 1, 1]} : vector<4x7x128xf32> to vector<1x7x128xf32>
    %1332 = vector.shape_cast %1331 : vector<1x7x128xf32> to vector<7x128xf32>
    %1333 = vector.broadcast %1330 : f32 to vector<7x128xf32>
    %1334 = arith.mulf %1332, %1333 : vector<7x128xf32>
    %1335 = vector.extract_strided_slice %5 {offsets = [3, 0, 0], sizes = [1, 6, 128], strides = [1, 1, 1]} : vector<4x6x128xf32> to vector<1x6x128xf32>
    %1336 = vector.shape_cast %1335 : vector<1x6x128xf32> to vector<6x128xf32>
    %1337 = vector.broadcast %1330 : f32 to vector<6x128xf32>
    %1338 = arith.mulf %1336, %1337 : vector<6x128xf32>
    %1339 = arith.addf %1328, %1334 : vector<7x128xf32>
    %1340 = arith.addf %1329, %1338 : vector<6x128xf32>
    %c0_326 = arith.constant 0 : index
    %c7_327 = arith.constant 7 : index
    %1341 = memref.load %arg5[%c0_326, %c7_327] : memref<1x8xf32, #tpu.memory_space<smem>>
    %1342 = vector.broadcast %1341 : f32 to vector<7x128xf32>
    %1343 = arith.addf %1339, %1342 : vector<7x128xf32>
    %c0_328 = arith.constant 0 : index
    %c7_329 = arith.constant 7 : index
    %1344 = memref.load %arg5[%c0_328, %c7_329] : memref<1x8xf32, #tpu.memory_space<smem>>
    %1345 = vector.broadcast %1344 : f32 to vector<6x128xf32>
    %1346 = arith.addf %1340, %1345 : vector<6x128xf32>
    %1347 = vector.extract_strided_slice %1343 {offsets = [0, 0], sizes = [6, 128], strides = [1, 1]} : vector<7x128xf32> to vector<6x128xf32>
    %1348 = arith.maximumf %1347, %1346 : vector<6x128xf32>
    %1349 = vector.extract_strided_slice %1343 {offsets = [1, 0], sizes = [6, 128], strides = [1, 1]} : vector<7x128xf32> to vector<6x128xf32>
    %1350 = arith.maximumf %1348, %1349 : vector<6x128xf32>
    %c0_330 = arith.constant 0 : index
    %c7_331 = arith.constant 7 : index
    %1351 = memref.load %arg3[%c0_330, %c7_331] : memref<1x8xf32, #tpu.memory_space<smem>>
    %1352 = vector.extract_strided_slice %6 {offsets = [0, 0, 0], sizes = [1, 6, 128], strides = [1, 1, 1]} : vector<4x6x128xf32> to vector<1x6x128xf32>
    %1353 = vector.shape_cast %1352 : vector<1x6x128xf32> to vector<6x128xf32>
    %c7_332 = arith.constant 7 : index
    %c0_333 = arith.constant 0 : index
    %1354 = memref.load %arg2[%c7_332, %c0_333] : memref<8x4xf32, #tpu.memory_space<smem>>
    %1355 = vector.broadcast %1354 : f32 to vector<6x128xf32>
    %1356 = arith.mulf %1353, %1355 : vector<6x128xf32>
    %1357 = vector.broadcast %1351 : f32 to vector<6x128xf32>
    %1358 = arith.addf %1357, %1356 : vector<6x128xf32>
    %1359 = vector.extract_strided_slice %6 {offsets = [1, 0, 0], sizes = [1, 6, 128], strides = [1, 1, 1]} : vector<4x6x128xf32> to vector<1x6x128xf32>
    %1360 = vector.shape_cast %1359 : vector<1x6x128xf32> to vector<6x128xf32>
    %c7_334 = arith.constant 7 : index
    %c1_335 = arith.constant 1 : index
    %1361 = memref.load %arg2[%c7_334, %c1_335] : memref<8x4xf32, #tpu.memory_space<smem>>
    %1362 = vector.broadcast %1361 : f32 to vector<6x128xf32>
    %1363 = arith.mulf %1360, %1362 : vector<6x128xf32>
    %1364 = arith.addf %1358, %1363 : vector<6x128xf32>
    %1365 = vector.extract_strided_slice %6 {offsets = [2, 0, 0], sizes = [1, 6, 128], strides = [1, 1, 1]} : vector<4x6x128xf32> to vector<1x6x128xf32>
    %1366 = vector.shape_cast %1365 : vector<1x6x128xf32> to vector<6x128xf32>
    %c7_336 = arith.constant 7 : index
    %c2_337 = arith.constant 2 : index
    %1367 = memref.load %arg2[%c7_336, %c2_337] : memref<8x4xf32, #tpu.memory_space<smem>>
    %1368 = vector.broadcast %1367 : f32 to vector<6x128xf32>
    %1369 = arith.mulf %1366, %1368 : vector<6x128xf32>
    %1370 = arith.addf %1364, %1369 : vector<6x128xf32>
    %1371 = vector.extract_strided_slice %6 {offsets = [3, 0, 0], sizes = [1, 6, 128], strides = [1, 1, 1]} : vector<4x6x128xf32> to vector<1x6x128xf32>
    %1372 = vector.shape_cast %1371 : vector<1x6x128xf32> to vector<6x128xf32>
    %c7_338 = arith.constant 7 : index
    %c3_339 = arith.constant 3 : index
    %1373 = memref.load %arg2[%c7_338, %c3_339] : memref<8x4xf32, #tpu.memory_space<smem>>
    %1374 = vector.broadcast %1373 : f32 to vector<6x128xf32>
    %1375 = arith.mulf %1372, %1374 : vector<6x128xf32>
    %1376 = arith.addf %1370, %1375 : vector<6x128xf32>
    %1377 = arith.addf %1350, %1376 : vector<6x128xf32>
    %cst_340 = arith.constant 0.000000e+00 : f32
    %1378 = vector.broadcast %cst_340 : f32 to vector<6x128xf32>
    %1379 = arith.maximumf %1377, %1378 : vector<6x128xf32>
    %c7_341 = arith.constant 7 : index
    %c0_342 = arith.constant 0 : index
    %c0_343 = arith.constant 0 : index
    %1380 = vector.load %arg6[%c7_341, %c0_342, %c0_343] : memref<8x6x128xf32, #tpu.memory_space<vmem>>, vector<1x6x128xf32>
    %1381 = vector.shape_cast %1380 : vector<1x6x128xf32> to vector<6x128xf32>
    %1382 = vector.shape_cast %1379 : vector<6x128xf32> to vector<1x6x128xf32>
    tpu.vector_store %arg6[%c7_341, %c0_342, %c0_343], %1382 {strides = array<i32>} : memref<8x6x128xf32, #tpu.memory_space<vmem>>, vector<1x6x128xf32>,
    return
  }
  func.func @transform_0(%arg0: i32) -> (i32, i32, i32) {
    %c0_i32 = arith.constant 0 : i32
    %c0_i32_0 = arith.constant 0 : i32
    %c0_i32_1 = arith.constant 0 : i32
    return %c0_i32, %c0_i32_0, %arg0 : i32, i32, i32
  }
  func.func @transform_1(%arg0: i32) -> (i32, i32) {
    %c0_i32 = arith.constant 0 : i32
    %c0_i32_0 = arith.constant 0 : i32
    %c0_i32_1 = arith.constant 0 : i32
    return %c0_i32, %c0_i32_0 : i32, i32
  }
  func.func @transform_2(%arg0: i32) -> (i32, i32) {
    %c0_i32 = arith.constant 0 : i32
    %c0_i32_0 = arith.constant 0 : i32
    %c0_i32_1 = arith.constant 0 : i32
    return %c0_i32, %c0_i32_0 : i32, i32
  }
  func.func @transform_3(%arg0: i32) -> (i32, i32) {
    %c0_i32 = arith.constant 0 : i32
    %c0_i32_0 = arith.constant 0 : i32
    %c0_i32_1 = arith.constant 0 : i32
    return %c0_i32, %c0_i32_0 : i32, i32
  }
  func.func @transform_4(%arg0: i32) -> (i32, i32) {
    %c0_i32 = arith.constant 0 : i32
    %c0_i32_0 = arith.constant 0 : i32
    %c0_i32_1 = arith.constant 0 : i32
    return %c0_i32, %c0_i32_0 : i32, i32
  }
  func.func @transform_5(%arg0: i32) -> (i32, i32, i32) {
    %c0_i32 = arith.constant 0 : i32
    %c0_i32_0 = arith.constant 0 : i32
    %c0_i32_1 = arith.constant 0 : i32
    return %c0_i32, %c0_i32_0, %arg0 : i32, i32, i32
  }
}

</mosaic_0001>

<bundles_post_ra>
// kernel: tpu_custom_call.1
= control target key start
LH: loop header
LB: loop body
LE: loop exit
PB: predicated region body
PF: predicated region fallthrough
CT: control target
= control target key end

     0   :  { %10 = vsyncpa [#allocation3], 0  ;;  %s2048_s0 = inlined_call_operand.hbm [shape: f32[4,16,128], index: 0, kind: input, shape index: {}]   ;;  %s2049_s1 = inlined_call_operand.vmem [shape: f32[8,4], index: 1, kind: input, shape index: {}]   ;;  %s2050_s2 = inlined_call_operand.vmem [shape: f32[1,8], index: 2, kind: input, shape index: {}]   ;;  %s2051_s3 = inlined_call_operand.vmem [shape: f32[8,12], index: 3, kind: input, shape index: {}]   ;;  %s2052_s4 = inlined_call_operand.vmem [shape: f32[1,8], index: 4, kind: input, shape index: {}]   ;;  %s2053_s5 = inlined_call_operand.vmem [shape: f32[8,6,128], index: 5, kind: output, shape index: {}]  }
   0x1   :  { %11 = vsyncpa [#allocation4], 0 }
   0x2   :  { %12 = vsyncpa [#allocation7], 0  ;;  %s41_s20 = sshll.u32 %s2050_s2, 4  ;;  %s42_s20 = int_to_ptr.vmem [resolvable:$true] %s41_s20 }
   0x3   :  { %13 = vsyncpa [#allocation10], 0  ;;  %s18_s23 = sshll.u32 %s2048_s0, 4  ;;  %s1212_s24 = smov [#allocation6]   ;;  %s19_s23 = int_to_ptr.hbm [resolvable:$true] %s18_s23 }
   0x4   :  { %44 = dma.vmem_to_smem %s42_s20, 16, %s1212_s24, [#allocation7]  }
   0x5   :  { %s1213_s25 = smov [#allocation2]   ;;  %s1214_s27 = smov 128  }
   0x6   :  { %s20_s26 = sshll.u32 %s1213_s25, 4  ;;  %s1215_s28 = smov 8   ;;  %s21_s26 = int_to_ptr.vmem [resolvable:$true] %s20_s26 }
   0x7   :  { %26 = dma.hbm_to_vmem [thread:$0]  %s19_s23, 1024, %s21_s26, [#allocation3], %s1214_s27, %s1214_s27, %s1215_s28  }
   0x8   :  { %s32_s6 = sshll.u32 %s2049_s1, 4  ;;  %s50_s8 = sshll.u32 %s2051_s3, 4  ;;  %s33_s6 = int_to_ptr.vmem [resolvable:$true] %s32_s6  ;;  %s51_s8 = int_to_ptr.vmem [resolvable:$true] %s50_s8 }
   0x9   :  { %s1216_s9 = smov [#allocation5]   ;;  %s1217_s0 = smov [#allocation8]  }
   0xa   :  { %35 = dma.vmem_to_smem %s33_s6, 128, %s1216_s9, [#allocation4]  }
   0xb   :  { %53 = dma.vmem_to_smem %s51_s8, 128, %s1217_s0, [#allocation7]  }
   0xc   :  { %s59_s12 = sshll.u32 %s2052_s4, 4  ;;  %s1218_s13 = smov [#allocation9]   ;;  %s60_s12 = int_to_ptr.vmem [resolvable:$true] %s59_s12 }
   0xd   :  { %62 = dma.vmem_to_smem %s60_s12, 16, %s1218_s13, [#allocation10]  }
   0xe   :  { %1204 = dma.done.wait [#allocation3], 1024  }
   0xf   :  { %1205 = vsyncadd [#allocation3], 4294966272 }
  0x10   :  { %1206 = dma.done.wait [#allocation4], 128  }
  0x11   :  { %1207 = vsyncadd [#allocation4], 4294967168 }
  0x12   :  { %1208 = dma.done.wait [#allocation7], 144  }
  0x13   :  { %1209 = vsyncadd [#allocation7], 4294967152 }
  0x14   :  { %1210 = dma.done.wait [#allocation10], 16  }
  0x15   :  { %1211 = vsyncadd [#allocation10], 4294967280 }
  0x16   :  { %83 = sfence }
  0x17   :  { %s135_s1 = sld [smem:[#allocation8]]  ;;  %v1264_v0 = vld [vmem:[#allocation2] ss:$2 sm:$0x7f] }
  0x18   :  { %s950_s3 = sld [smem:[#allocation8 + $0x1]]  ;;  %v1266_v1 = vld [vmem:[#allocation2 + $0x1] ss:$2 sm:$0x7f] }
  0x19   :  { %s951_s14 = sld [smem:[#allocation8 + $0x2]]  ;;  %v1268_v2 = vld [vmem:[#allocation2 + $0x2] ss:$2 sm:$0x7f] }
  0x1a   :  { %s952_s4 = sld [smem:[#allocation8 + $0x3]]  ;;  %v1270_v3 = vld [vmem:[#allocation2 + $0x1] ss:$2 sm:$0x3f] }
  0x1b   :  { %s1272_s15 = sld [smem:[#allocation8 + $0x4]]  ;;  %v1274_v4 = vld [vmem:[#allocation2 + $0x10] ss:$2 sm:$0x7f] }
  0x1c   :  { %v1276_v5 = vld [vmem:[#allocation2 + $0x2] ss:$2 sm:$0x3f]  ;;  %s1278_s16 = sld [smem:[#allocation8 + $0x5]] }
  0x1d   :  { %v1280_v6 = vld [vmem:[#allocation2 + $0x3] ss:$2 sm:$0x3f]  ;;  %v136_v7 = vstv %s135_s1  ;;  %s1282_s17 = sld [smem:[#allocation8 + $0x6]] }
  0x1e   :  { %v1284_v8 = vld [vmem:[#allocation2 + $0x11] ss:$2 sm:$0x3f]  ;;  %v137_v9 = vmul.f32 %v136_v7, %v1264_v0  ;;  %v138_v10 = vmul.f32 %v136_v7, %v1270_v3  ;;  %v140_v11 = vstv %s950_s3  ;;  %s1288_s18 = sld [smem:[#allocation8 + $0x7]] }
  0x1f   :  { %v1290_v12 = vld [vmem:[#allocation2 + $0x11] ss:$2 sm:$0x7f]  ;;  %v141_v13 = vmul.f32 %v140_v11, %v1266_v1  ;;  %v142_v14 = vmul.f32 %v140_v11, %v1276_v5  ;;  %v146_v15 = vstv %s951_s14  ;;  %s1294_s19 = sld [smem:[#allocation8 + $0x8]] }
  0x20   :  { %v1296_v16 = vld [vmem:[#allocation2 + $0x12] ss:$2 sm:$0x3f]  ;;  %v147_v17 = vmul.f32 %v146_v15, %v1268_v2  ;;  %v148_v18 = vmul.f32 %v146_v15, %v1280_v6  ;;  %v152_v19 = vstv %s952_s4  ;;  %s1300_s20 = sld [smem:[#allocation8 + $0x9]] }
  0x21   :  { %v1302_v20 = vld [vmem:[#allocation2 + $0x20] ss:$2 sm:$0x7f]  ;;  %v1304_v21 = vld [vmem:[#allocation2 + $0x12] ss:$2 sm:$0x7f]  ;;  %v143_v22 = vadd.f32 %v141_v13, %v137_v9  ;;  %v144_v23 = vadd.f32 %v142_v14, %v138_v10  ;;  %v153_v24 = vmul.f32 %v152_v19, %v1274_v4  ;;  %v154_v25 = vmul.f32 %v152_v19, %v1284_v8 }
  0x22   :  { %s1308_s21 = sld [smem:[#allocation8 + $0xa]]  ;;  %v1310_v26 = vld [vmem:[#allocation2 + $0x13] ss:$2 sm:$0x3f]  ;;  %v158_v27 = vstv %s1272_s15  ;;  %v164_v28 = vstv %s1278_s16 }
  0x23   :  { %s1314_s22 = sld [smem:[#allocation8 + $0xb]]  ;;  %v1316_v29 = vld [vmem:[#allocation2 + $0x21] ss:$2 sm:$0x7f]  ;;  %v149_v30 = vadd.f32 %v147_v17, %v143_v22  ;;  %v150_v31 = vadd.f32 %v148_v18, %v144_v23  ;;  %v159_v32 = vmul.f32 %v158_v27, %v1290_v12  ;;  %v160_v33 = vmul.f32 %v158_v27, %v1296_v16 }
  0x24   :  { %s1320_s23 = sld [smem:[#allocation9]]  ;;  %v1322_v34 = vld [vmem:[#allocation2 + $0x22] ss:$2 sm:$0x7f]  ;;  %v165_v36 = vmul.f32 %v164_v28, %v1304_v21  ;;  %v170_v37 = vstv %s1282_s17  ;;  %v166_v43 = vmul.f32 %v164_v28, %v1310_v26  ;;  %v176_v44 = vstv %s1288_s18 }
  0x25   :  { %v1324_v35 = vld [vmem:[#allocation2 + $0x21] ss:$2 sm:$0x3f]  ;;  %s1328_s24 = sld [smem:[#allocation6]]  ;;  %v155_v41 = vadd.f32 %v153_v24, %v149_v30  ;;  %v156_v42 = vadd.f32 %v154_v25, %v150_v31  ;;  %v171_v46 = vmul.f32 %v170_v37, %v1302_v20  ;;  %v182_v47 = vstv %s1294_s19 }
  0x26   :  { %v1330_v38 = vld [vmem:[#allocation2 + $0x30] ss:$2 sm:$0x7f]  ;;  %v1332_v39 = vld [vmem:[#allocation2 + $0x31] ss:$2 sm:$0x7f]  ;;  %v172_v52 = vmul.f32 %v170_v37, %v1324_v35  ;;  %v188_v53 = vstv %s1300_s20  ;;  %v177_v55 = vmul.f32 %v176_v44, %v1316_v29  ;;  %v183_v62 = vmul.f32 %v182_v47, %v1322_v34 }
  0x27   :  { %v1334_v40 = vld [vmem:[#allocation2 + $0x22] ss:$2 sm:$0x3f]  ;;  %s1338_s25 = sld [smem:[#allocation5]]  ;;  %v161_v50 = vadd.f32 %v159_v32, %v155_v41  ;;  %v162_v51 = vadd.f32 %v160_v33, %v156_v42  ;;  %v189_v10 = vmul.f32 %v188_v53, %v1330_v38 }
  0x28   :  { %v1340_v45 = vld [vmem:[#allocation2 + $0x31] ss:$2 sm:$0x3f]  ;;  %s1344_s26 = sld [smem:[#allocation5 + $0x1]]  ;;  %v178_v56 = vmul.f32 %v176_v44, %v1334_v40  ;;  %v194_v57 = vstv %s1308_s21 }
  0x29   :  { %v1346_v48 = vld [vmem:[#allocation2 + $0x32] ss:$2 sm:$0x7f]  ;;  %v1348_v49 = vld [vmem:[#allocation2 + $0x23] ss:$2 sm:$0x3f]  ;;  %v167_v60 = vadd.f32 %v165_v36, %v161_v50  ;;  %v168_v61 = vadd.f32 %v166_v43, %v162_v51  ;;  %v200_v63 = vstv %s1314_s22  ;;  %v190_v11 = vmul.f32 %v188_v53, %v1340_v45 }
  0x2a   :  { %s1352_s27 = sld [smem:[#allocation5 + $0x2]]  ;;  %v1354_v54 = vld [vmem:[#allocation2 + $0x32] ss:$2 sm:$0x3f]  ;;  %v184_v9 = vmul.f32 %v182_v47, %v1348_v49  ;;  %v195_v13 = vmul.f32 %v194_v57, %v1332_v39  ;;  %v201_v24 = vmul.f32 %v200_v63, %v1346_v48 }
  0x2b   :  { %s1359_s28 = sld [smem:[#allocation5 + $0x3]]  ;;  %v1361_v58 = vld [vmem:[#allocation2 + $0x33] ss:$2 sm:$0x3f]  ;;  %v173_v15 = vadd.f32 %v171_v46, %v167_v60  ;;  %v174_v17 = vadd.f32 %v172_v52, %v168_v61  ;;  %v218_v19 = vstv %s1328_s24  ;;  %v196_v23 = vmul.f32 %v194_v57, %v1354_v54 }
  0x2c   :  { %v1363_v59 = vld [vmem:[#allocation2 + $0x4] ss:$2 sm:$0x3f]  ;;  %s1367_s29 = sld [smem:[#allocation8 + $0x80]]  ;;  %v202_v33 = vmul.f32 %v200_v63, %v1361_v58  ;;  %v206_v60 = vstv %s1320_s23 }
  0x2d   :  { %v1369_v7 = vld [vmem:[#allocation2 + $0x14] ss:$2 sm:$0x3f]  ;;  %s1375_s30 = sld [smem:[#allocation8 + $0x81]]  ;;  %v216_v18 = vstv %s1338_s25  ;;  %v179_v28 = vadd.f32 %v177_v55, %v173_v15  ;;  %v180_v30 = vadd.f32 %v178_v56, %v174_v17 }
  0x2e   :  { %v1377_v14 = vld [vmem:[#allocation2 + $0x24] ss:$2 sm:$0x3f]  ;;  %s1381_s6 = sld [smem:[#allocation8 + $0x82]]  ;;  %v217_v25 = vmul.f32 %v216_v18, %v1363_v59  ;;  %v221_v27 = vstv %s1344_s26 }
  0x2f   :  { %v1383_v22 = vld [vmem:[#allocation2 + $0x34] ss:$2 sm:$0x3f]  ;;  %s1389_s2 = sld [smem:[#allocation8 + $0x83]]  ;;  %v222_v31 = vmul.f32 %v221_v27, %v1369_v7  ;;  %v185_v42 = vadd.f32 %v183_v62, %v179_v28  ;;  %v186_v43 = vadd.f32 %v184_v9, %v180_v30 }
  0x30   :  { %v225_v32 = vstv %s1352_s27  ;;  %s1393_s7 = sld [smem:[#allocation8 + $0x84]]  ;;  %v219_v36 = vadd.f32 %v218_v19, %v217_v25 }
  0x31   :  { %v226_v37 = vmul.f32 %v225_v32, %v1377_v14  ;;  %v229_v41 = vstv %s1359_s28  ;;  %s1398_s8 = sld [smem:[#allocation8 + $0x85]]  ;;  %v191_v53 = vadd.f32 %v189_v10, %v185_v42  ;;  %v192_v55 = vadd.f32 %v190_v11, %v186_v43 }
  0x32   :  { %v230_v44 = vmul.f32 %v229_v41, %v1383_v22  ;;  %v236_v46 = vstv %s1367_s29  ;;  %s1402_s9 = sld [smem:[#allocation8 + $0x86]]  ;;  %v223_v47 = vadd.f32 %v222_v31, %v219_v36 }
  0x33   :  { %v237_v50 = vmul.f32 %v236_v46, %v1264_v0  ;;  %v238_v51 = vmul.f32 %v236_v46, %v1270_v3  ;;  %v240_v52 = vstv %s1375_s30  ;;  %s1407_s0 = sld [smem:[#allocation8 + $0x87]]  ;;  %v197_v9 = vadd.f32 %v195_v13, %v191_v53 }
  0x34   :  { %v241_v56 = vmul.f32 %v240_v52, %v1266_v1  ;;  %v242_v57 = vmul.f32 %v240_v52, %v1276_v5  ;;  %s1411_s10 = sld [smem:[#allocation8 + $0x88]]  ;;  %v227_v61 = vadd.f32 %v226_v37, %v223_v47  ;;  %v246_v62 = vstv %s1381_s6 }
  0x35   :  { %v252_v63 = vstv %s1389_s2  ;;  %s1416_s11 = sld [smem:[#allocation8 + $0x89]]  ;;  %v198_v15 = vadd.f32 %v196_v23, %v192_v55  ;;  %v247_v11 = vmul.f32 %v246_v62, %v1268_v2  ;;  %v248_v19 = vmul.f32 %v246_v62, %v1280_v6 }
  0x36   :  { %v243_v17 = vadd.f32 %v241_v56, %v237_v50  ;;  %v244_v18 = vadd.f32 %v242_v57, %v238_v51  ;;  %s1418_s12 = sld [smem:[#allocation8 + $0x8a]]  ;;  %v231_v10 = vadd.f32 %v230_v44, %v227_v61  ;;  %v253_v25 = vmul.f32 %v252_v63, %v1274_v4 }
  0x37   :  { %s1423_s13 = sld [smem:[#allocation8 + $0x8b]]  ;;  %v203_v27 = vadd.f32 %v201_v24, %v197_v9  ;;  %v204_v28 = vadd.f32 %v202_v33, %v198_v15  ;;  %v254_v13 = vmul.f32 %v252_v63, %v1284_v8  ;;  %v258_v23 = vstv %s1393_s7 }
  0x38   :  { %s1427_s1 = sld [smem:[#allocation9 + $0x1]]  ;;  %v249_v30 = vadd.f32 %v247_v11, %v243_v17  ;;  %v250_v31 = vadd.f32 %v248_v19, %v244_v18  ;;  %v259_v32 = vmul.f32 %v258_v23, %v1290_v12  ;;  %v260_v36 = vmul.f32 %v258_v23, %v1296_v16 }
  0x39   :  { %s1431_s3 = sld [smem:[#allocation6 + $0x1]]  ;;  %v207_v37 = vadd.f32 %v206_v60, %v203_v27  ;;  %v208_v41 = vadd.f32 %v206_v60, %v204_v28  ;;  %v264_v42 = vstv %s1398_s8  ;;  %v270_v24 = vstv %s1402_s9 }
  0x3a   :  { %s1435_s14 = sld [smem:[#allocation5 + $0x80]]  ;;  %v255_v33 = vadd.f32 %v253_v25, %v249_v30  ;;  %v256_v43 = vadd.f32 %v254_v13, %v250_v31  ;;  %v265_v44 = vmul.f32 %v264_v42, %v1304_v21  ;;  %v266_v46 = vmul.f32 %v264_v42, %v1310_v26 }
  0x3b   :  { %s1439_s4 = sld [smem:[#allocation5 + $0x81]]  ;;  %v209_v47 = vmax.f32 %v207_v37, %v208_v41  ;;  %v211_v50 = vrot.slane %v207_v37, 1  ;;  %v271_v51 = vmul.f32 %v270_v24, %v1302_v20  ;;  %v272_v52 = vmul.f32 %v270_v24, %v1324_v35 }
  0x3c   :  { %s1443_s15 = sld [smem:[#allocation5 + $0x82]]  ;;  %v261_v53 = vadd.f32 %v259_v32, %v255_v33  ;;  %v262_v55 = vadd.f32 %v260_v36, %v256_v43  ;;  %v276_v56 = vstv %s1407_s0  ;;  %v282_v57 = vstv %s1411_s10 }
  0x3d   :  { %s1447_s16 = sld [smem:[#allocation5 + $0x83]]  ;;  %v213_v60 = vmax.f32 %v209_v47, %v211_v50  ;;  %v277_v61 = vmul.f32 %v276_v56, %v1316_v29  ;;  %v278_v62 = vmul.f32 %v276_v56, %v1334_v40  ;;  %v283_v63 = vmul.f32 %v282_v57, %v1322_v34 }
  0x3e   :  { %s1452_s17 = sld [smem:[#allocation8 + $0x100]]  ;;  %v267_v9 = vadd.f32 %v265_v44, %v261_v53  ;;  %v268_v15 = vadd.f32 %v266_v46, %v262_v55  ;;  %v284_v17 = vmul.f32 %v282_v57, %v1348_v49  ;;  %v288_v18 = vstv %s1416_s11 }
  0x3f   :  { %s1456_s18 = sld [smem:[#allocation8 + $0x101]]  ;;  %v232_v11 = vadd.f32 %v231_v10, %v213_v60  ;;  %v289_v19 = vmul.f32 %v288_v18, %v1330_v38  ;;  %v290_v25 = vmul.f32 %v288_v18, %v1340_v45  ;;  %v294_v27 = vstv %s1418_s12 }
  0x40   :  { %s1461_s19 = sld [smem:[#allocation8 + $0x102]]  ;;  %v273_v28 = vadd.f32 %v271_v51, %v267_v9  ;;  %v274_v13 = vadd.f32 %v272_v52, %v268_v15  ;;  %v295_v23 = vmul.f32 %v294_v27, %v1332_v39  ;;  %v296_v30 = vmul.f32 %v294_v27, %v1354_v54 }
  0x41   :  { %s1465_s20 = sld [smem:[#allocation8 + $0x103]]  ;;  %v233_v31 = vmax.f32 %v232_v11, 0.0  ;;  %v300_v10 = vstv %s1423_s13  ;;  %v306_v32 = vstv %s1427_s1  ;;  %v316_v36 = vstv %s1435_s14 }
  0x42   :  { %v279_v37 = vadd.f32 %v277_v61, %v273_v28  ;;  %v280_v41 = vadd.f32 %v278_v62, %v274_v13  ;;  %v301_v42 = vmul.f32 %v300_v10, %v1346_v48  ;;  %v302_v24 = vmul.f32 %v300_v10, %v1361_v58  ;;  %s1472_s21 = sld [smem:[#allocation8 + $0x104]] }
  0x43   :  { %234 = vst [vmem:[%s2053_s5] sm:$0x3f] %v233_v31  ;;  %v317_v33 = vmul.f32 %v316_v36, %v1363_v59  ;;  %v318_v43 = vstv %s1431_s3  ;;  %v321_v44 = vstv %s1439_s4  ;;  %v325_v46 = vstv %s1443_s15  ;;  %s1481_s24 = sld [smem:[#allocation8 + $0x105]] }
  0x44   :  { %v285_v47 = vadd.f32 %v283_v63, %v279_v37  ;;  %v286_v50 = vadd.f32 %v284_v17, %v280_v41  ;;  %v322_v51 = vmul.f32 %v321_v44, %v1369_v7  ;;  %v326_v52 = vmul.f32 %v325_v46, %v1377_v14  ;;  %s1485_s25 = sld [smem:[#allocation8 + $0x106]] }
  0x45   :  { %v319_v53 = vadd.f32 %v318_v43, %v317_v33  ;;  %v329_v55 = vstv %s1447_s16  ;;  %v337_v56 = vstv %s1452_s17  ;;  %v341_v57 = vstv %s1456_s18  ;;  %s1490_s26 = sld [smem:[#allocation8 + $0x107]] }
  0x46   :  { %v291_v60 = vadd.f32 %v289_v19, %v285_v47  ;;  %v292_v61 = vadd.f32 %v290_v25, %v286_v50  ;;  %v330_v62 = vmul.f32 %v329_v55, %v1383_v22  ;;  %v338_v63 = vmul.f32 %v337_v56, %v1264_v0  ;;  %s1494_s27 = sld [smem:[#allocation8 + $0x108]] }
  0x47   :  { %v323_v9 = vadd.f32 %v322_v51, %v319_v53  ;;  %v339_v15 = vmul.f32 %v337_v56, %v1270_v3  ;;  %v342_v17 = vmul.f32 %v341_v57, %v1266_v1  ;;  %v343_v18 = vmul.f32 %v341_v57, %v1276_v5  ;;  %s1499_s28 = sld [smem:[#allocation8 + $0x109]] }
  0x48   :  { %v297_v11 = vadd.f32 %v295_v23, %v291_v60  ;;  %v298_v27 = vadd.f32 %v296_v30, %v292_v61  ;;  %v347_v28 = vstv %s1461_s19  ;;  %v353_v19 = vstv %s1465_s20  ;;  %s1503_s29 = sld [smem:[#allocation8 + $0x10a]] }
  0x49   :  { %v327_v25 = vadd.f32 %v326_v52, %v323_v9  ;;  %v344_v13 = vadd.f32 %v342_v17, %v338_v63  ;;  %v345_v31 = vadd.f32 %v343_v18, %v339_v15  ;;  %v348_v10 = vmul.f32 %v347_v28, %v1268_v2  ;;  %s1506_s30 = sld [smem:[#allocation8 + $0x10b]] }
  0x4a   :  { %v303_v36 = vadd.f32 %v301_v42, %v297_v11  ;;  %v304_v37 = vadd.f32 %v302_v24, %v298_v27  ;;  %v349_v41 = vmul.f32 %v347_v28, %v1280_v6  ;;  %v354_v23 = vmul.f32 %v353_v19, %v1274_v4  ;;  %s1510_s6 = sld [smem:[#allocation9 + $0x2]] }
  0x4b   :  { %v331_v30 = vadd.f32 %v330_v62, %v327_v25  ;;  %v350_v33 = vadd.f32 %v348_v10, %v344_v13  ;;  %v355_v43 = vmul.f32 %v353_v19, %v1284_v8  ;;  %v359_v44 = vstv %s1472_s21  ;;  %s1514_s2 = sld [smem:[#allocation6 + $0x2]] }
  0x4c   :  { %v307_v46 = vadd.f32 %v306_v32, %v303_v36  ;;  %v308_v47 = vadd.f32 %v306_v32, %v304_v37  ;;  %v351_v50 = vadd.f32 %v349_v41, %v345_v31  ;;  %v360_v42 = vmul.f32 %v359_v44, %v1290_v12  ;;  %s1517_s7 = sld [smem:[#allocation5 + $0x100]] }
  0x4d   :  { %v356_v24 = vadd.f32 %v354_v23, %v350_v33  ;;  %v361_v51 = vmul.f32 %v359_v44, %v1296_v16  ;;  %v365_v52 = vstv %s1481_s24  ;;  %v371_v53 = vstv %s1485_s25  ;;  %s1522_s8 = sld [smem:[#allocation5 + $0x101]] }
  0x4e   :  { %v309_v55 = vmax.f32 %v307_v46, %v308_v47  ;;  %v311_v56 = vrot.slane %v307_v46, 1  ;;  %v357_v57 = vadd.f32 %v355_v43, %v351_v50  ;;  %v366_v60 = vmul.f32 %v365_v52, %v1304_v21  ;;  %s1525_s9 = sld [smem:[#allocation5 + $0x102]] }
  0x4f   :  { %v362_v32 = vadd.f32 %v360_v42, %v356_v24  ;;  %v367_v61 = vmul.f32 %v365_v52, %v1310_v26  ;;  %v372_v62 = vmul.f32 %v371_v53, %v1302_v20  ;;  %v373_v63 = vmul.f32 %v371_v53, %v1324_v35  ;;  %s1530_s0 = sld [smem:[#allocation5 + $0x103]] }
  0x50   :  { %v313_v9 = vmax.f32 %v309_v55, %v311_v56  ;;  %v363_v15 = vadd.f32 %v361_v51, %v357_v57  ;;  %v377_v17 = vstv %s1490_s26  ;;  %v383_v18 = vstv %s1494_s27  ;;  %s1534_s10 = sld [smem:[#allocation8 + $0x180]] }
  0x51   :  { %v368_v11 = vadd.f32 %v366_v60, %v362_v32  ;;  %v378_v27 = vmul.f32 %v377_v17, %v1316_v29  ;;  %v379_v28 = vmul.f32 %v377_v17, %v1334_v40  ;;  %v384_v19 = vmul.f32 %v383_v18, %v1322_v34  ;;  %s1539_s11 = sld [smem:[#allocation8 + $0x181]] }
  0x52   :  { %v332_v25 = vadd.f32 %v331_v30, %v313_v9  ;;  %v369_v13 = vadd.f32 %v367_v61, %v363_v15  ;;  %v385_v31 = vmul.f32 %v383_v18, %v1348_v49  ;;  %v389_v10 = vstv %s1499_s28  ;;  %s1546_s12 = sld [smem:[#allocation8 + $0x182]] }
  0x53   :  { %v374_v36 = vadd.f32 %v372_v62, %v368_v11  ;;  %v390_v37 = vmul.f32 %v389_v10, %v1330_v38  ;;  %v391_v41 = vmul.f32 %v389_v10, %v1340_v45  ;;  %v395_v23 = vstv %s1503_s29  ;;  %s1550_s13 = sld [smem:[#allocation8 + $0x183]] }
  0x54   :  { %v333_v33 = vmax.f32 %v332_v25, 0.0  ;;  %v375_v43 = vadd.f32 %v373_v63, %v369_v13  ;;  %v396_v30 = vmul.f32 %v395_v23, %v1332_v39  ;;  %v397_v44 = vmul.f32 %v395_v23, %v1354_v54  ;;  %s1561_s14 = sld [smem:[#allocation8 + $0x184]] }
  0x55   :  { %v380_v46 = vadd.f32 %v378_v27, %v374_v36  ;;  %v401_v47 = vstv %s1506_s30  ;;  %v407_v50 = vstv %s1510_s6  ;;  %v417_v42 = vstv %s1517_s7  ;;  %s1566_s4 = sld [smem:[#allocation8 + $0x185]] }
  0x56   :  { %982 = vst [vmem:[%s2053_s5 + $0x8] sm:$0x3f] %v333_v33  ;;  %v381_v24 = vadd.f32 %v379_v28, %v375_v43  ;;  %v402_v51 = vmul.f32 %v401_v47, %v1346_v48  ;;  %v403_v52 = vmul.f32 %v401_v47, %v1361_v58  ;;  %v418_v53 = vmul.f32 %v417_v42, %v1363_v59  ;;  %s1570_s15 = sld [smem:[#allocation8 + $0x186]] }
  0x57   :  { %v386_v55 = vadd.f32 %v384_v19, %v380_v46  ;;  %v419_v56 = vstv %s1514_s2  ;;  %v422_v57 = vstv %s1522_s8  ;;  %v426_v60 = vstv %s1525_s9  ;;  %s1575_s16 = sld [smem:[#allocation8 + $0x187]] }
  0x58   :  { %v387_v32 = vadd.f32 %v385_v31, %v381_v24  ;;  %v420_v61 = vadd.f32 %v419_v56, %v418_v53  ;;  %v423_v62 = vmul.f32 %v422_v57, %v1369_v7  ;;  %v427_v63 = vmul.f32 %v426_v60, %v1377_v14  ;;  %s1579_s17 = sld [smem:[#allocation8 + $0x188]] }
  0x59   :  { %v392_v9 = vadd.f32 %v390_v37, %v386_v55  ;;  %v430_v15 = vstv %s1530_s0  ;;  %v438_v17 = vstv %s1534_s10  ;;  %v442_v18 = vstv %s1539_s11  ;;  %s1584_s18 = sld [smem:[#allocation8 + $0x189]] }
  0x5a   :  { %v393_v11 = vadd.f32 %v391_v41, %v387_v32  ;;  %v424_v27 = vadd.f32 %v423_v62, %v420_v61  ;;  %v431_v28 = vmul.f32 %v430_v15, %v1383_v22  ;;  %v439_v19 = vmul.f32 %v438_v17, %v1264_v0  ;;  %s1588_s19 = sld [smem:[#allocation8 + $0x18a]] }
  0x5b   :  { %v398_v25 = vadd.f32 %v396_v30, %v392_v9  ;;  %v440_v13 = vmul.f32 %v438_v17, %v1270_v3  ;;  %v443_v31 = vmul.f32 %v442_v18, %v1266_v1  ;;  %v444_v10 = vmul.f32 %v442_v18, %v1276_v5  ;;  %s1591_s20 = sld [smem:[#allocation8 + $0x18b]] }
  0x5c   :  { %v399_v36 = vadd.f32 %v397_v44, %v393_v11  ;;  %v428_v37 = vadd.f32 %v427_v63, %v424_v27  ;;  %v448_v23 = vstv %s1546_s12  ;;  %v454_v41 = vstv %s1550_s13  ;;  %s1595_s21 = sld [smem:[#allocation9 + $0x3]] }
  0x5d   :  { %v404_v33 = vadd.f32 %v402_v51, %v398_v25  ;;  %v445_v43 = vadd.f32 %v443_v31, %v439_v19  ;;  %v446_v46 = vadd.f32 %v444_v10, %v440_v13  ;;  %v449_v30 = vmul.f32 %v448_v23, %v1268_v2  ;;  %s1599_s22 = sld [smem:[#allocation6 + $0x3]] }
  0x5e   :  { %v405_v47 = vadd.f32 %v403_v52, %v399_v36  ;;  %v432_v42 = vadd.f32 %v431_v28, %v428_v37  ;;  %v450_v24 = vmul.f32 %v448_v23, %v1280_v6  ;;  %v455_v44 = vmul.f32 %v454_v41, %v1274_v4  ;;  %s1603_s23 = sld [smem:[#allocation5 + $0x180]] }
  0x5f   :  { %v408_v53 = vadd.f32 %v407_v50, %v404_v33  ;;  %v451_v55 = vadd.f32 %v449_v30, %v445_v43  ;;  %v456_v51 = vmul.f32 %v454_v41, %v1284_v8  ;;  %v460_v56 = vstv %s1561_s14  ;;  %s1607_s24 = sld [smem:[#allocation5 + $0x181]] }
  0x60   :  { %v409_v57 = vadd.f32 %v407_v50, %v405_v47  ;;  %v452_v60 = vadd.f32 %v450_v24, %v446_v46  ;;  %v461_v52 = vmul.f32 %v460_v56, %v1290_v12  ;;  %v462_v32 = vmul.f32 %v460_v56, %v1296_v16  ;;  %s1611_s25 = sld [smem:[#allocation5 + $0x182]] }
  0x61   :  { %v412_v61 = vrot.slane %v408_v53, 1  ;;  %v457_v62 = vadd.f32 %v455_v44, %v451_v55  ;;  %v466_v63 = vstv %s1566_s4  ;;  %v472_v9 = vstv %s1570_s15  ;;  %s1616_s26 = sld [smem:[#allocation5 + $0x183]] }
  0x62   :  { %v410_v15 = vmax.f32 %v408_v53, %v409_v57  ;;  %v458_v17 = vadd.f32 %v456_v51, %v452_v60  ;;  %v467_v50 = vmul.f32 %v466_v63, %v1304_v21  ;;  %v468_v18 = vmul.f32 %v466_v63, %v1310_v26  ;;  %s1620_s27 = sld [smem:[#allocation8 + $0x200]] }
  0x63   :  { %v463_v11 = vadd.f32 %v461_v52, %v457_v62  ;;  %v473_v27 = vmul.f32 %v472_v9, %v1302_v20  ;;  %v474_v28 = vmul.f32 %v472_v9, %v1324_v35  ;;  %v478_v19 = vstv %s1575_s16  ;;  %s1625_s28 = sld [smem:[#allocation8 + $0x201]] }
  0x64   :  { %v414_v25 = vmax.f32 %v410_v15, %v412_v61  ;;  %v464_v13 = vadd.f32 %v462_v32, %v458_v17  ;;  %v479_v31 = vmul.f32 %v478_v19, %v1316_v29  ;;  %v480_v10 = vmul.f32 %v478_v19, %v1334_v40  ;;  %s1629_s29 = sld [smem:[#allocation8 + $0x202]] }
  0x65   :  { %v469_v36 = vadd.f32 %v467_v50, %v463_v11  ;;  %v484_v37 = vstv %s1579_s17  ;;  %v490_v23 = vstv %s1584_s18  ;;  %v496_v41 = vstv %s1588_s19  ;;  %s1636_s30 = sld [smem:[#allocation8 + $0x203]] }
  0x66   :  { %v433_v33 = vadd.f32 %v432_v42, %v414_v25  ;;  %v470_v43 = vadd.f32 %v468_v18, %v464_v13  ;;  %v485_v46 = vmul.f32 %v484_v37, %v1322_v34  ;;  %v486_v30 = vmul.f32 %v484_v37, %v1348_v49  ;;  %s1641_s6 = sld [smem:[#allocation8 + $0x204]] }
  0x67   :  { %v475_v47 = vadd.f32 %v473_v27, %v469_v36  ;;  %v491_v24 = vmul.f32 %v490_v23, %v1330_v38  ;;  %v492_v44 = vmul.f32 %v490_v23, %v1340_v45  ;;  %v497_v53 = vmul.f32 %v496_v41, %v1332_v39  ;;  %s1649_s8 = sld [smem:[#allocation8 + $0x205]] }
  0x68   :  { %v434_v55 = vmax.f32 %v433_v33, 0.0  ;;  %v476_v42 = vadd.f32 %v474_v28, %v470_v43  ;;  %v498_v51 = vmul.f32 %v496_v41, %v1354_v54  ;;  %v502_v56 = vstv %s1591_s20  ;;  %s1654_s9 = sld [smem:[#allocation8 + $0x206]] }
  0x69   :  { %v481_v57 = vadd.f32 %v479_v31, %v475_v47  ;;  %v503_v60 = vmul.f32 %v502_v56, %v1346_v48  ;;  %v504_v52 = vmul.f32 %v502_v56, %v1361_v58  ;;  %v508_v32 = vstv %s1595_s21  ;;  %s1659_s0 = sld [smem:[#allocation8 + $0x207]] }
  0x6a   :  { %1001 = vst [vmem:[%s2053_s5 + $0x10] sm:$0x3f] %v434_v55  ;;  %v482_v61 = vadd.f32 %v480_v10, %v476_v42  ;;  %v518_v62 = vstv %s1603_s23  ;;  %v520_v63 = vstv %s1599_s22  ;;  %v523_v9 = vstv %s1607_s24  ;;  %s1663_s10 = sld [smem:[#allocation8 + $0x208]] }
  0x6b   :  { %v487_v15 = vadd.f32 %v485_v46, %v481_v57  ;;  %v519_v17 = vmul.f32 %v518_v62, %v1363_v59  ;;  %v524_v50 = vmul.f32 %v523_v9, %v1369_v7  ;;  %v527_v18 = vstv %s1611_s25  ;;  %s1668_s11 = sld [smem:[#allocation8 + $0x209]] }
  0x6c   :  { %v488_v11 = vadd.f32 %v486_v30, %v482_v61  ;;  %v528_v27 = vmul.f32 %v527_v18, %v1377_v14  ;;  %v531_v28 = vstv %s1616_s26  ;;  %v539_v19 = vstv %s1620_s27  ;;  %s1672_s12 = sld [smem:[#allocation8 + $0x20a]] }
  0x6d   :  { %v493_v25 = vadd.f32 %v491_v24, %v487_v15  ;;  %v521_v13 = vadd.f32 %v520_v63, %v519_v17  ;;  %v532_v31 = vmul.f32 %v531_v28, %v1383_v22  ;;  %v540_v10 = vmul.f32 %v539_v19, %v1264_v0  ;;  %s1677_s13 = sld [smem:[#allocation8 + $0x20b]] }
  0x6e   :  { %v494_v36 = vadd.f32 %v492_v44, %v488_v11  ;;  %v541_v37 = vmul.f32 %v539_v19, %v1270_v3  ;;  %v543_v23 = vstv %s1625_s28  ;;  %v549_v41 = vstv %s1629_s29  ;;  %s1679_s1 = sld [smem:[#allocation9 + $0x4]] }
  0x6f   :  { %v499_v33 = vadd.f32 %v497_v53, %v493_v25  ;;  %v525_v43 = vadd.f32 %v524_v50, %v521_v13  ;;  %v544_v46 = vmul.f32 %v543_v23, %v1266_v1  ;;  %v545_v30 = vmul.f32 %v543_v23, %v1276_v5  ;;  %s1684_s3 = sld [smem:[#allocation6 + $0x4]] }
  0x70   :  { %v500_v47 = vadd.f32 %v498_v51, %v494_v36  ;;  %v550_v0 = vmul.f32 %v549_v41, %v1268_v2  ;;  %v551_v24 = vmul.f32 %v549_v41, %v1280_v6  ;;  %v555_v44 = vstv %s1636_s30  ;;  %s1686_s14 = sld [smem:[#allocation5 + $0x200]] }
  0x71   :  { %v505_v55 = vadd.f32 %v503_v60, %v499_v33  ;;  %v529_v42 = vadd.f32 %v528_v27, %v525_v43  ;;  %v546_v56 = vadd.f32 %v544_v46, %v540_v10  ;;  %v547_v53 = vadd.f32 %v545_v30, %v541_v37  ;;  %s1691_s4 = sld [smem:[#allocation5 + $0x201]] }
  0x72   :  { %v506_v1 = vadd.f32 %v504_v52, %v500_v47  ;;  %v556_v57 = vmul.f32 %v555_v44, %v1274_v4  ;;  %v557_v61 = vmul.f32 %v555_v44, %v1284_v8  ;;  %v561_v51 = vstv %s1641_s6  ;;  %s1694_s15 = sld [smem:[#allocation5 + $0x202]] }
  0x73   :  { %v509_v2 = vadd.f32 %v508_v32, %v505_v55  ;;  %v533_v6 = vadd.f32 %v532_v31, %v529_v42  ;;  %v552_v62 = vadd.f32 %v550_v0, %v546_v56  ;;  %v553_v60 = vadd.f32 %v551_v24, %v547_v53  ;;  %s1699_s16 = sld [smem:[#allocation5 + $0x203]] }
  0x74   :  { %v510_v63 = vadd.f32 %v508_v32, %v506_v1  ;;  %v562_v9 = vmul.f32 %v561_v51, %v1290_v12  ;;  %v563_v52 = vmul.f32 %v561_v51, %v1296_v16  ;;  %v567_v15 = vstv %s1649_s8  ;;  %s1703_s17 = sld [smem:[#allocation8 + $0x280]] }
  0x75   :  { %v513_v4 = vrot.slane %v509_v2, 1  ;;  %v558_v8 = vadd.f32 %v556_v57, %v552_v62  ;;  %v559_v17 = vadd.f32 %v557_v61, %v553_v60  ;;  %v568_v50 = vmul.f32 %v567_v15, %v1304_v21  ;;  %s1707_s18 = sld [smem:[#allocation8 + $0x281]] }
  0x76   :  { %v511_v18 = vmax.f32 %v509_v2, %v510_v63  ;;  %v569_v11 = vmul.f32 %v567_v15, %v1310_v26  ;;  %v573_v27 = vstv %s1654_s9  ;;  %v579_v32 = vstv %s1659_s0  ;;  %s1714_s19 = sld [smem:[#allocation8 + $0x282]] }
  0x77   :  { %v564_v12 = vadd.f32 %v562_v9, %v558_v8  ;;  %v565_v16 = vadd.f32 %v563_v52, %v559_v17  ;;  %v574_v28 = vmul.f32 %v573_v27, %v1302_v20  ;;  %v575_v19 = vmul.f32 %v573_v27, %v1324_v35  ;;  %s1718_s20 = sld [smem:[#allocation8 + $0x283]]  ;;  %v1754_v9 = vld [vmem:[#allocation2 + $0x1] ss:$2 sm:$0x7f] }
  0x78   :  { %v515_v21 = vmax.f32 %v511_v18, %v513_v4  ;;  %v580_v25 = vmul.f32 %v579_v32, %v1316_v29  ;;  %v585_v13 = vstv %s1663_s10  ;;  %v581_v10 = vmul.f32 %v579_v32, %v1334_v40  ;;  %s1723_s21 = sld [smem:[#allocation8 + $0x284]] }
  0x79   :  { %v570_v26 = vadd.f32 %v568_v50, %v564_v12  ;;  %v571_v31 = vadd.f32 %v569_v11, %v565_v16  ;;  %v586_v36 = vmul.f32 %v585_v13, %v1322_v34  ;;  %v591_v23 = vstv %s1668_s11  ;;  %s1734_s24 = sld [smem:[#allocation8 + $0x285]]  ;;  %v1769_v12 = vld [vmem:[#allocation2 + $0x2] ss:$2 sm:$0x7f] }
  0x7a   :  { %v534_v37 = vadd.f32 %v533_v6, %v515_v21  ;;  %v597_v41 = vstv %s1672_s12  ;;  %v603_v20 = vstv %s1677_s13  ;;  %v587_v29 = vmul.f32 %v585_v13, %v1348_v49  ;;  %s1738_s25 = sld [smem:[#allocation8 + $0x286]] }
  0x7b   :  { %v576_v35 = vadd.f32 %v574_v28, %v570_v26  ;;  %v577_v33 = vadd.f32 %v575_v19, %v571_v31  ;;  %v592_v43 = vmul.f32 %v591_v23, %v1330_v38  ;;  %v593_v34 = vmul.f32 %v591_v23, %v1340_v45  ;;  %s1744_s26 = sld [smem:[#allocation8 + $0x287]]  ;;  %v1772_v28 = vld [vmem:[#allocation2 + $0x3] ss:$2 sm:$0x3f] }
  0x7c   :  { %v535_v46 = vmax.f32 %v534_v37, 0.0  ;;  %v598_v30 = vmul.f32 %v597_v41, %v1332_v39  ;;  %v599_v47 = vmul.f32 %v597_v41, %v1354_v54  ;;  %v604_v44 = vmul.f32 %v603_v20, %v1346_v48  ;;  %s1747_s27 = sld [smem:[#allocation8 + $0x288]]  ;;  %v1775_v19 = vld [vmem:[#allocation2 + $0x10] ss:$2 sm:$0x7f] }
  0x7d   :  { %v582_v0 = vadd.f32 %v580_v25, %v576_v35  ;;  %v583_v24 = vadd.f32 %v581_v10, %v577_v33  ;;  %v609_v38 = vstv %s1679_s1  ;;  %v605_v45 = vmul.f32 %v603_v20, %v1361_v58  ;;  %s1757_s28 = sld [smem:[#allocation8 + $0x289]]  ;;  %v1778_v25 = vld [vmem:[#allocation2 + $0x11] ss:$2 sm:$0x3f] }
  0x7e   :  { %1020 = vst [vmem:[%s2053_s5 + $0x18] sm:$0x3f] %v535_v46  ;;  %v619_v39 = vstv %s1686_s14  ;;  %v621_v55 = vstv %s1684_s3  ;;  %v624_v54 = vstv %s1691_s4  ;;  %s1760_s29 = sld [smem:[#allocation8 + $0x28a]]  ;;  %v1788_v20 = vld [vmem:[#allocation2 + $0x12] ss:$2 sm:$0x3f] }
  0x7f   :  { %v588_v42 = vadd.f32 %v586_v36, %v582_v0  ;;  %v589_v56 = vadd.f32 %v587_v29, %v583_v24  ;;  %v620_v53 = vmul.f32 %v619_v39, %v1363_v59  ;;  %v625_v1 = vmul.f32 %v624_v54, %v1369_v7  ;;  %v1750_v7 = vld [vmem:[#allocation2] ss:$2 sm:$0x7f]  ;;  %s1765_s30 = sld [smem:[#allocation8 + $0x28b]] }
  0x80   :  { %v628_v48 = vstv %s1694_s15  ;;  %v632_v57 = vstv %s1699_s16  ;;  %v640_v61 = vstv %s1703_s17  ;;  %v644_v51 = vstv %s1707_s18  ;;  %s1767_s6 = sld [smem:[#allocation9 + $0x5]]  ;;  %v1783_v36 = vld [vmem:[#allocation2 + $0x11] ss:$2 sm:$0x7f] }
  0x81   :  { %v594_v58 = vadd.f32 %v592_v43, %v588_v42  ;;  %v595_v2 = vadd.f32 %v593_v34, %v589_v56  ;;  %v622_v6 = vadd.f32 %v621_v55, %v620_v53  ;;  %v629_v62 = vmul.f32 %v628_v48, %v1377_v14  ;;  %s1781_s2 = sld [smem:[#allocation6 + $0x5]]  ;;  %v1794_v46 = vld [vmem:[#allocation2 + $0x12] ss:$2 sm:$0x7f] }
  0x82   :  { %v633_v59 = vmul.f32 %v632_v57, %v1383_v22  ;;  %v641_v60 = vmul.f32 %v1750_v7, %v640_v61  ;;  %v642_v63 = vmul.f32 %v640_v61, %v1270_v3  ;;  %v645_v52 = vmul.f32 %v1754_v9, %v644_v51  ;;  %s1786_s7 = sld [smem:[#allocation5 + $0x280]]  ;;  %v1806_v39 = vld [vmem:[#allocation2 + $0x20] ss:$2 sm:$0x7f] }
  0x83   :  { %v600_v15 = vadd.f32 %v598_v30, %v594_v58  ;;  %v601_v14 = vadd.f32 %v599_v47, %v595_v2  ;;  %v626_v4 = vadd.f32 %v625_v1, %v622_v6  ;;  %v646_v8 = vmul.f32 %v644_v51, %v1276_v5  ;;  %s1792_s8 = sld [smem:[#allocation5 + $0x281]]  ;;  %v1797_v30 = vld [vmem:[#allocation2 + $0x13] ss:$2 sm:$0x3f] }
  0x84   :  { %v647_v22 = vadd.f32 %v645_v52, %v641_v60  ;;  %v650_v17 = vstv %s1714_s19  ;;  %v656_v50 = vstv %s1718_s20  ;;  %v662_v18 = vstv %s1723_s21  ;;  %s1800_s9 = sld [smem:[#allocation5 + $0x282]]  ;;  %v1809_v54 = vld [vmem:[#allocation2 + $0x21] ss:$2 sm:$0x3f] }
  0x85   :  { %v606_v3 = vadd.f32 %v604_v44, %v600_v15  ;;  %v607_v11 = vadd.f32 %v605_v45, %v601_v14  ;;  %v630_v27 = vadd.f32 %v629_v62, %v626_v4  ;;  %v648_v32 = vadd.f32 %v646_v8, %v642_v63  ;;  %s1804_s0 = sld [smem:[#allocation5 + $0x283]]  ;;  %v1812_v56 = vld [vmem:[#allocation2 + $0x21] ss:$2 sm:$0x7f] }
  0x86   :  { %v651_v16 = vmul.f32 %v1769_v12, %v650_v17  ;;  %v652_v5 = vmul.f32 %v1772_v28, %v650_v17  ;;  %v657_v21 = vmul.f32 %v1775_v19, %v656_v50  ;;  %v658_v13 = vmul.f32 %v1778_v25, %v656_v50  ;;  %s1815_s10 = sld [smem:[#allocation8 + $0x300]]  ;;  %v1821_v58 = vld [vmem:[#allocation2 + $0x22] ss:$2 sm:$0x7f] }
  0x87   :  { %v610_v26 = vadd.f32 %v609_v38, %v606_v3  ;;  %v611_v31 = vadd.f32 %v609_v38, %v607_v11  ;;  %v634_v10 = vadd.f32 %v633_v59, %v630_v27  ;;  %v663_v37 = vmul.f32 %v1783_v36, %v662_v18  ;;  %s1819_s11 = sld [smem:[#allocation8 + $0x301]]  ;;  %v1828_v63 = vld [vmem:[#allocation2 + $0x30] ss:$2 sm:$0x7f] }
  0x88   :  { %v653_v23 = vadd.f32 %v651_v16, %v647_v22  ;;  %v654_v41 = vadd.f32 %v652_v5, %v648_v32  ;;  %v664_v35 = vmul.f32 %v1788_v20, %v662_v18  ;;  %v668_v33 = vstv %s1734_s24  ;;  %s1826_s12 = sld [smem:[#allocation8 + $0x302]]  ;;  %v1831_v52 = vld [vmem:[#allocation2 + $0x31] ss:$2 sm:$0x3f] }
  0x89   :  { %v612_v29 = vmax.f32 %v610_v26, %v611_v31  ;;  %v614_v43 = vrot.slane %v610_v26, 1  ;;  %v669_v34 = vmul.f32 %v1794_v46, %v668_v33  ;;  %v670_v47 = vmul.f32 %v1797_v30, %v668_v33  ;;  %s1834_s13 = sld [smem:[#allocation8 + $0x303]]  ;;  %v1841_v50 = vld [vmem:[#allocation2 + $0x31] ss:$2 sm:$0x7f] }
  0x8a   :  { %v659_v0 = vadd.f32 %v657_v21, %v653_v23  ;;  %v660_v24 = vadd.f32 %v658_v13, %v654_v41  ;;  %v674_v44 = vstv %s1738_s25  ;;  %v680_v38 = vstv %s1744_s26  ;;  %s1839_s1 = sld [smem:[#allocation8 + $0x304]]  ;;  %v1844_v3 = vld [vmem:[#allocation2 + $0x32] ss:$2 sm:$0x3f] }
  0x8b   :  { %v616_v45 = vmax.f32 %v612_v29, %v614_v43  ;;  %v675_v55 = vmul.f32 %v1806_v39, %v674_v44  ;;  %v676_v42 = vmul.f32 %v1809_v54, %v674_v44  ;;  %v681_v53 = vmul.f32 %v1812_v56, %v680_v38  ;;  %v1850_v27 = vld [vmem:[#allocation2 + $0x32] ss:$2 sm:$0x7f]  ;;  %v1853_v16 = vld [vmem:[#allocation2 + $0x33] ss:$2 sm:$0x3f] }
  0x8c   :  { %v665_v1 = vadd.f32 %v663_v37, %v659_v0  ;;  %v666_v48 = vadd.f32 %v664_v35, %v660_v24  ;;  %v682_v57 = vmul.f32 %v680_v38, %v1334_v40  ;;  %v686_v61 = vstv %s1747_s27  ;;  %s1862_s4 = sld [smem:[#allocation8 + $0x305]]  ;;  %v1864_v41 = vld [vmem:[#allocation2 + $0x14] ss:$2 sm:$0x3f] }
  0x8d   :  { %v635_v51 = vadd.f32 %v634_v10, %v616_v45  ;;  %v687_v2 = vmul.f32 %v1821_v58, %v686_v61  ;;  %v688_v6 = vmul.f32 %v686_v61, %v1348_v49  ;;  %v692_v62 = vstv %s1757_s28  ;;  %v1858_v10 = vld [vmem:[#allocation2 + $0x4] ss:$2 sm:$0x3f]  ;;  %s1870_s15 = sld [smem:[#allocation8 + $0x306]] }
  0x8e   :  { %v671_v59 = vadd.f32 %v669_v34, %v665_v1  ;;  %v672_v60 = vadd.f32 %v670_v47, %v666_v48  ;;  %v693_v40 = vmul.f32 %v1828_v63, %v692_v62  ;;  %v694_v15 = vmul.f32 %v1831_v52, %v692_v62  ;;  %v1872_v24 = vld [vmem:[#allocation2 + $0x24] ss:$2 sm:$0x3f]  ;;  %s1875_s16 = sld [smem:[#allocation8 + $0x307]] }
  0x8f   :  { %v636_v14 = vmax.f32 %v635_v51, 0.0  ;;  %v698_v4 = vstv %s1760_s29  ;;  %v704_v49 = vstv %s1765_s30  ;;  %v710_v8 = vstv %s1767_s6  ;;  %v1877_v38 = vld [vmem:[#allocation2 + $0x34] ss:$2 sm:$0x3f]  ;;  %s1885_s17 = sld [smem:[#allocation8 + $0x308]] }
  0x90   :  { %v677_v22 = vadd.f32 %v675_v55, %v671_v59  ;;  %v678_v17 = vadd.f32 %v676_v42, %v672_v60  ;;  %v699_v18 = vmul.f32 %v1841_v50, %v698_v4  ;;  %v700_v11 = vmul.f32 %v1844_v3, %v698_v4  ;;  %v1881_v42 = vld [vmem:[#allocation2 + $0x1] ss:$2 sm:$0x3f]  ;;  %s1888_s18 = sld [smem:[#allocation8 + $0x309]] }
  0x91   :  { %1039 = vst [vmem:[%s2053_s5 + $0x20] sm:$0x3f] %v636_v14  ;;  %v705_v32 = vmul.f32 %v1850_v27, %v704_v49  ;;  %v706_v5 = vmul.f32 %v1853_v16, %v704_v49  ;;  %v720_v21 = vstv %s1786_s7  ;;  %v722_v13 = vstv %s1781_s2  ;;  %s1896_s19 = sld [smem:[#allocation8 + $0x30a]] }
  0x92   :  { %v683_v26 = vadd.f32 %v681_v53, %v677_v22  ;;  %v684_v31 = vadd.f32 %v682_v57, %v678_v17  ;;  %v721_v37 = vmul.f32 %v1858_v10, %v720_v21  ;;  %v725_v23 = vstv %s1792_s8  ;;  %s1898_s20 = sld [smem:[#allocation8 + $0x30b]] }
  0x93   :  { %v726_v35 = vmul.f32 %v1864_v41, %v725_v23  ;;  %v729_v33 = vstv %s1800_s9  ;;  %v733_v29 = vstv %s1804_s0  ;;  %v741_v43 = vstv %s1815_s10  ;;  %s1903_s21 = sld [smem:[#allocation9 + $0x6]] }
  0x94   :  { %v689_v34 = vadd.f32 %v687_v2, %v683_v26  ;;  %v690_v47 = vadd.f32 %v688_v6, %v684_v31  ;;  %v723_v0 = vadd.f32 %v722_v13, %v721_v37  ;;  %v730_v44 = vmul.f32 %v1872_v24, %v729_v33  ;;  %v1890_v2 = vld [vmem:[#allocation2 + $0x2] ss:$2 sm:$0x3f]  ;;  %s1906_s22 = sld [smem:[#allocation6 + $0x6]] }
  0x95   :  { %v734_v45 = vmul.f32 %v1877_v38, %v733_v29  ;;  %v742_v55 = vmul.f32 %v1750_v7, %v741_v43  ;;  %v743_v53 = vmul.f32 %v1881_v42, %v741_v43  ;;  %v745_v1 = vstv %s1819_s11  ;;  %s1910_s23 = sld [smem:[#allocation5 + $0x300]] }
  0x96   :  { %v695_v48 = vadd.f32 %v693_v40, %v689_v34  ;;  %v696_v57 = vadd.f32 %v694_v15, %v690_v47  ;;  %v727_v61 = vadd.f32 %v726_v35, %v723_v0  ;;  %v746_v51 = vmul.f32 %v1754_v9, %v745_v1  ;;  %s1918_s24 = sld [smem:[#allocation5 + $0x301]] }
  0x97   :  { %v747_v6 = vmul.f32 %v1890_v2, %v745_v1  ;;  %v751_v62 = vstv %s1826_s12  ;;  %v757_v59 = vstv %s1834_s13  ;;  %v763_v60 = vstv %s1839_s1  ;;  %s1922_s25 = sld [smem:[#allocation5 + $0x302]] }
  0x98   :  { %v701_v14 = vadd.f32 %v699_v18, %v695_v48  ;;  %v702_v4 = vadd.f32 %v700_v11, %v696_v57  ;;  %v731_v49 = vadd.f32 %v730_v44, %v727_v61  ;;  %v748_v22 = vadd.f32 %v746_v51, %v742_v55  ;;  %s1926_s26 = sld [smem:[#allocation5 + $0x303]] }
  0x99   :  { %v749_v40 = vadd.f32 %v747_v6, %v743_v53  ;;  %v752_v15 = vmul.f32 %v1769_v12, %v751_v62  ;;  %v753_v17 = vmul.f32 %v1772_v28, %v751_v62  ;;  %v758_v21 = vmul.f32 %v1775_v19, %v757_v59  ;;  %s1930_s27 = sld [smem:[#allocation8 + $0x380]]  ;;  %v1933_v6 = vld [vmem:[#allocation2 + $0x22] ss:$2 sm:$0x3f] }
  0x9a   :  { %v707_v13 = vadd.f32 %v705_v32, %v701_v14  ;;  %v708_v18 = vadd.f32 %v706_v5, %v702_v4  ;;  %v735_v11 = vadd.f32 %v734_v45, %v731_v49  ;;  %v759_v26 = vmul.f32 %v1778_v25, %v757_v59  ;;  %s1937_s28 = sld [smem:[#allocation8 + $0x381]]  ;;  %v1939_v4 = vld [vmem:[#allocation2 + $0x23] ss:$2 sm:$0x3f] }
  0x9b   :  { %v754_v31 = vadd.f32 %v752_v15, %v748_v22  ;;  %v755_v37 = vadd.f32 %v753_v17, %v749_v40  ;;  %v764_v23 = vmul.f32 %v1783_v36, %v763_v60  ;;  %v765_v35 = vmul.f32 %v1788_v20, %v763_v60  ;;  %s1946_s29 = sld [smem:[#allocation8 + $0x382]] }
  0x9c   :  { %v711_v33 = vadd.f32 %v710_v8, %v707_v13  ;;  %v712_v29 = vadd.f32 %v710_v8, %v708_v18  ;;  %v769_v32 = vstv %s1862_s4  ;;  %v775_v5 = vstv %s1870_s15  ;;  %s1950_s30 = sld [smem:[#allocation8 + $0x383]] }
  0x9d   :  { %v760_v43 = vadd.f32 %v758_v21, %v754_v31  ;;  %v761_v34 = vadd.f32 %v759_v26, %v755_v37  ;;  %v770_v47 = vmul.f32 %v1794_v46, %v769_v32  ;;  %v771_v0 = vmul.f32 %v1797_v30, %v769_v32  ;;  %s1964_s7 = sld [smem:[#allocation8 + $0x384]] }
  0x9e   :  { %v713_v44 = vmax.f32 %v711_v33, %v712_v29  ;;  %v715_v45 = vrot.slane %v711_v33, 1  ;;  %v776_v55 = vmul.f32 %v1806_v39, %v775_v5  ;;  %v777_v8 = vmul.f32 %v1809_v54, %v775_v5  ;;  %s1968_s8 = sld [smem:[#allocation8 + $0x385]] }
  0x9f   :  { %v766_v53 = vadd.f32 %v764_v23, %v760_v43  ;;  %v767_v1 = vadd.f32 %v765_v35, %v761_v34  ;;  %v781_v48 = vstv %s1875_s16  ;;  %v787_v57 = vstv %s1885_s17  ;;  %s1973_s9 = sld [smem:[#allocation8 + $0x386]] }
  0xa0   :  { %v717_v61 = vmax.f32 %v713_v44, %v715_v45  ;;  %v782_v51 = vmul.f32 %v1812_v56, %v781_v48  ;;  %v783_v62 = vmul.f32 %v1933_v6, %v781_v48  ;;  %v788_v59 = vmul.f32 %v1821_v58, %v787_v57  ;;  %s1980_s0 = sld [smem:[#allocation8 + $0x387]] }
  0xa1   :  { %v772_v60 = vadd.f32 %v770_v47, %v766_v53  ;;  %v773_v14 = vadd.f32 %v771_v0, %v767_v1  ;;  %v789_v49 = vmul.f32 %v1939_v4, %v787_v57  ;;  %v793_v22 = vstv %s1888_s18  ;;  %s1984_s10 = sld [smem:[#allocation8 + $0x388]] }
  0xa2   :  { %v736_v40 = vadd.f32 %v735_v11, %v717_v61  ;;  %v794_v15 = vmul.f32 %v1828_v63, %v793_v22  ;;  %v795_v17 = vmul.f32 %v1831_v52, %v793_v22  ;;  %v799_v21 = vstv %s1896_s19  ;;  %s1987_s11 = sld [smem:[#allocation8 + $0x389]] }
  0xa3   :  { %v778_v13 = vadd.f32 %v776_v55, %v772_v60  ;;  %v779_v18 = vadd.f32 %v777_v8, %v773_v14  ;;  %v800_v26 = vmul.f32 %v1841_v50, %v799_v21  ;;  %v801_v31 = vmul.f32 %v1844_v3, %v799_v21  ;;  %s1991_s12 = sld [smem:[#allocation8 + $0x38a]] }
  0xa4   :  { %v737_v37 = vmax.f32 %v736_v40, 0.0  ;;  %v805_v11 = vstv %s1898_s20  ;;  %v811_v23 = vstv %s1903_s21  ;;  %v821_v35 = vstv %s1910_s23  ;;  %s1995_s13 = sld [smem:[#allocation8 + $0x38b]] }
  0xa5   :  { %v784_v33 = vadd.f32 %v782_v51, %v778_v13  ;;  %v785_v29 = vadd.f32 %v783_v62, %v779_v18  ;;  %v806_v32 = vmul.f32 %v1850_v27, %v805_v11  ;;  %v807_v5 = vmul.f32 %v1853_v16, %v805_v11  ;;  %s1998_s1 = sld [smem:[#allocation6 + $0x7]] }
  0xa6   :  { %1058 = vst [vmem:[%s2053_s5 + $0x28] sm:$0x3f] %v737_v37  ;;  %v822_v43 = vmul.f32 %v1858_v10, %v821_v35  ;;  %v823_v34 = vstv %s1906_s22  ;;  %v826_v47 = vstv %s1918_s24  ;;  %v830_v0 = vstv %s1922_s25  ;;  %s2003_s3 = sld [smem:[#allocation5 + $0x380]] }
  0xa7   :  { %v790_v44 = vadd.f32 %v788_v59, %v784_v33  ;;  %v791_v45 = vadd.f32 %v789_v49, %v785_v29  ;;  %v827_v55 = vmul.f32 %v1864_v41, %v826_v47  ;;  %v831_v8 = vmul.f32 %v1872_v24, %v830_v0  ;;  %s2006_s14 = sld [smem:[#allocation5 + $0x381]] }
  0xa8   :  { %v824_v53 = vadd.f32 %v823_v34, %v822_v43  ;;  %v834_v1 = vstv %s1926_s26  ;;  %v842_v48 = vstv %s1930_s27  ;;  %v846_v57 = vstv %s1937_s28  ;;  %s2011_s4 = sld [smem:[#allocation5 + $0x382]] }
  0xa9   :  { %v796_v61 = vadd.f32 %v794_v15, %v790_v44  ;;  %v797_v51 = vadd.f32 %v795_v17, %v791_v45  ;;  %v835_v62 = vmul.f32 %v1877_v38, %v834_v1  ;;  %v843_v59 = vmul.f32 %v1750_v7, %v842_v48  ;;  %s2020_s15 = sld [smem:[#allocation5 + $0x383]] }
  0xaa   :  { %v828_v60 = vadd.f32 %v827_v55, %v824_v53  ;;  %v844_v14 = vmul.f32 %v1881_v42, %v842_v48  ;;  %v847_v49 = vmul.f32 %v1754_v9, %v846_v57  ;;  %v848_v22 = vmul.f32 %v1890_v2, %v846_v57  ;;  %s2023_s16 = sld [smem:[#allocation9 + $0x7]] }
  0xab   :  { %v802_v40 = vadd.f32 %v800_v26, %v796_v61  ;;  %v803_v21 = vadd.f32 %v801_v31, %v797_v51  ;;  %v852_v13 = vstv %s1946_s29  ;;  %v858_v18 = vstv %s1950_s30 }
  0xac   :  { %v832_v15 = vadd.f32 %v831_v8, %v828_v60  ;;  %v849_v17 = vadd.f32 %v847_v49, %v843_v59  ;;  %v850_v37 = vadd.f32 %v848_v22, %v844_v14  ;;  %v853_v7 = vmul.f32 %v1769_v12, %v852_v13 }
  0xad   :  { %v808_v42 = vadd.f32 %v806_v32, %v802_v40  ;;  %v809_v9 = vadd.f32 %v807_v5, %v803_v21  ;;  %v854_v2 = vmul.f32 %v1772_v28, %v852_v13  ;;  %v859_v26 = vmul.f32 %v1775_v19, %v858_v18 }
  0xae   :  { %v836_v31 = vadd.f32 %v835_v62, %v832_v15  ;;  %v855_v11 = vadd.f32 %v853_v7, %v849_v17  ;;  %v860_v35 = vmul.f32 %v1778_v25, %v858_v18  ;;  %v864_v33 = vstv %s1964_s7 }
  0xaf   :  { %v812_v12 = vadd.f32 %v811_v23, %v808_v42  ;;  %v813_v29 = vadd.f32 %v811_v23, %v809_v9  ;;  %v856_v43 = vadd.f32 %v854_v2, %v850_v37  ;;  %v865_v32 = vmul.f32 %v1783_v36, %v864_v33 }
  0xb0   :  { %v861_v28 = vadd.f32 %v859_v26, %v855_v11  ;;  %v866_v5 = vmul.f32 %v1788_v20, %v864_v33  ;;  %v870_v19 = vstv %s1968_s8  ;;  %v876_v34 = vstv %s1973_s9 }
  0xb1   :  { %v814_v25 = vmax.f32 %v812_v12, %v813_v29  ;;  %v816_v47 = vrot.slane %v812_v12, 1  ;;  %v862_v0 = vadd.f32 %v860_v35, %v856_v43  ;;  %v871_v44 = vmul.f32 %v1794_v46, %v870_v19 }
  0xb2   :  { %v867_v36 = vadd.f32 %v865_v32, %v861_v28  ;;  %v872_v23 = vmul.f32 %v1797_v30, %v870_v19  ;;  %v877_v20 = vmul.f32 %v1806_v39, %v876_v34  ;;  %v878_v45 = vmul.f32 %v1809_v54, %v876_v34 }
  0xb3   :  { %v818_v55 = vmax.f32 %v814_v25, %v816_v47  ;;  %v868_v8 = vadd.f32 %v866_v5, %v862_v0  ;;  %v882_v53 = vstv %s1980_s0  ;;  %v888_v1 = vstv %s1984_s10 }
  0xb4   :  { %v873_v48 = vadd.f32 %v871_v44, %v867_v36  ;;  %v883_v46 = vmul.f32 %v1812_v56, %v882_v53  ;;  %v884_v51 = vmul.f32 %v1933_v6, %v882_v53  ;;  %v894_v30 = vstv %s1987_s11 }
  0xb5   :  { %v837_v57 = vadd.f32 %v836_v31, %v818_v55  ;;  %v874_v61 = vadd.f32 %v872_v23, %v868_v8  ;;  %v889_v39 = vmul.f32 %v1821_v58, %v888_v1  ;;  %v900_v54 = vstv %s1991_s12 }
  0xb6   :  { %v879_v62 = vadd.f32 %v877_v20, %v873_v48  ;;  %v890_v56 = vmul.f32 %v1939_v4, %v888_v1  ;;  %v895_v6 = vmul.f32 %v1828_v63, %v894_v30  ;;  %v896_v49 = vmul.f32 %v1831_v52, %v894_v30 }
  0xb7   :  { %v838_v59 = vmax.f32 %v837_v57, 0.0  ;;  %v880_v60 = vadd.f32 %v878_v45, %v874_v61  ;;  %v922_v22 = vstv %s2003_s3  ;;  %v901_v40 = vmul.f32 %v1841_v50, %v900_v54 }
  0xb8   :  { %v885_v14 = vadd.f32 %v883_v46, %v879_v62  ;;  %v906_v21 = vstv %s1995_s13  ;;  %v923_v13 = vmul.f32 %v1858_v10, %v922_v22  ;;  %v924_v18 = vstv %s1998_s1 }
  0xb9   :  { %1077 = vst [vmem:[%s2053_s5 + $0x30] sm:$0x3f] %v838_v59  ;;  %v886_v58 = vadd.f32 %v884_v51, %v880_v60  ;;  %v927_v15 = vstv %s2006_s14  ;;  %v931_v17 = vstv %s2011_s4  ;;  %v902_v52 = vmul.f32 %v1844_v3, %v900_v54 }
  0xba   :  { %v891_v4 = vadd.f32 %v889_v39, %v885_v14  ;;  %v925_v37 = vadd.f32 %v924_v18, %v923_v13  ;;  %v928_v7 = vmul.f32 %v1864_v41, %v927_v15  ;;  %v907_v9 = vmul.f32 %v1850_v27, %v906_v21 }
  0xbb   :  { %v892_v63 = vadd.f32 %v890_v56, %v886_v58  ;;  %v908_v50 = vmul.f32 %v1853_v16, %v906_v21  ;;  %v932_v10 = vmul.f32 %v1872_v24, %v931_v17  ;;  %v935_v11 = vstv %s2020_s15 }
  0xbc   :  { %v897_v42 = vadd.f32 %v895_v6, %v891_v4  ;;  %v929_v26 = vadd.f32 %v928_v7, %v925_v37  ;;  %v912_v33 = vstv %s2023_s16  ;;  %v936_v3 = vmul.f32 %v1877_v38, %v935_v11 }
  0xbd   :  { %v898_v2 = vadd.f32 %v896_v49, %v892_v63 }
  0xbe   :  { %v903_v31 = vadd.f32 %v901_v40, %v897_v42  ;;  %v933_v43 = vadd.f32 %v932_v10, %v929_v26 }
  0xbf   :  { %v904_v35 = vadd.f32 %v902_v52, %v898_v2 }
  0xc0   :  { %v909_v12 = vadd.f32 %v907_v9, %v903_v31  ;;  %v937_v27 = vadd.f32 %v936_v3, %v933_v43 }
  0xc1   :  { %v910_v29 = vadd.f32 %v908_v50, %v904_v35 }
  0xc2   :  { %v913_v32 = vadd.f32 %v912_v33, %v909_v12 }
  0xc3   :  { %v914_v41 = vadd.f32 %v912_v33, %v910_v29 }
  0xc4   :  { %v917_v28 = vrot.slane %v913_v32, 1 }
  0xc5   :  { %v915_v5 = vmax.f32 %v913_v32, %v914_v41 }
  0xc7   :  { %v919_v19 = vmax.f32 %v915_v5, %v917_v28 }
  0xc9   :  { %v938_v34 = vadd.f32 %v937_v27, %v919_v19 }
  0xcb   :  { %v939_v16 = vmax.f32 %v938_v34, 0.0 }
  0xcd   :  { %1096 = vst [vmem:[%s2053_s5 + $0x38] sm:$0x3f] %v939_v16 }
  0xce   :  { %946 = vsyncpa [#allocation3], 1 }
  0xcf   :  { %947 = vsyncpa [#allocation4], 1 }
  0xd0   :  { %948 = vsyncpa [#allocation7], 1 }
  0xd1   :  { %949 = vsyncpa [#allocation10], 1 }

</bundles_post_ra>
